<compile_context>
chip_gen: v5e
topology: v5e:2x2
jax: 0.10.0
libtpu: 0.0.40
codegen_flags: <defaults>
</compile_context>

<pallas_src>
import functools

import jax
import jax.numpy as jnp
from jax.experimental import pallas as pl
from jax.experimental.pallas import tpu as pltpu

EPS = 1e-5


def _pick_tile(m):
    """Largest row-tile (multiple of 8) that evenly divides m."""
    for tm in (2048, 1024, 512, 256, 128, 64, 32, 16, 8):
        if m % tm == 0:
            return tm
    return m


_PARALLEL1 = pltpu.CompilerParams(dimension_semantics=("parallel",))


# ---------------- K1 / K3: 3x3 conv (shift-and-matmul) + BN partial stats ----------------
def _conv3x3_stats_kernel(xp_ref, w_ref, y_ref, st_ref):
    # xp_ref: (H+2, W+2, Cin) bf16 (halo'd sample), w_ref: (9, Cin, Cout) bf16 (resident)
    # y_ref : (H*W, Cout) f32,  st_ref: (2, Cout) f32  [row0 = sum, row1 = sum of squares]
    hp, wp, cin = xp_ref.shape
    h, w = hp - 2, wp - 2
    cout = y_ref.shape[-1]
    acc = jnp.zeros((h * w, cout), jnp.float32)
    for ky in range(3):
        for kx in range(3):
            patch = xp_ref[ky:ky + h, kx:kx + w, :].reshape(h * w, cin)
            acc = acc + jnp.dot(patch, w_ref[ky * 3 + kx],
                                preferred_element_type=jnp.float32)
    y_ref[...] = acc
    st_ref[0:1, :] = jnp.sum(acc, axis=0, keepdims=True)
    st_ref[1:2, :] = jnp.sum(acc * acc, axis=0, keepdims=True)


def conv3x3_stats(xp, w):
    n, hp, wp, cin = xp.shape
    h, wd = hp - 2, wp - 2
    cout = w.shape[-1]
    return pl.pallas_call(
        _conv3x3_stats_kernel,
        grid=(n,),
        in_specs=[
            pl.BlockSpec((None, hp, wp, cin), lambda i: (i, 0, 0, 0)),
            pl.BlockSpec((9, cin, cout), lambda i: (0, 0, 0)),      # weights stay resident
        ],
        out_specs=(
            pl.BlockSpec((None, h * wd, cout), lambda i: (i, 0, 0)),
            pl.BlockSpec((None, 2, cout), lambda i: (i, 0, 0)),
        ),
        out_shape=(
            jax.ShapeDtypeStruct((n, h * wd, cout), jnp.float32),
            jax.ShapeDtypeStruct((n, 2, cout), jnp.float32),
        ),
        compiler_params=_PARALLEL1,
    )(xp, w)


# ---------------- K2: BN (batch stats) apply + ReLU, row-tiled ----------------
def _bn_relu_kernel(total, y_ref, st_ref, g_ref, b_ref, o_ref):
    tot = jnp.sum(st_ref[...], axis=0)                 # (2, C): global sum / sumsq
    mean = tot[0:1, :] / total
    var = tot[1:2, :] / total - mean * mean            # biased variance (training mode)
    scale = g_ref[...] * jax.lax.rsqrt(var + EPS)
    shift = b_ref[...] - mean * scale
    o_ref[...] = jnp.maximum(y_ref[...] * scale + shift, 0.0).astype(o_ref.dtype)


def bn_relu_apply(y2d, stats, gamma, beta, total):
    m, c = y2d.shape
    tm = _pick_tile(m)
    return pl.pallas_call(
        functools.partial(_bn_relu_kernel, float(total)),
        grid=(m // tm,),
        in_specs=[
            pl.BlockSpec((tm, c), lambda i: (i, 0)),
            pl.BlockSpec(stats.shape, lambda i: (0, 0, 0)),          # tiny, resident
            pl.BlockSpec((1, c), lambda i: (0, 0)),
            pl.BlockSpec((1, c), lambda i: (0, 0)),
        ],
        out_specs=pl.BlockSpec((tm, c), lambda i: (i, 0)),
        out_shape=jax.ShapeDtypeStruct((m, c), jnp.bfloat16),
        compiler_params=_PARALLEL1,
    )(y2d, stats, gamma, beta)


# ---------------- K4: BN2 apply + ChannelAttention gate + per-pixel avg/max ----------------
def _bn_ca_kernel(y_ref, st_ref, g_ref, b_ref, w1_ref, w2_ref, out_ref, pix_ref):
    hw = y_ref.shape[0]
    n = st_ref.shape[0]
    total = float(n * hw)
    tot = jnp.sum(st_ref[...], axis=0)                 # (2, C)
    mean = tot[0:1, :] / total
    var = tot[1:2, :] / total - mean * mean
    scale = g_ref[...] * jax.lax.rsqrt(var + EPS)
    shift = b_ref[...] - mean * scale
    y = y_ref[...] * scale + shift                     # (HW, C) f32, bn2 output

    # ChannelAttention: global avg/max pool -> fc1 -> relu -> fc2 (shared) -> sigmoid
    avg_c = jnp.mean(y, axis=0, keepdims=True)         # (1, C)
    max_c = jnp.max(y, axis=0, keepdims=True)          # (1, C)
    w1 = w1_ref[...]
    w2 = w2_ref[...]
    h_avg = jnp.maximum(jnp.dot(avg_c, w1, preferred_element_type=jnp.float32), 0.0)
    h_max = jnp.maximum(jnp.dot(max_c, w1, preferred_element_type=jnp.float32), 0.0)
    ca = jax.nn.sigmoid(jnp.dot(h_avg, w2, preferred_element_type=jnp.float32)
                        + jnp.dot(h_max, w2, preferred_element_type=jnp.float32))  # (1, C)

    out = y * ca                                        # lane-aligned broadcast over rows
    out_ref[...] = out
    # SpatialAttention inputs: per-pixel mean/max over channels (stats never 1-lane alone)
    pix_ref[:, 0:1] = jnp.mean(out, axis=1, keepdims=True)
    pix_ref[:, 1:2] = jnp.max(out, axis=1, keepdims=True)


def bn_ca(y2, stats, gamma, beta, w1, w2):
    n, hw, c = y2.shape
    r = w1.shape[1]
    return pl.pallas_call(
        _bn_ca_kernel,
        grid=(n,),
        in_specs=[
            pl.BlockSpec((None, hw, c), lambda i: (i, 0, 0)),
            pl.BlockSpec((n, 2, c), lambda i: (0, 0, 0)),
            pl.BlockSpec((1, c), lambda i: (0, 0)),
            pl.BlockSpec((1, c), lambda i: (0, 0)),
            pl.BlockSpec((c, r), lambda i: (0, 0)),
            pl.BlockSpec((r, c), lambda i: (0, 0)),
        ],
        out_specs=(
            pl.BlockSpec((None, hw, c), lambda i: (i, 0, 0)),
            pl.BlockSpec((None, hw, 2), lambda i: (i, 0, 0)),
        ),
        out_shape=(
            jax.ShapeDtypeStruct((n, hw, c), jnp.float32),
            jax.ShapeDtypeStruct((n, hw, 2), jnp.float32),
        ),
        compiler_params=_PARALLEL1,
    )(y2, stats, gamma, beta, w1, w2)


# ---------------- K5: 7x7 spatial-attention conv as a VPU tap-sum (no MXU) ----------------
def _sa_conv_kernel(sp_ref, w_ref, o_ref):
    # sp_ref: (2, H+6, W+6) f32 padded [avg, max] stats; w_ref: (98,) f32 in SMEM
    h, w = o_ref.shape
    acc = jnp.zeros((h, w), jnp.float32)
    for ky in range(7):
        for kx in range(7):
            t = ky * 7 + kx
            acc = acc + w_ref[t] * sp_ref[0, ky:ky + h, kx:kx + w]
            acc = acc + w_ref[49 + t] * sp_ref[1, ky:ky + h, kx:kx + w]
    o_ref[...] = jax.nn.sigmoid(acc)


def sa_conv(stats_p, sa_w):
    n, _, hp, wp = stats_p.shape
    h, w = hp - 6, wp - 6
    return pl.pallas_call(
        _sa_conv_kernel,
        grid=(n,),
        in_specs=[
            pl.BlockSpec((None, 2, hp, wp), lambda i: (i, 0, 0, 0)),
            pl.BlockSpec(memory_space=pltpu.MemorySpace.SMEM),       # 98 scalar tap weights
        ],
        out_specs=pl.BlockSpec((None, h, w), lambda i: (i, 0, 0)),
        out_shape=jax.ShapeDtypeStruct((n, h, w), jnp.float32),
        compiler_params=_PARALLEL1,
    )(stats_p, sa_w)


# ---------------- K6: spatial gate * out + residual + ReLU, row-tiled ----------------
def _gate_res_kernel(o3_ref, sa_ref, res_ref, out_ref):
    out_ref[...] = jnp.maximum(o3_ref[...] * sa_ref[...] + res_ref[...], 0.0)


def gate_res_relu(out3, sa, res):
    m, c = out3.shape
    tm = _pick_tile(m)
    return pl.pallas_call(
        _gate_res_kernel,
        grid=(m // tm,),
        in_specs=[
            pl.BlockSpec((tm, c), lambda i: (i, 0)),
            pl.BlockSpec((tm, 1), lambda i: (i, 0)),
            pl.BlockSpec((tm, c), lambda i: (i, 0)),
        ],
        out_specs=pl.BlockSpec((tm, c), lambda i: (i, 0)),
        out_shape=jax.ShapeDtypeStruct((m, c), jnp.float32),
        compiler_params=_PARALLEL1,
    )(out3, sa, res)


# ---------------- forward pass ----------------
def basic_block_forward(x_nchw, params):
    n, c, h, w = x_nchw.shape
    planes = params["w_conv1"].shape[-1]
    assert planes == c, "stride=1 / downsample=None requires inplanes == planes"

    x = jnp.transpose(x_nchw, (0, 2, 3, 1)).astype(jnp.float32)          # NHWC f32

    # conv1 (3x3, pad 1, no bias) + bn1 partial stats
    xp1 = jnp.pad(x, ((0, 0), (1, 1), (1, 1), (0, 0))).astype(jnp.bfloat16)
    y1, st1 = conv3x3_stats(xp1, params["w_conv1"])                      # (N, HW, P) f32

    # bn1 + relu (batch statistics), output bf16 for the next conv
    a1 = bn_relu_apply(y1.reshape(n * h * w, planes), st1,
                       params["g1"], params["b1"], n * h * w)            # (NHW, P) bf16

    # conv2 (3x3, pad 1, no bias) + bn2 partial stats
    a1p = jnp.pad(a1.reshape(n, h, w, planes), ((0, 0), (1, 1), (1, 1), (0, 0)))
    y2, st2 = conv3x3_stats(a1p, params["w_conv2"])                      # (N, HW, P) f32

    # bn2 + channel-attention gate + per-pixel channel avg/max stats
    out3, pix = bn_ca(y2, st2, params["g2"], params["b2"],
                      params["ca_w1"], params["ca_w2"])                  # (N,HW,P), (N,HW,2)

    # spatial attention: pad tiny stats, 7x7 conv + sigmoid on the VPU
    stats = jnp.transpose(pix, (0, 2, 1)).reshape(n, 2, h, w)
    stats_p = jnp.pad(stats, ((0, 0), (0, 0), (3, 3), (3, 3)))
    sa = sa_conv(stats_p, params["sa_w"])                                # (N, H, W)

    # sa(out)*out + residual, final relu
    out = gate_res_relu(out3.reshape(n * h * w, planes),
                        sa.reshape(n * h * w, 1),
                        x.reshape(n * h * w, c))

    return jnp.transpose(out.reshape(n, h, w, planes), (0, 3, 1, 2))     # back to NCHW


def make_params(key, inplanes, planes):
    ks = jax.random.split(key, 9)
    ratio = max(planes // 16, 1)
    w1 = jax.random.normal(ks[0], (3, 3, inplanes, planes), jnp.float32) * 0.1
    w2 = jax.random.normal(ks[1], (3, 3, planes, planes), jnp.float32) * 0.1
    return {
        # conv weights in (tap, Cin, Cout) order, bf16 for the MXU (f32 accumulation)
        "w_conv1": w1.reshape(9, inplanes, planes).astype(jnp.bfloat16),
        "w_conv2": w2.reshape(9, planes, planes).astype(jnp.bfloat16),
        "g1": jax.random.uniform(ks[2], (1, planes), jnp.float32, 0.5, 1.5),
        "b1": jax.random.normal(ks[3], (1, planes), jnp.float32) * 0.1,
        "g2": jax.random.uniform(ks[4], (1, planes), jnp.float32, 0.5, 1.5),
        "b2": jax.random.normal(ks[5], (1, planes), jnp.float32) * 0.1,
        "ca_w1": jax.random.normal(ks[6], (planes, ratio), jnp.float32) * 0.2,
        "ca_w2": jax.random.normal(ks[7], (ratio, planes), jnp.float32) * 0.2,
        # SpatialAttention 7x7 weight, flattened [channel(avg,max), ky, kx]
        "sa_w": jax.random.normal(ks[8], (98,), jnp.float32) * 0.1,
    }


if __name__ == "__main__":
    # planes must be >= 16 so planes // 16 >= 1 (as in the PyTorch module).
    N, C, H, W = 2, 16, 8, 8
    key = jax.random.PRNGKey(0)
    kx, kp = jax.random.split(key)
    x = jax.random.normal(kx, (N, C, H, W), jnp.float32)
    params = make_params(kp, C, C)

    out = jax.jit(basic_block_forward)(x, params)
    jax.block_until_ready(out)
    assert out.shape == (N, C, H, W), out.shape
    print("KERNEL_OK")
</pallas_src>

<mosaic_0001>
module attributes {stable_mosaic.version = 11 : i64} {
  func.func @_bn_ca_kernel(%arg0: i32, %arg1: memref<1x64x16xf32, #tpu.memory_space<vmem>>, %arg2: memref<2x2x16xf32, #tpu.memory_space<vmem>>, %arg3: memref<1x16xf32, #tpu.memory_space<vmem>>, %arg4: memref<1x16xf32, #tpu.memory_space<vmem>>, %arg5: memref<16x1xf32, #tpu.memory_space<vmem>>, %arg6: memref<1x16xf32, #tpu.memory_space<vmem>>, %arg7: memref<1x64x16xf32, #tpu.memory_space<vmem>>, %arg8: memref<1x64x2xf32, #tpu.memory_space<vmem>>) attributes {dimension_semantics = [#tpu.dimension_semantics<parallel>], iteration_bounds = array<i64: 2>, scalar_prefetch = 0 : i64, scratch_operands = 0 : i64, tpu.core_type = #tpu.core_type<tc>, window_params = [{transform_indices = @transform_0, window_bounds = array<i64: 1, 64, 16>}, {pipeline_mode = #tpu.pipeline_mode<synchronous>, transform_indices = @transform_1, window_bounds = array<i64: 2, 2, 16>}, {pipeline_mode = #tpu.pipeline_mode<synchronous>, transform_indices = @transform_2, window_bounds = array<i64: 1, 16>}, {pipeline_mode = #tpu.pipeline_mode<synchronous>, transform_indices = @transform_3, window_bounds = array<i64: 1, 16>}, {pipeline_mode = #tpu.pipeline_mode<synchronous>, transform_indices = @transform_4, window_bounds = array<i64: 16, 1>}, {pipeline_mode = #tpu.pipeline_mode<synchronous>, transform_indices = @transform_5, window_bounds = array<i64: 1, 16>}, {transform_indices = @transform_6, window_bounds = array<i64: 1, 64, 16>}, {transform_indices = @transform_7, window_bounds = array<i64: 1, 64, 2>}]} {
    %c0 = arith.constant 0 : index
    %c0_0 = arith.constant 0 : index
    %c0_1 = arith.constant 0 : index
    %0 = vector.load %arg2[%c0, %c0_0, %c0_1] : memref<2x2x16xf32, #tpu.memory_space<vmem>>, vector<2x2x16xf32>
    %cst = arith.constant dense<0.000000e+00> : vector<2x16xf32>
    %1 = vector.multi_reduction <add>, %0, %cst [0] : vector<2x2x16xf32> to vector<2x16xf32>
    %2 = vector.extract_strided_slice %1 {offsets = [0, 0], sizes = [1, 16], strides = [1, 1]} : vector<2x16xf32> to vector<1x16xf32>
    %cst_2 = arith.constant 1.280000e+02 : f32
    %3 = vector.broadcast %cst_2 : f32 to vector<1x16xf32>
    %4 = arith.divf %2, %3 : vector<1x16xf32>
    %5 = vector.extract_strided_slice %1 {offsets = [1, 0], sizes = [1, 16], strides = [1, 1]} : vector<2x16xf32> to vector<1x16xf32>
    %cst_3 = arith.constant 1.280000e+02 : f32
    %6 = vector.broadcast %cst_3 : f32 to vector<1x16xf32>
    %7 = arith.divf %5, %6 : vector<1x16xf32>
    %8 = arith.mulf %4, %4 : vector<1x16xf32>
    %9 = arith.subf %7, %8 : vector<1x16xf32>
    %c0_4 = arith.constant 0 : index
    %c0_5 = arith.constant 0 : index
    %10 = vector.load %arg3[%c0_4, %c0_5] : memref<1x16xf32, #tpu.memory_space<vmem>>, vector<1x16xf32>
    %cst_6 = arith.constant 9.99999974E-6 : f32
    %11 = vector.broadcast %cst_6 : f32 to vector<1x16xf32>
    %12 = arith.addf %9, %11 : vector<1x16xf32>
    %13 = math.rsqrt %12 : vector<1x16xf32>
    %14 = arith.mulf %10, %13 : vector<1x16xf32>
    %c0_7 = arith.constant 0 : index
    %c0_8 = arith.constant 0 : index
    %15 = vector.load %arg4[%c0_7, %c0_8] : memref<1x16xf32, #tpu.memory_space<vmem>>, vector<1x16xf32>
    %16 = arith.mulf %4, %14 : vector<1x16xf32>
    %17 = arith.subf %15, %16 : vector<1x16xf32>
    %c0_9 = arith.constant 0 : index
    %c0_10 = arith.constant 0 : index
    %c0_11 = arith.constant 0 : index
    %18 = vector.load %arg1[%c0_9, %c0_10, %c0_11] : memref<1x64x16xf32, #tpu.memory_space<vmem>>, vector<1x64x16xf32>
    %19 = vector.shape_cast %18 : vector<1x64x16xf32> to vector<64x16xf32>
    %20 = vector.broadcast %14 : vector<1x16xf32> to vector<64x16xf32>
    %21 = arith.mulf %19, %20 : vector<64x16xf32>
    %22 = vector.broadcast %17 : vector<1x16xf32> to vector<64x16xf32>
    %23 = arith.addf %21, %22 : vector<64x16xf32>
    %cst_12 = arith.constant dense<0.000000e+00> : vector<16xf32>
    %24 = vector.multi_reduction <add>, %23, %cst_12 [0] : vector<64x16xf32> to vector<16xf32>
    %25 = vector.shape_cast %24 : vector<16xf32> to vector<1x16xf32>
    %cst_13 = arith.constant 6.400000e+01 : f32
    %26 = vector.broadcast %cst_13 : f32 to vector<1x16xf32>
    %27 = arith.divf %25, %26 : vector<1x16xf32>
    %cst_14 = arith.constant dense<0xFF800000> : vector<16xf32>
    %28 = vector.multi_reduction <maximumf>, %23, %cst_14 [0] : vector<64x16xf32> to vector<16xf32>
    %29 = vector.shape_cast %28 : vector<16xf32> to vector<1x16xf32>
    %c0_15 = arith.constant 0 : index
    %c0_16 = arith.constant 0 : index
    %30 = vector.load %arg5[%c0_15, %c0_16] : memref<16x1xf32, #tpu.memory_space<vmem>>, vector<16x1xf32>
    %c0_17 = arith.constant 0 : index
    %c0_18 = arith.constant 0 : index
    %31 = vector.load %arg6[%c0_17, %c0_18] : memref<1x16xf32, #tpu.memory_space<vmem>>, vector<1x16xf32>
    %cst_19 = arith.constant dense<0.000000e+00> : vector<1x1xf32>
    %32 = tpu.matmul %27, %30, %cst_19 {dimension_numbers = #tpu.dot_dimension_numbers<[1], [0], [0], [1], [0, 0, 1, 1], [], []>} : vector<1x16xf32>, vector<16x1xf32>, vector<1x1xf32> -> vector<1x1xf32>
    %cst_20 = arith.constant 0.000000e+00 : f32
    %33 = vector.broadcast %cst_20 : f32 to vector<1x1xf32>
    %34 = arith.maximumf %32, %33 : vector<1x1xf32>
    %cst_21 = arith.constant dense<0.000000e+00> : vector<1x1xf32>
    %35 = tpu.matmul %29, %30, %cst_21 {dimension_numbers = #tpu.dot_dimension_numbers<[1], [0], [0], [1], [0, 0, 1, 1], [], []>} : vector<1x16xf32>, vector<16x1xf32>, vector<1x1xf32> -> vector<1x1xf32>
    %cst_22 = arith.constant 0.000000e+00 : f32
    %36 = vector.broadcast %cst_22 : f32 to vector<1x1xf32>
    %37 = arith.maximumf %35, %36 : vector<1x1xf32>
    %cst_23 = arith.constant dense<0.000000e+00> : vector<1x16xf32>
    %38 = tpu.matmul %34, %31, %cst_23 {dimension_numbers = #tpu.dot_dimension_numbers<[1], [0], [0], [1], [0, 0, 1, 1], [], []>} : vector<1x1xf32>, vector<1x16xf32>, vector<1x16xf32> -> vector<1x16xf32>
    %cst_24 = arith.constant dense<0.000000e+00> : vector<1x16xf32>
    %39 = tpu.matmul %37, %31, %cst_24 {dimension_numbers = #tpu.dot_dimension_numbers<[1], [0], [0], [1], [0, 0, 1, 1], [], []>} : vector<1x1xf32>, vector<1x16xf32>, vector<1x16xf32> -> vector<1x16xf32>
    %40 = arith.addf %38, %39 : vector<1x16xf32>
    %41 = arith.negf %40 : vector<1x16xf32>
    %42 = math.exp %41 : vector<1x16xf32>
    %cst_25 = arith.constant 1.000000e+00 : f32
    %43 = vector.broadcast %cst_25 : f32 to vector<1x16xf32>
    %44 = arith.addf %43, %42 : vector<1x16xf32>
    %45 = arith.divf %43, %44 : vector<1x16xf32>
    %46 = vector.broadcast %45 : vector<1x16xf32> to vector<64x16xf32>
    %47 = arith.mulf %23, %46 : vector<64x16xf32>
    %c0_26 = arith.constant 0 : index
    %c0_27 = arith.constant 0 : index
    %c0_28 = arith.constant 0 : index
    %48 = vector.load %arg7[%c0_26, %c0_27, %c0_28] : memref<1x64x16xf32, #tpu.memory_space<vmem>>, vector<1x64x16xf32>
    %49 = vector.shape_cast %48 : vector<1x64x16xf32> to vector<64x16xf32>
    %50 = vector.shape_cast %47 : vector<64x16xf32> to vector<1x64x16xf32>
    tpu.vector_store %arg7[%c0_26, %c0_27, %c0_28], %50 {strides = array<i32>} : memref<1x64x16xf32, #tpu.memory_space<vmem>>, vector<1x64x16xf32>,
    %cst_29 = arith.constant dense<0.000000e+00> : vector<64xf32>
    %51 = vector.multi_reduction <add>, %47, %cst_29 [1] : vector<64x16xf32> to vector<64xf32>
    %52 = vector.shape_cast %51 : vector<64xf32> to vector<64x1xf32>
    %cst_30 = arith.constant 1.600000e+01 : f32
    %53 = vector.broadcast %cst_30 : f32 to vector<64x1xf32>
    %54 = arith.divf %52, %53 : vector<64x1xf32>
    %c0_31 = arith.constant 0 : index
    %c0_32 = arith.constant 0 : index
    %c0_33 = arith.constant 0 : index
    %55 = vector.load %arg8[%c0_31, %c0_32, %c0_33] : memref<1x64x2xf32, #tpu.memory_space<vmem>>, vector<1x64x1xf32>
    %56 = vector.shape_cast %55 : vector<1x64x1xf32> to vector<64x1xf32>
    %57 = vector.shape_cast %54 : vector<64x1xf32> to vector<1x64x1xf32>
    tpu.vector_store %arg8[%c0_31, %c0_32, %c0_33], %57 {strides = array<i32>} : memref<1x64x2xf32, #tpu.memory_space<vmem>>, vector<1x64x1xf32>,
    %cst_34 = arith.constant dense<0xFF800000> : vector<64xf32>
    %58 = vector.multi_reduction <maximumf>, %47, %cst_34 [1] : vector<64x16xf32> to vector<64xf32>
    %59 = vector.shape_cast %58 : vector<64xf32> to vector<64x1xf32>
    %c0_35 = arith.constant 0 : index
    %c0_36 = arith.constant 0 : index
    %c1 = arith.constant 1 : index
    %60 = vector.load %arg8[%c0_35, %c0_36, %c1] : memref<1x64x2xf32, #tpu.memory_space<vmem>>, vector<1x64x1xf32>
    %61 = vector.shape_cast %60 : vector<1x64x1xf32> to vector<64x1xf32>
    %62 = vector.shape_cast %59 : vector<64x1xf32> to vector<1x64x1xf32>
    tpu.vector_store %arg8[%c0_35, %c0_36, %c1], %62 {strides = array<i32>} : memref<1x64x2xf32, #tpu.memory_space<vmem>>, vector<1x64x1xf32>,
    return
  }
  func.func @transform_0(%arg0: i32) -> (i32, i32, i32) {
    %c0_i32 = arith.constant 0 : i32
    %c0_i32_0 = arith.constant 0 : i32
    %c0_i32_1 = arith.constant 0 : i32
    return %arg0, %c0_i32, %c0_i32_0 : i32, i32, i32
  }
  func.func @transform_1(%arg0: i32) -> (i32, i32, i32) {
    %c0_i32 = arith.constant 0 : i32
    %c0_i32_0 = arith.constant 0 : i32
    %c0_i32_1 = arith.constant 0 : i32
    %c0_i32_2 = arith.constant 0 : i32
    return %c0_i32, %c0_i32_0, %c0_i32_1 : i32, i32, i32
  }
  func.func @transform_2(%arg0: i32) -> (i32, i32) {
    %c0_i32 = arith.constant 0 : i32
    %c0_i32_0 = arith.constant 0 : i32
    %c0_i32_1 = arith.constant 0 : i32
    return %c0_i32, %c0_i32_0 : i32, i32
  }
  func.func @transform_3(%arg0: i32) -> (i32, i32) {
    %c0_i32 = arith.constant 0 : i32
    %c0_i32_0 = arith.constant 0 : i32
    %c0_i32_1 = arith.constant 0 : i32
    return %c0_i32, %c0_i32_0 : i32, i32
  }
  func.func @transform_4(%arg0: i32) -> (i32, i32) {
    %c0_i32 = arith.constant 0 : i32
    %c0_i32_0 = arith.constant 0 : i32
    %c0_i32_1 = arith.constant 0 : i32
    return %c0_i32, %c0_i32_0 : i32, i32
  }
  func.func @transform_5(%arg0: i32) -> (i32, i32) {
    %c0_i32 = arith.constant 0 : i32
    %c0_i32_0 = arith.constant 0 : i32
    %c0_i32_1 = arith.constant 0 : i32
    return %c0_i32, %c0_i32_0 : i32, i32
  }
  func.func @transform_6(%arg0: i32) -> (i32, i32, i32) {
    %c0_i32 = arith.constant 0 : i32
    %c0_i32_0 = arith.constant 0 : i32
    %c0_i32_1 = arith.constant 0 : i32
    return %arg0, %c0_i32, %c0_i32_0 : i32, i32, i32
  }
  func.func @transform_7(%arg0: i32) -> (i32, i32, i32) {
    %c0_i32 = arith.constant 0 : i32
    %c0_i32_0 = arith.constant 0 : i32
    %c0_i32_1 = arith.constant 0 : i32
    return %arg0, %c0_i32, %c0_i32_0 : i32, i32, i32
  }
}

module attributes {stable_mosaic.version = 11 : i64} {
  func.func @_conv3x3_stats_kernel(%arg0: i32, %arg1: memref<1x10x10x16xbf16, #tpu.memory_space<vmem>>, %arg2: memref<9x16x16xbf16, #tpu.memory_space<vmem>>, %arg3: memref<1x64x16xf32, #tpu.memory_space<vmem>>, %arg4: memref<1x2x16xf32, #tpu.memory_space<vmem>>) attributes {dimension_semantics = [#tpu.dimension_semantics<parallel>], iteration_bounds = array<i64: 2>, scalar_prefetch = 0 : i64, scratch_operands = 0 : i64, tpu.core_type = #tpu.core_type<tc>, window_params = [{transform_indices = @transform_0, window_bounds = array<i64: 1, 10, 10, 16>}, {pipeline_mode = #tpu.pipeline_mode<synchronous>, transform_indices = @transform_1, window_bounds = array<i64: 9, 16, 16>}, {transform_indices = @transform_2, window_bounds = array<i64: 1, 64, 16>}, {transform_indices = @transform_3, window_bounds = array<i64: 1, 2, 16>}]} {
    %cst = arith.constant 0.000000e+00 : f32
    %0 = vector.broadcast %cst : f32 to vector<64x16xf32>
    %c0 = arith.constant 0 : index
    %c0_0 = arith.constant 0 : index
    %c0_1 = arith.constant 0 : index
    %c0_2 = arith.constant 0 : index
    %1 = vector.load %arg1[%c0, %c0_0, %c0_1, %c0_2] : memref<1x10x10x16xbf16, #tpu.memory_space<vmem>>, vector<1x8x8x16xbf16>
    %2 = vector.shape_cast %1 : vector<1x8x8x16xbf16> to vector<8x8x16xbf16>
    %3 = vector.shape_cast %2 : vector<8x8x16xbf16> to vector<64x16xbf16>
    %c0_3 = arith.constant 0 : index
    %c0_4 = arith.constant 0 : index
    %c0_5 = arith.constant 0 : index
    %4 = vector.load %arg2[%c0_3, %c0_4, %c0_5] : memref<9x16x16xbf16, #tpu.memory_space<vmem>>, vector<1x16x16xbf16>
    %5 = vector.shape_cast %4 : vector<1x16x16xbf16> to vector<16x16xbf16>
    %cst_6 = arith.constant dense<0.000000e+00> : vector<64x16xf32>
    %6 = tpu.matmul %3, %5, %cst_6 {dimension_numbers = #tpu.dot_dimension_numbers<[1], [0], [0], [1], [0, 0, 1, 1], [], []>} : vector<64x16xbf16>, vector<16x16xbf16>, vector<64x16xf32> -> vector<64x16xf32>
    %7 = arith.addf %0, %6 : vector<64x16xf32>
    %c0_7 = arith.constant 0 : index
    %c0_8 = arith.constant 0 : index
    %c1 = arith.constant 1 : index
    %c0_9 = arith.constant 0 : index
    %8 = vector.load %arg1[%c0_7, %c0_8, %c1, %c0_9] : memref<1x10x10x16xbf16, #tpu.memory_space<vmem>>, vector<1x8x8x16xbf16>
    %9 = vector.shape_cast %8 : vector<1x8x8x16xbf16> to vector<8x8x16xbf16>
    %10 = vector.shape_cast %9 : vector<8x8x16xbf16> to vector<64x16xbf16>
    %c1_10 = arith.constant 1 : index
    %c0_11 = arith.constant 0 : index
    %c0_12 = arith.constant 0 : index
    %11 = vector.load %arg2[%c1_10, %c0_11, %c0_12] : memref<9x16x16xbf16, #tpu.memory_space<vmem>>, vector<1x16x16xbf16>
    %12 = vector.shape_cast %11 : vector<1x16x16xbf16> to vector<16x16xbf16>
    %cst_13 = arith.constant dense<0.000000e+00> : vector<64x16xf32>
    %13 = tpu.matmul %10, %12, %cst_13 {dimension_numbers = #tpu.dot_dimension_numbers<[1], [0], [0], [1], [0, 0, 1, 1], [], []>} : vector<64x16xbf16>, vector<16x16xbf16>, vector<64x16xf32> -> vector<64x16xf32>
    %14 = arith.addf %7, %13 : vector<64x16xf32>
    %c0_14 = arith.constant 0 : index
    %c0_15 = arith.constant 0 : index
    %c2 = arith.constant 2 : index
    %c0_16 = arith.constant 0 : index
    %15 = vector.load %arg1[%c0_14, %c0_15, %c2, %c0_16] : memref<1x10x10x16xbf16, #tpu.memory_space<vmem>>, vector<1x8x8x16xbf16>
    %16 = vector.shape_cast %15 : vector<1x8x8x16xbf16> to vector<8x8x16xbf16>
    %17 = vector.shape_cast %16 : vector<8x8x16xbf16> to vector<64x16xbf16>
    %c2_17 = arith.constant 2 : index
    %c0_18 = arith.constant 0 : index
    %c0_19 = arith.constant 0 : index
    %18 = vector.load %arg2[%c2_17, %c0_18, %c0_19] : memref<9x16x16xbf16, #tpu.memory_space<vmem>>, vector<1x16x16xbf16>
    %19 = vector.shape_cast %18 : vector<1x16x16xbf16> to vector<16x16xbf16>
    %cst_20 = arith.constant dense<0.000000e+00> : vector<64x16xf32>
    %20 = tpu.matmul %17, %19, %cst_20 {dimension_numbers = #tpu.dot_dimension_numbers<[1], [0], [0], [1], [0, 0, 1, 1], [], []>} : vector<64x16xbf16>, vector<16x16xbf16>, vector<64x16xf32> -> vector<64x16xf32>
    %21 = arith.addf %14, %20 : vector<64x16xf32>
    %c0_21 = arith.constant 0 : index
    %c1_22 = arith.constant 1 : index
    %c0_23 = arith.constant 0 : index
    %c0_24 = arith.constant 0 : index
    %22 = vector.load %arg1[%c0_21, %c1_22, %c0_23, %c0_24] : memref<1x10x10x16xbf16, #tpu.memory_space<vmem>>, vector<1x8x8x16xbf16>
    %23 = vector.shape_cast %22 : vector<1x8x8x16xbf16> to vector<8x8x16xbf16>
    %24 = vector.shape_cast %23 : vector<8x8x16xbf16> to vector<64x16xbf16>
    %c3 = arith.constant 3 : index
    %c0_25 = arith.constant 0 : index
    %c0_26 = arith.constant 0 : index
    %25 = vector.load %arg2[%c3, %c0_25, %c0_26] : memref<9x16x16xbf16, #tpu.memory_space<vmem>>, vector<1x16x16xbf16>
    %26 = vector.shape_cast %25 : vector<1x16x16xbf16> to vector<16x16xbf16>
    %cst_27 = arith.constant dense<0.000000e+00> : vector<64x16xf32>
    %27 = tpu.matmul %24, %26, %cst_27 {dimension_numbers = #tpu.dot_dimension_numbers<[1], [0], [0], [1], [0, 0, 1, 1], [], []>} : vector<64x16xbf16>, vector<16x16xbf16>, vector<64x16xf32> -> vector<64x16xf32>
    %28 = arith.addf %21, %27 : vector<64x16xf32>
    %c0_28 = arith.constant 0 : index
    %c1_29 = arith.constant 1 : index
    %c1_30 = arith.constant 1 : index
    %c0_31 = arith.constant 0 : index
    %29 = vector.load %arg1[%c0_28, %c1_29, %c1_30, %c0_31] : memref<1x10x10x16xbf16, #tpu.memory_space<vmem>>, vector<1x8x8x16xbf16>
    %30 = vector.shape_cast %29 : vector<1x8x8x16xbf16> to vector<8x8x16xbf16>
    %31 = vector.shape_cast %30 : vector<8x8x16xbf16> to vector<64x16xbf16>
    %c4 = arith.constant 4 : index
    %c0_32 = arith.constant 0 : index
    %c0_33 = arith.constant 0 : index
    %32 = vector.load %arg2[%c4, %c0_32, %c0_33] : memref<9x16x16xbf16, #tpu.memory_space<vmem>>, vector<1x16x16xbf16>
    %33 = vector.shape_cast %32 : vector<1x16x16xbf16> to vector<16x16xbf16>
    %cst_34 = arith.constant dense<0.000000e+00> : vector<64x16xf32>
    %34 = tpu.matmul %31, %33, %cst_34 {dimension_numbers = #tpu.dot_dimension_numbers<[1], [0], [0], [1], [0, 0, 1, 1], [], []>} : vector<64x16xbf16>, vector<16x16xbf16>, vector<64x16xf32> -> vector<64x16xf32>
    %35 = arith.addf %28, %34 : vector<64x16xf32>
    %c0_35 = arith.constant 0 : index
    %c1_36 = arith.constant 1 : index
    %c2_37 = arith.constant 2 : index
    %c0_38 = arith.constant 0 : index
    %36 = vector.load %arg1[%c0_35, %c1_36, %c2_37, %c0_38] : memref<1x10x10x16xbf16, #tpu.memory_space<vmem>>, vector<1x8x8x16xbf16>
    %37 = vector.shape_cast %36 : vector<1x8x8x16xbf16> to vector<8x8x16xbf16>
    %38 = vector.shape_cast %37 : vector<8x8x16xbf16> to vector<64x16xbf16>
    %c5 = arith.constant 5 : index
    %c0_39 = arith.constant 0 : index
    %c0_40 = arith.constant 0 : index
    %39 = vector.load %arg2[%c5, %c0_39, %c0_40] : memref<9x16x16xbf16, #tpu.memory_space<vmem>>, vector<1x16x16xbf16>
    %40 = vector.shape_cast %39 : vector<1x16x16xbf16> to vector<16x16xbf16>
    %cst_41 = arith.constant dense<0.000000e+00> : vector<64x16xf32>
    %41 = tpu.matmul %38, %40, %cst_41 {dimension_numbers = #tpu.dot_dimension_numbers<[1], [0], [0], [1], [0, 0, 1, 1], [], []>} : vector<64x16xbf16>, vector<16x16xbf16>, vector<64x16xf32> -> vector<64x16xf32>
    %42 = arith.addf %35, %41 : vector<64x16xf32>
    %c0_42 = arith.constant 0 : index
    %c2_43 = arith.constant 2 : index
    %c0_44 = arith.constant 0 : index
    %c0_45 = arith.constant 0 : index
    %43 = vector.load %arg1[%c0_42, %c2_43, %c0_44, %c0_45] : memref<1x10x10x16xbf16, #tpu.memory_space<vmem>>, vector<1x8x8x16xbf16>
    %44 = vector.shape_cast %43 : vector<1x8x8x16xbf16> to vector<8x8x16xbf16>
    %45 = vector.shape_cast %44 : vector<8x8x16xbf16> to vector<64x16xbf16>
    %c6 = arith.constant 6 : index
    %c0_46 = arith.constant 0 : index
    %c0_47 = arith.constant 0 : index
    %46 = vector.load %arg2[%c6, %c0_46, %c0_47] : memref<9x16x16xbf16, #tpu.memory_space<vmem>>, vector<1x16x16xbf16>
    %47 = vector.shape_cast %46 : vector<1x16x16xbf16> to vector<16x16xbf16>
    %cst_48 = arith.constant dense<0.000000e+00> : vector<64x16xf32>
    %48 = tpu.matmul %45, %47, %cst_48 {dimension_numbers = #tpu.dot_dimension_numbers<[1], [0], [0], [1], [0, 0, 1, 1], [], []>} : vector<64x16xbf16>, vector<16x16xbf16>, vector<64x16xf32> -> vector<64x16xf32>
    %49 = arith.addf %42, %48 : vector<64x16xf32>
    %c0_49 = arith.constant 0 : index
    %c2_50 = arith.constant 2 : index
    %c1_51 = arith.constant 1 : index
    %c0_52 = arith.constant 0 : index
    %50 = vector.load %arg1[%c0_49, %c2_50, %c1_51, %c0_52] : memref<1x10x10x16xbf16, #tpu.memory_space<vmem>>, vector<1x8x8x16xbf16>
    %51 = vector.shape_cast %50 : vector<1x8x8x16xbf16> to vector<8x8x16xbf16>
    %52 = vector.shape_cast %51 : vector<8x8x16xbf16> to vector<64x16xbf16>
    %c7 = arith.constant 7 : index
    %c0_53 = arith.constant 0 : index
    %c0_54 = arith.constant 0 : index
    %53 = vector.load %arg2[%c7, %c0_53, %c0_54] : memref<9x16x16xbf16, #tpu.memory_space<vmem>>, vector<1x16x16xbf16>
    %54 = vector.shape_cast %53 : vector<1x16x16xbf16> to vector<16x16xbf16>
    %cst_55 = arith.constant dense<0.000000e+00> : vector<64x16xf32>
    %55 = tpu.matmul %52, %54, %cst_55 {dimension_numbers = #tpu.dot_dimension_numbers<[1], [0], [0], [1], [0, 0, 1, 1], [], []>} : vector<64x16xbf16>, vector<16x16xbf16>, vector<64x16xf32> -> vector<64x16xf32>
    %56 = arith.addf %49, %55 : vector<64x16xf32>
    %c0_56 = arith.constant 0 : index
    %c2_57 = arith.constant 2 : index
    %c2_58 = arith.constant 2 : index
    %c0_59 = arith.constant 0 : index
    %57 = vector.load %arg1[%c0_56, %c2_57, %c2_58, %c0_59] : memref<1x10x10x16xbf16, #tpu.memory_space<vmem>>, vector<1x8x8x16xbf16>
    %58 = vector.shape_cast %57 : vector<1x8x8x16xbf16> to vector<8x8x16xbf16>
    %59 = vector.shape_cast %58 : vector<8x8x16xbf16> to vector<64x16xbf16>
    %c8 = arith.constant 8 : index
    %c0_60 = arith.constant 0 : index
    %c0_61 = arith.constant 0 : index
    %60 = vector.load %arg2[%c8, %c0_60, %c0_61] : memref<9x16x16xbf16, #tpu.memory_space<vmem>>, vector<1x16x16xbf16>
    %61 = vector.shape_cast %60 : vector<1x16x16xbf16> to vector<16x16xbf16>
    %cst_62 = arith.constant dense<0.000000e+00> : vector<64x16xf32>
    %62 = tpu.matmul %59, %61, %cst_62 {dimension_numbers = #tpu.dot_dimension_numbers<[1], [0], [0], [1], [0, 0, 1, 1], [], []>} : vector<64x16xbf16>, vector<16x16xbf16>, vector<64x16xf32> -> vector<64x16xf32>
    %63 = arith.addf %56, %62 : vector<64x16xf32>
    %c0_63 = arith.constant 0 : index
    %c0_64 = arith.constant 0 : index
    %c0_65 = arith.constant 0 : index
    %64 = vector.load %arg3[%c0_63, %c0_64, %c0_65] : memref<1x64x16xf32, #tpu.memory_space<vmem>>, vector<1x64x16xf32>
    %65 = vector.shape_cast %64 : vector<1x64x16xf32> to vector<64x16xf32>
    %66 = vector.shape_cast %63 : vector<64x16xf32> to vector<1x64x16xf32>
    tpu.vector_store %arg3[%c0_63, %c0_64, %c0_65], %66 {strides = array<i32>} : memref<1x64x16xf32, #tpu.memory_space<vmem>>, vector<1x64x16xf32>,
    %cst_66 = arith.constant dense<0.000000e+00> : vector<16xf32>
    %67 = vector.multi_reduction <add>, %63, %cst_66 [0] : vector<64x16xf32> to vector<16xf32>
    %68 = vector.shape_cast %67 : vector<16xf32> to vector<1x16xf32>
    %c0_67 = arith.constant 0 : index
    %c0_68 = arith.constant 0 : index
    %c0_69 = arith.constant 0 : index
    %69 = vector.load %arg4[%c0_67, %c0_68, %c0_69] : memref<1x2x16xf32, #tpu.memory_space<vmem>>, vector<1x1x16xf32>
    %70 = vector.shape_cast %69 : vector<1x1x16xf32> to vector<1x16xf32>
    %71 = vector.shape_cast %68 : vector<1x16xf32> to vector<1x1x16xf32>
    tpu.vector_store %arg4[%c0_67, %c0_68, %c0_69], %71 {strides = array<i32>} : memref<1x2x16xf32, #tpu.memory_space<vmem>>, vector<1x1x16xf32>,
    %72 = arith.mulf %63, %63 : vector<64x16xf32>
    %cst_70 = arith.constant dense<0.000000e+00> : vector<16xf32>
    %73 = vector.multi_reduction <add>, %72, %cst_70 [0] : vector<64x16xf32> to vector<16xf32>
    %74 = vector.shape_cast %73 : vector<16xf32> to vector<1x16xf32>
    %c0_71 = arith.constant 0 : index
    %c1_72 = arith.constant 1 : index
    %c0_73 = arith.constant 0 : index
    %75 = vector.load %arg4[%c0_71, %c1_72, %c0_73] : memref<1x2x16xf32, #tpu.memory_space<vmem>>, vector<1x1x16xf32>
    %76 = vector.shape_cast %75 : vector<1x1x16xf32> to vector<1x16xf32>
    %77 = vector.shape_cast %74 : vector<1x16xf32> to vector<1x1x16xf32>
    tpu.vector_store %arg4[%c0_71, %c1_72, %c0_73], %77 {strides = array<i32>} : memref<1x2x16xf32, #tpu.memory_space<vmem>>, vector<1x1x16xf32>,
    return
  }
  func.func @transform_0(%arg0: i32) -> (i32, i32, i32, i32) {
    %c0_i32 = arith.constant 0 : i32
    %c0_i32_0 = arith.constant 0 : i32
    %c0_i32_1 = arith.constant 0 : i32
    %c0_i32_2 = arith.constant 0 : i32
    return %arg0, %c0_i32, %c0_i32_0, %c0_i32_1 : i32, i32, i32, i32
  }
  func.func @transform_1(%arg0: i32) -> (i32, i32, i32) {
    %c0_i32 = arith.constant 0 : i32
    %c0_i32_0 = arith.constant 0 : i32
    %c0_i32_1 = arith.constant 0 : i32
    %c0_i32_2 = arith.constant 0 : i32
    return %c0_i32, %c0_i32_0, %c0_i32_1 : i32, i32, i32
  }
  func.func @transform_2(%arg0: i32) -> (i32, i32, i32) {
    %c0_i32 = arith.constant 0 : i32
    %c0_i32_0 = arith.constant 0 : i32
    %c0_i32_1 = arith.constant 0 : i32
    return %arg0, %c0_i32, %c0_i32_0 : i32, i32, i32
  }
  func.func @transform_3(%arg0: i32) -> (i32, i32, i32) {
    %c0_i32 = arith.constant 0 : i32
    %c0_i32_0 = arith.constant 0 : i32
    %c0_i32_1 = arith.constant 0 : i32
    return %arg0, %c0_i32, %c0_i32_0 : i32, i32, i32
  }
}

module attributes {stable_mosaic.version = 11 : i64} {
  func.func @_bn_relu_kernel(%arg0: i32, %arg1: memref<128x16xf32, #tpu.memory_space<vmem>>, %arg2: memref<2x2x16xf32, #tpu.memory_space<vmem>>, %arg3: memref<1x16xf32, #tpu.memory_space<vmem>>, %arg4: memref<1x16xf32, #tpu.memory_space<vmem>>, %arg5: memref<128x16xbf16, #tpu.memory_space<vmem>>) attributes {dimension_semantics = [#tpu.dimension_semantics<parallel>], iteration_bounds = array<i64: 1>, scalar_prefetch = 0 : i64, scratch_operands = 0 : i64, tpu.core_type = #tpu.core_type<tc>, window_params = [{transform_indices = @transform_0, window_bounds = array<i64: 128, 16>}, {pipeline_mode = #tpu.pipeline_mode<synchronous>, transform_indices = @transform_1, window_bounds = array<i64: 2, 2, 16>}, {pipeline_mode = #tpu.pipeline_mode<synchronous>, transform_indices = @transform_2, window_bounds = array<i64: 1, 16>}, {pipeline_mode = #tpu.pipeline_mode<synchronous>, transform_indices = @transform_3, window_bounds = array<i64: 1, 16>}, {transform_indices = @transform_4, window_bounds = array<i64: 128, 16>}]} {
    %c0 = arith.constant 0 : index
    %c0_0 = arith.constant 0 : index
    %c0_1 = arith.constant 0 : index
    %0 = vector.load %arg2[%c0, %c0_0, %c0_1] : memref<2x2x16xf32, #tpu.memory_space<vmem>>, vector<2x2x16xf32>
    %cst = arith.constant dense<0.000000e+00> : vector<2x16xf32>
    %1 = vector.multi_reduction <add>, %0, %cst [0] : vector<2x2x16xf32> to vector<2x16xf32>
    %2 = vector.extract_strided_slice %1 {offsets = [0, 0], sizes = [1, 16], strides = [1, 1]} : vector<2x16xf32> to vector<1x16xf32>
    %cst_2 = arith.constant 1.280000e+02 : f32
    %3 = vector.broadcast %cst_2 : f32 to vector<1x16xf32>
    %4 = arith.divf %2, %3 : vector<1x16xf32>
    %5 = vector.extract_strided_slice %1 {offsets = [1, 0], sizes = [1, 16], strides = [1, 1]} : vector<2x16xf32> to vector<1x16xf32>
    %cst_3 = arith.constant 1.280000e+02 : f32
    %6 = vector.broadcast %cst_3 : f32 to vector<1x16xf32>
    %7 = arith.divf %5, %6 : vector<1x16xf32>
    %8 = arith.mulf %4, %4 : vector<1x16xf32>
    %9 = arith.subf %7, %8 : vector<1x16xf32>
    %c0_4 = arith.constant 0 : index
    %c0_5 = arith.constant 0 : index
    %10 = vector.load %arg3[%c0_4, %c0_5] : memref<1x16xf32, #tpu.memory_space<vmem>>, vector<1x16xf32>
    %cst_6 = arith.constant 9.99999974E-6 : f32
    %11 = vector.broadcast %cst_6 : f32 to vector<1x16xf32>
    %12 = arith.addf %9, %11 : vector<1x16xf32>
    %13 = math.rsqrt %12 : vector<1x16xf32>
    %14 = arith.mulf %10, %13 : vector<1x16xf32>
    %c0_7 = arith.constant 0 : index
    %c0_8 = arith.constant 0 : index
    %15 = vector.load %arg4[%c0_7, %c0_8] : memref<1x16xf32, #tpu.memory_space<vmem>>, vector<1x16xf32>
    %16 = arith.mulf %4, %14 : vector<1x16xf32>
    %17 = arith.subf %15, %16 : vector<1x16xf32>
    %c0_9 = arith.constant 0 : index
    %c0_10 = arith.constant 0 : index
    %18 = vector.load %arg1[%c0_9, %c0_10] : memref<128x16xf32, #tpu.memory_space<vmem>>, vector<128x16xf32>
    %19 = vector.broadcast %14 : vector<1x16xf32> to vector<128x16xf32>
    %20 = arith.mulf %18, %19 : vector<128x16xf32>
    %21 = vector.broadcast %17 : vector<1x16xf32> to vector<128x16xf32>
    %22 = arith.addf %20, %21 : vector<128x16xf32>
    %cst_11 = arith.constant 0.000000e+00 : f32
    %23 = vector.broadcast %cst_11 : f32 to vector<128x16xf32>
    %24 = arith.maximumf %22, %23 : vector<128x16xf32>
    %25 = arith.truncf %24 : vector<128x16xf32> to vector<128x16xbf16>
    %c0_12 = arith.constant 0 : index
    %c0_13 = arith.constant 0 : index
    %26 = vector.load %arg5[%c0_12, %c0_13] : memref<128x16xbf16, #tpu.memory_space<vmem>>, vector<128x16xbf16>
    tpu.vector_store %arg5[%c0_12, %c0_13], %25 {strides = array<i32>} : memref<128x16xbf16, #tpu.memory_space<vmem>>, vector<128x16xbf16>,
    return
  }
  func.func @transform_0(%arg0: i32) -> (i32, i32) {
    %c0_i32 = arith.constant 0 : i32
    %c0_i32_0 = arith.constant 0 : i32
    return %arg0, %c0_i32 : i32, i32
  }
  func.func @transform_1(%arg0: i32) -> (i32, i32, i32) {
    %c0_i32 = arith.constant 0 : i32
    %c0_i32_0 = arith.constant 0 : i32
    %c0_i32_1 = arith.constant 0 : i32
    %c0_i32_2 = arith.constant 0 : i32
    return %c0_i32, %c0_i32_0, %c0_i32_1 : i32, i32, i32
  }
  func.func @transform_2(%arg0: i32) -> (i32, i32) {
    %c0_i32 = arith.constant 0 : i32
    %c0_i32_0 = arith.constant 0 : i32
    %c0_i32_1 = arith.constant 0 : i32
    return %c0_i32, %c0_i32_0 : i32, i32
  }
  func.func @transform_3(%arg0: i32) -> (i32, i32) {
    %c0_i32 = arith.constant 0 : i32
    %c0_i32_0 = arith.constant 0 : i32
    %c0_i32_1 = arith.constant 0 : i32
    return %c0_i32, %c0_i32_0 : i32, i32
  }
  func.func @transform_4(%arg0: i32) -> (i32, i32) {
    %c0_i32 = arith.constant 0 : i32
    %c0_i32_0 = arith.constant 0 : i32
    return %arg0, %c0_i32 : i32, i32
  }
}

module attributes {stable_mosaic.version = 11 : i64} {
  func.func @_sa_conv_kernel(%arg0: i32, %arg1: memref<1x2x14x14xf32, #tpu.memory_space<vmem>>, %arg2: memref<98xf32, #tpu.memory_space<smem>>, %arg3: memref<1x8x8xf32, #tpu.memory_space<vmem>>) attributes {dimension_semantics = [#tpu.dimension_semantics<parallel>], iteration_bounds = array<i64: 2>, scalar_prefetch = 0 : i64, scratch_operands = 0 : i64, tpu.core_type = #tpu.core_type<tc>, window_params = [{transform_indices = @transform_0, window_bounds = array<i64: 1, 2, 14, 14>}, {transform_indices = @transform_1, window_bounds = array<i64: 98>}, {transform_indices = @transform_2, window_bounds = array<i64: 1, 8, 8>}]} {
    %cst = arith.constant 0.000000e+00 : f32
    %0 = vector.broadcast %cst : f32 to vector<8x8xf32>
    %c0 = arith.constant 0 : index
    %1 = memref.load %arg2[%c0] : memref<98xf32, #tpu.memory_space<smem>>
    %c0_0 = arith.constant 0 : index
    %c0_1 = arith.constant 0 : index
    %c0_2 = arith.constant 0 : index
    %c0_3 = arith.constant 0 : index
    %2 = vector.load %arg1[%c0_0, %c0_1, %c0_2, %c0_3] : memref<1x2x14x14xf32, #tpu.memory_space<vmem>>, vector<1x1x8x8xf32>
    %3 = vector.shape_cast %2 : vector<1x1x8x8xf32> to vector<8x8xf32>
    %4 = vector.broadcast %1 : f32 to vector<8x8xf32>
    %5 = arith.mulf %4, %3 : vector<8x8xf32>
    %6 = arith.addf %0, %5 : vector<8x8xf32>
    %c49 = arith.constant 49 : index
    %7 = memref.load %arg2[%c49] : memref<98xf32, #tpu.memory_space<smem>>
    %c0_4 = arith.constant 0 : index
    %c1 = arith.constant 1 : index
    %c0_5 = arith.constant 0 : index
    %c0_6 = arith.constant 0 : index
    %8 = vector.load %arg1[%c0_4, %c1, %c0_5, %c0_6] : memref<1x2x14x14xf32, #tpu.memory_space<vmem>>, vector<1x1x8x8xf32>
    %9 = vector.shape_cast %8 : vector<1x1x8x8xf32> to vector<8x8xf32>
    %10 = vector.broadcast %7 : f32 to vector<8x8xf32>
    %11 = arith.mulf %10, %9 : vector<8x8xf32>
    %12 = arith.addf %6, %11 : vector<8x8xf32>
    %c1_7 = arith.constant 1 : index
    %13 = memref.load %arg2[%c1_7] : memref<98xf32, #tpu.memory_space<smem>>
    %c0_8 = arith.constant 0 : index
    %c0_9 = arith.constant 0 : index
    %c0_10 = arith.constant 0 : index
    %c1_11 = arith.constant 1 : index
    %14 = vector.load %arg1[%c0_8, %c0_9, %c0_10, %c1_11] : memref<1x2x14x14xf32, #tpu.memory_space<vmem>>, vector<1x1x8x8xf32>
    %15 = vector.shape_cast %14 : vector<1x1x8x8xf32> to vector<8x8xf32>
    %16 = vector.broadcast %13 : f32 to vector<8x8xf32>
    %17 = arith.mulf %16, %15 : vector<8x8xf32>
    %18 = arith.addf %12, %17 : vector<8x8xf32>
    %c50 = arith.constant 50 : index
    %19 = memref.load %arg2[%c50] : memref<98xf32, #tpu.memory_space<smem>>
    %c0_12 = arith.constant 0 : index
    %c1_13 = arith.constant 1 : index
    %c0_14 = arith.constant 0 : index
    %c1_15 = arith.constant 1 : index
    %20 = vector.load %arg1[%c0_12, %c1_13, %c0_14, %c1_15] : memref<1x2x14x14xf32, #tpu.memory_space<vmem>>, vector<1x1x8x8xf32>
    %21 = vector.shape_cast %20 : vector<1x1x8x8xf32> to vector<8x8xf32>
    %22 = vector.broadcast %19 : f32 to vector<8x8xf32>
    %23 = arith.mulf %22, %21 : vector<8x8xf32>
    %24 = arith.addf %18, %23 : vector<8x8xf32>
    %c2 = arith.constant 2 : index
    %25 = memref.load %arg2[%c2] : memref<98xf32, #tpu.memory_space<smem>>
    %c0_16 = arith.constant 0 : index
    %c0_17 = arith.constant 0 : index
    %c0_18 = arith.constant 0 : index
    %c2_19 = arith.constant 2 : index
    %26 = vector.load %arg1[%c0_16, %c0_17, %c0_18, %c2_19] : memref<1x2x14x14xf32, #tpu.memory_space<vmem>>, vector<1x1x8x8xf32>
    %27 = vector.shape_cast %26 : vector<1x1x8x8xf32> to vector<8x8xf32>
    %28 = vector.broadcast %25 : f32 to vector<8x8xf32>
    %29 = arith.mulf %28, %27 : vector<8x8xf32>
    %30 = arith.addf %24, %29 : vector<8x8xf32>
    %c51 = arith.constant 51 : index
    %31 = memref.load %arg2[%c51] : memref<98xf32, #tpu.memory_space<smem>>
    %c0_20 = arith.constant 0 : index
    %c1_21 = arith.constant 1 : index
    %c0_22 = arith.constant 0 : index
    %c2_23 = arith.constant 2 : index
    %32 = vector.load %arg1[%c0_20, %c1_21, %c0_22, %c2_23] : memref<1x2x14x14xf32, #tpu.memory_space<vmem>>, vector<1x1x8x8xf32>
    %33 = vector.shape_cast %32 : vector<1x1x8x8xf32> to vector<8x8xf32>
    %34 = vector.broadcast %31 : f32 to vector<8x8xf32>
    %35 = arith.mulf %34, %33 : vector<8x8xf32>
    %36 = arith.addf %30, %35 : vector<8x8xf32>
    %c3 = arith.constant 3 : index
    %37 = memref.load %arg2[%c3] : memref<98xf32, #tpu.memory_space<smem>>
    %c0_24 = arith.constant 0 : index
    %c0_25 = arith.constant 0 : index
    %c0_26 = arith.constant 0 : index
    %c3_27 = arith.constant 3 : index
    %38 = vector.load %arg1[%c0_24, %c0_25, %c0_26, %c3_27] : memref<1x2x14x14xf32, #tpu.memory_space<vmem>>, vector<1x1x8x8xf32>
    %39 = vector.shape_cast %38 : vector<1x1x8x8xf32> to vector<8x8xf32>
    %40 = vector.broadcast %37 : f32 to vector<8x8xf32>
    %41 = arith.mulf %40, %39 : vector<8x8xf32>
    %42 = arith.addf %36, %41 : vector<8x8xf32>
    %c52 = arith.constant 52 : index
    %43 = memref.load %arg2[%c52] : memref<98xf32, #tpu.memory_space<smem>>
    %c0_28 = arith.constant 0 : index
    %c1_29 = arith.constant 1 : index
    %c0_30 = arith.constant 0 : index
    %c3_31 = arith.constant 3 : index
    %44 = vector.load %arg1[%c0_28, %c1_29, %c0_30, %c3_31] : memref<1x2x14x14xf32, #tpu.memory_space<vmem>>, vector<1x1x8x8xf32>
    %45 = vector.shape_cast %44 : vector<1x1x8x8xf32> to vector<8x8xf32>
    %46 = vector.broadcast %43 : f32 to vector<8x8xf32>
    %47 = arith.mulf %46, %45 : vector<8x8xf32>
    %48 = arith.addf %42, %47 : vector<8x8xf32>
    %c4 = arith.constant 4 : index
    %49 = memref.load %arg2[%c4] : memref<98xf32, #tpu.memory_space<smem>>
    %c0_32 = arith.constant 0 : index
    %c0_33 = arith.constant 0 : index
    %c0_34 = arith.constant 0 : index
    %c4_35 = arith.constant 4 : index
    %50 = vector.load %arg1[%c0_32, %c0_33, %c0_34, %c4_35] : memref<1x2x14x14xf32, #tpu.memory_space<vmem>>, vector<1x1x8x8xf32>
    %51 = vector.shape_cast %50 : vector<1x1x8x8xf32> to vector<8x8xf32>
    %52 = vector.broadcast %49 : f32 to vector<8x8xf32>
    %53 = arith.mulf %52, %51 : vector<8x8xf32>
    %54 = arith.addf %48, %53 : vector<8x8xf32>
    %c53 = arith.constant 53 : index
    %55 = memref.load %arg2[%c53] : memref<98xf32, #tpu.memory_space<smem>>
    %c0_36 = arith.constant 0 : index
    %c1_37 = arith.constant 1 : index
    %c0_38 = arith.constant 0 : index
    %c4_39 = arith.constant 4 : index
    %56 = vector.load %arg1[%c0_36, %c1_37, %c0_38, %c4_39] : memref<1x2x14x14xf32, #tpu.memory_space<vmem>>, vector<1x1x8x8xf32>
    %57 = vector.shape_cast %56 : vector<1x1x8x8xf32> to vector<8x8xf32>
    %58 = vector.broadcast %55 : f32 to vector<8x8xf32>
    %59 = arith.mulf %58, %57 : vector<8x8xf32>
    %60 = arith.addf %54, %59 : vector<8x8xf32>
    %c5 = arith.constant 5 : index
    %61 = memref.load %arg2[%c5] : memref<98xf32, #tpu.memory_space<smem>>
    %c0_40 = arith.constant 0 : index
    %c0_41 = arith.constant 0 : index
    %c0_42 = arith.constant 0 : index
    %c5_43 = arith.constant 5 : index
    %62 = vector.load %arg1[%c0_40, %c0_41, %c0_42, %c5_43] : memref<1x2x14x14xf32, #tpu.memory_space<vmem>>, vector<1x1x8x8xf32>
    %63 = vector.shape_cast %62 : vector<1x1x8x8xf32> to vector<8x8xf32>
    %64 = vector.broadcast %61 : f32 to vector<8x8xf32>
    %65 = arith.mulf %64, %63 : vector<8x8xf32>
    %66 = arith.addf %60, %65 : vector<8x8xf32>
    %c54 = arith.constant 54 : index
    %67 = memref.load %arg2[%c54] : memref<98xf32, #tpu.memory_space<smem>>
    %c0_44 = arith.constant 0 : index
    %c1_45 = arith.constant 1 : index
    %c0_46 = arith.constant 0 : index
    %c5_47 = arith.constant 5 : index
    %68 = vector.load %arg1[%c0_44, %c1_45, %c0_46, %c5_47] : memref<1x2x14x14xf32, #tpu.memory_space<vmem>>, vector<1x1x8x8xf32>
    %69 = vector.shape_cast %68 : vector<1x1x8x8xf32> to vector<8x8xf32>
    %70 = vector.broadcast %67 : f32 to vector<8x8xf32>
    %71 = arith.mulf %70, %69 : vector<8x8xf32>
    %72 = arith.addf %66, %71 : vector<8x8xf32>
    %c6 = arith.constant 6 : index
    %73 = memref.load %arg2[%c6] : memref<98xf32, #tpu.memory_space<smem>>
    %c0_48 = arith.constant 0 : index
    %c0_49 = arith.constant 0 : index
    %c0_50 = arith.constant 0 : index
    %c6_51 = arith.constant 6 : index
    %74 = vector.load %arg1[%c0_48, %c0_49, %c0_50, %c6_51] : memref<1x2x14x14xf32, #tpu.memory_space<vmem>>, vector<1x1x8x8xf32>
    %75 = vector.shape_cast %74 : vector<1x1x8x8xf32> to vector<8x8xf32>
    %76 = vector.broadcast %73 : f32 to vector<8x8xf32>
    %77 = arith.mulf %76, %75 : vector<8x8xf32>
    %78 = arith.addf %72, %77 : vector<8x8xf32>
    %c55 = arith.constant 55 : index
    %79 = memref.load %arg2[%c55] : memref<98xf32, #tpu.memory_space<smem>>
    %c0_52 = arith.constant 0 : index
    %c1_53 = arith.constant 1 : index
    %c0_54 = arith.constant 0 : index
    %c6_55 = arith.constant 6 : index
    %80 = vector.load %arg1[%c0_52, %c1_53, %c0_54, %c6_55] : memref<1x2x14x14xf32, #tpu.memory_space<vmem>>, vector<1x1x8x8xf32>
    %81 = vector.shape_cast %80 : vector<1x1x8x8xf32> to vector<8x8xf32>
    %82 = vector.broadcast %79 : f32 to vector<8x8xf32>
    %83 = arith.mulf %82, %81 : vector<8x8xf32>
    %84 = arith.addf %78, %83 : vector<8x8xf32>
    %c7 = arith.constant 7 : index
    %85 = memref.load %arg2[%c7] : memref<98xf32, #tpu.memory_space<smem>>
    %c0_56 = arith.constant 0 : index
    %c0_57 = arith.constant 0 : index
    %c1_58 = arith.constant 1 : index
    %c0_59 = arith.constant 0 : index
    %86 = vector.load %arg1[%c0_56, %c0_57, %c1_58, %c0_59] : memref<1x2x14x14xf32, #tpu.memory_space<vmem>>, vector<1x1x8x8xf32>
    %87 = vector.shape_cast %86 : vector<1x1x8x8xf32> to vector<8x8xf32>
    %88 = vector.broadcast %85 : f32 to vector<8x8xf32>
    %89 = arith.mulf %88, %87 : vector<8x8xf32>
    %90 = arith.addf %84, %89 : vector<8x8xf32>
    %c56 = arith.constant 56 : index
    %91 = memref.load %arg2[%c56] : memref<98xf32, #tpu.memory_space<smem>>
    %c0_60 = arith.constant 0 : index
    %c1_61 = arith.constant 1 : index
    %c1_62 = arith.constant 1 : index
    %c0_63 = arith.constant 0 : index
    %92 = vector.load %arg1[%c0_60, %c1_61, %c1_62, %c0_63] : memref<1x2x14x14xf32, #tpu.memory_space<vmem>>, vector<1x1x8x8xf32>
    %93 = vector.shape_cast %92 : vector<1x1x8x8xf32> to vector<8x8xf32>
    %94 = vector.broadcast %91 : f32 to vector<8x8xf32>
    %95 = arith.mulf %94, %93 : vector<8x8xf32>
    %96 = arith.addf %90, %95 : vector<8x8xf32>
    %c8 = arith.constant 8 : index
    %97 = memref.load %arg2[%c8] : memref<98xf32, #tpu.memory_space<smem>>
    %c0_64 = arith.constant 0 : index
    %c0_65 = arith.constant 0 : index
    %c1_66 = arith.constant 1 : index
    %c1_67 = arith.constant 1 : index
    %98 = vector.load %arg1[%c0_64, %c0_65, %c1_66, %c1_67] : memref<1x2x14x14xf32, #tpu.memory_space<vmem>>, vector<1x1x8x8xf32>
    %99 = vector.shape_cast %98 : vector<1x1x8x8xf32> to vector<8x8xf32>
    %100 = vector.broadcast %97 : f32 to vector<8x8xf32>
    %101 = arith.mulf %100, %99 : vector<8x8xf32>
    %102 = arith.addf %96, %101 : vector<8x8xf32>
    %c57 = arith.constant 57 : index
    %103 = memref.load %arg2[%c57] : memref<98xf32, #tpu.memory_space<smem>>
    %c0_68 = arith.constant 0 : index
    %c1_69 = arith.constant 1 : index
    %c1_70 = arith.constant 1 : index
    %c1_71 = arith.constant 1 : index
    %104 = vector.load %arg1[%c0_68, %c1_69, %c1_70, %c1_71] : memref<1x2x14x14xf32, #tpu.memory_space<vmem>>, vector<1x1x8x8xf32>
    %105 = vector.shape_cast %104 : vector<1x1x8x8xf32> to vector<8x8xf32>
    %106 = vector.broadcast %103 : f32 to vector<8x8xf32>
    %107 = arith.mulf %106, %105 : vector<8x8xf32>
    %108 = arith.addf %102, %107 : vector<8x8xf32>
    %c9 = arith.constant 9 : index
    %109 = memref.load %arg2[%c9] : memref<98xf32, #tpu.memory_space<smem>>
    %c0_72 = arith.constant 0 : index
    %c0_73 = arith.constant 0 : index
    %c1_74 = arith.constant 1 : index
    %c2_75 = arith.constant 2 : index
    %110 = vector.load %arg1[%c0_72, %c0_73, %c1_74, %c2_75] : memref<1x2x14x14xf32, #tpu.memory_space<vmem>>, vector<1x1x8x8xf32>
    %111 = vector.shape_cast %110 : vector<1x1x8x8xf32> to vector<8x8xf32>
    %112 = vector.broadcast %109 : f32 to vector<8x8xf32>
    %113 = arith.mulf %112, %111 : vector<8x8xf32>
    %114 = arith.addf %108, %113 : vector<8x8xf32>
    %c58 = arith.constant 58 : index
    %115 = memref.load %arg2[%c58] : memref<98xf32, #tpu.memory_space<smem>>
    %c0_76 = arith.constant 0 : index
    %c1_77 = arith.constant 1 : index
    %c1_78 = arith.constant 1 : index
    %c2_79 = arith.constant 2 : index
    %116 = vector.load %arg1[%c0_76, %c1_77, %c1_78, %c2_79] : memref<1x2x14x14xf32, #tpu.memory_space<vmem>>, vector<1x1x8x8xf32>
    %117 = vector.shape_cast %116 : vector<1x1x8x8xf32> to vector<8x8xf32>
    %118 = vector.broadcast %115 : f32 to vector<8x8xf32>
    %119 = arith.mulf %118, %117 : vector<8x8xf32>
    %120 = arith.addf %114, %119 : vector<8x8xf32>
    %c10 = arith.constant 10 : index
    %121 = memref.load %arg2[%c10] : memref<98xf32, #tpu.memory_space<smem>>
    %c0_80 = arith.constant 0 : index
    %c0_81 = arith.constant 0 : index
    %c1_82 = arith.constant 1 : index
    %c3_83 = arith.constant 3 : index
    %122 = vector.load %arg1[%c0_80, %c0_81, %c1_82, %c3_83] : memref<1x2x14x14xf32, #tpu.memory_space<vmem>>, vector<1x1x8x8xf32>
    %123 = vector.shape_cast %122 : vector<1x1x8x8xf32> to vector<8x8xf32>
    %124 = vector.broadcast %121 : f32 to vector<8x8xf32>
    %125 = arith.mulf %124, %123 : vector<8x8xf32>
    %126 = arith.addf %120, %125 : vector<8x8xf32>
    %c59 = arith.constant 59 : index
    %127 = memref.load %arg2[%c59] : memref<98xf32, #tpu.memory_space<smem>>
    %c0_84 = arith.constant 0 : index
    %c1_85 = arith.constant 1 : index
    %c1_86 = arith.constant 1 : index
    %c3_87 = arith.constant 3 : index
    %128 = vector.load %arg1[%c0_84, %c1_85, %c1_86, %c3_87] : memref<1x2x14x14xf32, #tpu.memory_space<vmem>>, vector<1x1x8x8xf32>
    %129 = vector.shape_cast %128 : vector<1x1x8x8xf32> to vector<8x8xf32>
    %130 = vector.broadcast %127 : f32 to vector<8x8xf32>
    %131 = arith.mulf %130, %129 : vector<8x8xf32>
    %132 = arith.addf %126, %131 : vector<8x8xf32>
    %c11 = arith.constant 11 : index
    %133 = memref.load %arg2[%c11] : memref<98xf32, #tpu.memory_space<smem>>
    %c0_88 = arith.constant 0 : index
    %c0_89 = arith.constant 0 : index
    %c1_90 = arith.constant 1 : index
    %c4_91 = arith.constant 4 : index
    %134 = vector.load %arg1[%c0_88, %c0_89, %c1_90, %c4_91] : memref<1x2x14x14xf32, #tpu.memory_space<vmem>>, vector<1x1x8x8xf32>
    %135 = vector.shape_cast %134 : vector<1x1x8x8xf32> to vector<8x8xf32>
    %136 = vector.broadcast %133 : f32 to vector<8x8xf32>
    %137 = arith.mulf %136, %135 : vector<8x8xf32>
    %138 = arith.addf %132, %137 : vector<8x8xf32>
    %c60 = arith.constant 60 : index
    %139 = memref.load %arg2[%c60] : memref<98xf32, #tpu.memory_space<smem>>
    %c0_92 = arith.constant 0 : index
    %c1_93 = arith.constant 1 : index
    %c1_94 = arith.constant 1 : index
    %c4_95 = arith.constant 4 : index
    %140 = vector.load %arg1[%c0_92, %c1_93, %c1_94, %c4_95] : memref<1x2x14x14xf32, #tpu.memory_space<vmem>>, vector<1x1x8x8xf32>
    %141 = vector.shape_cast %140 : vector<1x1x8x8xf32> to vector<8x8xf32>
    %142 = vector.broadcast %139 : f32 to vector<8x8xf32>
    %143 = arith.mulf %142, %141 : vector<8x8xf32>
    %144 = arith.addf %138, %143 : vector<8x8xf32>
    %c12 = arith.constant 12 : index
    %145 = memref.load %arg2[%c12] : memref<98xf32, #tpu.memory_space<smem>>
    %c0_96 = arith.constant 0 : index
    %c0_97 = arith.constant 0 : index
    %c1_98 = arith.constant 1 : index
    %c5_99 = arith.constant 5 : index
    %146 = vector.load %arg1[%c0_96, %c0_97, %c1_98, %c5_99] : memref<1x2x14x14xf32, #tpu.memory_space<vmem>>, vector<1x1x8x8xf32>
    %147 = vector.shape_cast %146 : vector<1x1x8x8xf32> to vector<8x8xf32>
    %148 = vector.broadcast %145 : f32 to vector<8x8xf32>
    %149 = arith.mulf %148, %147 : vector<8x8xf32>
    %150 = arith.addf %144, %149 : vector<8x8xf32>
    %c61 = arith.constant 61 : index
    %151 = memref.load %arg2[%c61] : memref<98xf32, #tpu.memory_space<smem>>
    %c0_100 = arith.constant 0 : index
    %c1_101 = arith.constant 1 : index
    %c1_102 = arith.constant 1 : index
    %c5_103 = arith.constant 5 : index
    %152 = vector.load %arg1[%c0_100, %c1_101, %c1_102, %c5_103] : memref<1x2x14x14xf32, #tpu.memory_space<vmem>>, vector<1x1x8x8xf32>
    %153 = vector.shape_cast %152 : vector<1x1x8x8xf32> to vector<8x8xf32>
    %154 = vector.broadcast %151 : f32 to vector<8x8xf32>
    %155 = arith.mulf %154, %153 : vector<8x8xf32>
    %156 = arith.addf %150, %155 : vector<8x8xf32>
    %c13 = arith.constant 13 : index
    %157 = memref.load %arg2[%c13] : memref<98xf32, #tpu.memory_space<smem>>
    %c0_104 = arith.constant 0 : index
    %c0_105 = arith.constant 0 : index
    %c1_106 = arith.constant 1 : index
    %c6_107 = arith.constant 6 : index
    %158 = vector.load %arg1[%c0_104, %c0_105, %c1_106, %c6_107] : memref<1x2x14x14xf32, #tpu.memory_space<vmem>>, vector<1x1x8x8xf32>
    %159 = vector.shape_cast %158 : vector<1x1x8x8xf32> to vector<8x8xf32>
    %160 = vector.broadcast %157 : f32 to vector<8x8xf32>
    %161 = arith.mulf %160, %159 : vector<8x8xf32>
    %162 = arith.addf %156, %161 : vector<8x8xf32>
    %c62 = arith.constant 62 : index
    %163 = memref.load %arg2[%c62] : memref<98xf32, #tpu.memory_space<smem>>
    %c0_108 = arith.constant 0 : index
    %c1_109 = arith.constant 1 : index
    %c1_110 = arith.constant 1 : index
    %c6_111 = arith.constant 6 : index
    %164 = vector.load %arg1[%c0_108, %c1_109, %c1_110, %c6_111] : memref<1x2x14x14xf32, #tpu.memory_space<vmem>>, vector<1x1x8x8xf32>
    %165 = vector.shape_cast %164 : vector<1x1x8x8xf32> to vector<8x8xf32>
    %166 = vector.broadcast %163 : f32 to vector<8x8xf32>
    %167 = arith.mulf %166, %165 : vector<8x8xf32>
    %168 = arith.addf %162, %167 : vector<8x8xf32>
    %c14 = arith.constant 14 : index
    %169 = memref.load %arg2[%c14] : memref<98xf32, #tpu.memory_space<smem>>
    %c0_112 = arith.constant 0 : index
    %c0_113 = arith.constant 0 : index
    %c2_114 = arith.constant 2 : index
    %c0_115 = arith.constant 0 : index
    %170 = vector.load %arg1[%c0_112, %c0_113, %c2_114, %c0_115] : memref<1x2x14x14xf32, #tpu.memory_space<vmem>>, vector<1x1x8x8xf32>
    %171 = vector.shape_cast %170 : vector<1x1x8x8xf32> to vector<8x8xf32>
    %172 = vector.broadcast %169 : f32 to vector<8x8xf32>
    %173 = arith.mulf %172, %171 : vector<8x8xf32>
    %174 = arith.addf %168, %173 : vector<8x8xf32>
    %c63 = arith.constant 63 : index
    %175 = memref.load %arg2[%c63] : memref<98xf32, #tpu.memory_space<smem>>
    %c0_116 = arith.constant 0 : index
    %c1_117 = arith.constant 1 : index
    %c2_118 = arith.constant 2 : index
    %c0_119 = arith.constant 0 : index
    %176 = vector.load %arg1[%c0_116, %c1_117, %c2_118, %c0_119] : memref<1x2x14x14xf32, #tpu.memory_space<vmem>>, vector<1x1x8x8xf32>
    %177 = vector.shape_cast %176 : vector<1x1x8x8xf32> to vector<8x8xf32>
    %178 = vector.broadcast %175 : f32 to vector<8x8xf32>
    %179 = arith.mulf %178, %177 : vector<8x8xf32>
    %180 = arith.addf %174, %179 : vector<8x8xf32>
    %c15 = arith.constant 15 : index
    %181 = memref.load %arg2[%c15] : memref<98xf32, #tpu.memory_space<smem>>
    %c0_120 = arith.constant 0 : index
    %c0_121 = arith.constant 0 : index
    %c2_122 = arith.constant 2 : index
    %c1_123 = arith.constant 1 : index
    %182 = vector.load %arg1[%c0_120, %c0_121, %c2_122, %c1_123] : memref<1x2x14x14xf32, #tpu.memory_space<vmem>>, vector<1x1x8x8xf32>
    %183 = vector.shape_cast %182 : vector<1x1x8x8xf32> to vector<8x8xf32>
    %184 = vector.broadcast %181 : f32 to vector<8x8xf32>
    %185 = arith.mulf %184, %183 : vector<8x8xf32>
    %186 = arith.addf %180, %185 : vector<8x8xf32>
    %c64 = arith.constant 64 : index
    %187 = memref.load %arg2[%c64] : memref<98xf32, #tpu.memory_space<smem>>
    %c0_124 = arith.constant 0 : index
    %c1_125 = arith.constant 1 : index
    %c2_126 = arith.constant 2 : index
    %c1_127 = arith.constant 1 : index
    %188 = vector.load %arg1[%c0_124, %c1_125, %c2_126, %c1_127] : memref<1x2x14x14xf32, #tpu.memory_space<vmem>>, vector<1x1x8x8xf32>
    %189 = vector.shape_cast %188 : vector<1x1x8x8xf32> to vector<8x8xf32>
    %190 = vector.broadcast %187 : f32 to vector<8x8xf32>
    %191 = arith.mulf %190, %189 : vector<8x8xf32>
    %192 = arith.addf %186, %191 : vector<8x8xf32>
    %c16 = arith.constant 16 : index
    %193 = memref.load %arg2[%c16] : memref<98xf32, #tpu.memory_space<smem>>
    %c0_128 = arith.constant 0 : index
    %c0_129 = arith.constant 0 : index
    %c2_130 = arith.constant 2 : index
    %c2_131 = arith.constant 2 : index
    %194 = vector.load %arg1[%c0_128, %c0_129, %c2_130, %c2_131] : memref<1x2x14x14xf32, #tpu.memory_space<vmem>>, vector<1x1x8x8xf32>
    %195 = vector.shape_cast %194 : vector<1x1x8x8xf32> to vector<8x8xf32>
    %196 = vector.broadcast %193 : f32 to vector<8x8xf32>
    %197 = arith.mulf %196, %195 : vector<8x8xf32>
    %198 = arith.addf %192, %197 : vector<8x8xf32>
    %c65 = arith.constant 65 : index
    %199 = memref.load %arg2[%c65] : memref<98xf32, #tpu.memory_space<smem>>
    %c0_132 = arith.constant 0 : index
    %c1_133 = arith.constant 1 : index
    %c2_134 = arith.constant 2 : index
    %c2_135 = arith.constant 2 : index
    %200 = vector.load %arg1[%c0_132, %c1_133, %c2_134, %c2_135] : memref<1x2x14x14xf32, #tpu.memory_space<vmem>>, vector<1x1x8x8xf32>
    %201 = vector.shape_cast %200 : vector<1x1x8x8xf32> to vector<8x8xf32>
    %202 = vector.broadcast %199 : f32 to vector<8x8xf32>
    %203 = arith.mulf %202, %201 : vector<8x8xf32>
    %204 = arith.addf %198, %203 : vector<8x8xf32>
    %c17 = arith.constant 17 : index
    %205 = memref.load %arg2[%c17] : memref<98xf32, #tpu.memory_space<smem>>
    %c0_136 = arith.constant 0 : index
    %c0_137 = arith.constant 0 : index
    %c2_138 = arith.constant 2 : index
    %c3_139 = arith.constant 3 : index
    %206 = vector.load %arg1[%c0_136, %c0_137, %c2_138, %c3_139] : memref<1x2x14x14xf32, #tpu.memory_space<vmem>>, vector<1x1x8x8xf32>
    %207 = vector.shape_cast %206 : vector<1x1x8x8xf32> to vector<8x8xf32>
    %208 = vector.broadcast %205 : f32 to vector<8x8xf32>
    %209 = arith.mulf %208, %207 : vector<8x8xf32>
    %210 = arith.addf %204, %209 : vector<8x8xf32>
    %c66 = arith.constant 66 : index
    %211 = memref.load %arg2[%c66] : memref<98xf32, #tpu.memory_space<smem>>
    %c0_140 = arith.constant 0 : index
    %c1_141 = arith.constant 1 : index
    %c2_142 = arith.constant 2 : index
    %c3_143 = arith.constant 3 : index
    %212 = vector.load %arg1[%c0_140, %c1_141, %c2_142, %c3_143] : memref<1x2x14x14xf32, #tpu.memory_space<vmem>>, vector<1x1x8x8xf32>
    %213 = vector.shape_cast %212 : vector<1x1x8x8xf32> to vector<8x8xf32>
    %214 = vector.broadcast %211 : f32 to vector<8x8xf32>
    %215 = arith.mulf %214, %213 : vector<8x8xf32>
    %216 = arith.addf %210, %215 : vector<8x8xf32>
    %c18 = arith.constant 18 : index
    %217 = memref.load %arg2[%c18] : memref<98xf32, #tpu.memory_space<smem>>
    %c0_144 = arith.constant 0 : index
    %c0_145 = arith.constant 0 : index
    %c2_146 = arith.constant 2 : index
    %c4_147 = arith.constant 4 : index
    %218 = vector.load %arg1[%c0_144, %c0_145, %c2_146, %c4_147] : memref<1x2x14x14xf32, #tpu.memory_space<vmem>>, vector<1x1x8x8xf32>
    %219 = vector.shape_cast %218 : vector<1x1x8x8xf32> to vector<8x8xf32>
    %220 = vector.broadcast %217 : f32 to vector<8x8xf32>
    %221 = arith.mulf %220, %219 : vector<8x8xf32>
    %222 = arith.addf %216, %221 : vector<8x8xf32>
    %c67 = arith.constant 67 : index
    %223 = memref.load %arg2[%c67] : memref<98xf32, #tpu.memory_space<smem>>
    %c0_148 = arith.constant 0 : index
    %c1_149 = arith.constant 1 : index
    %c2_150 = arith.constant 2 : index
    %c4_151 = arith.constant 4 : index
    %224 = vector.load %arg1[%c0_148, %c1_149, %c2_150, %c4_151] : memref<1x2x14x14xf32, #tpu.memory_space<vmem>>, vector<1x1x8x8xf32>
    %225 = vector.shape_cast %224 : vector<1x1x8x8xf32> to vector<8x8xf32>
    %226 = vector.broadcast %223 : f32 to vector<8x8xf32>
    %227 = arith.mulf %226, %225 : vector<8x8xf32>
    %228 = arith.addf %222, %227 : vector<8x8xf32>
    %c19 = arith.constant 19 : index
    %229 = memref.load %arg2[%c19] : memref<98xf32, #tpu.memory_space<smem>>
    %c0_152 = arith.constant 0 : index
    %c0_153 = arith.constant 0 : index
    %c2_154 = arith.constant 2 : index
    %c5_155 = arith.constant 5 : index
    %230 = vector.load %arg1[%c0_152, %c0_153, %c2_154, %c5_155] : memref<1x2x14x14xf32, #tpu.memory_space<vmem>>, vector<1x1x8x8xf32>
    %231 = vector.shape_cast %230 : vector<1x1x8x8xf32> to vector<8x8xf32>
    %232 = vector.broadcast %229 : f32 to vector<8x8xf32>
    %233 = arith.mulf %232, %231 : vector<8x8xf32>
    %234 = arith.addf %228, %233 : vector<8x8xf32>
    %c68 = arith.constant 68 : index
    %235 = memref.load %arg2[%c68] : memref<98xf32, #tpu.memory_space<smem>>
    %c0_156 = arith.constant 0 : index
    %c1_157 = arith.constant 1 : index
    %c2_158 = arith.constant 2 : index
    %c5_159 = arith.constant 5 : index
    %236 = vector.load %arg1[%c0_156, %c1_157, %c2_158, %c5_159] : memref<1x2x14x14xf32, #tpu.memory_space<vmem>>, vector<1x1x8x8xf32>
    %237 = vector.shape_cast %236 : vector<1x1x8x8xf32> to vector<8x8xf32>
    %238 = vector.broadcast %235 : f32 to vector<8x8xf32>
    %239 = arith.mulf %238, %237 : vector<8x8xf32>
    %240 = arith.addf %234, %239 : vector<8x8xf32>
    %c20 = arith.constant 20 : index
    %241 = memref.load %arg2[%c20] : memref<98xf32, #tpu.memory_space<smem>>
    %c0_160 = arith.constant 0 : index
    %c0_161 = arith.constant 0 : index
    %c2_162 = arith.constant 2 : index
    %c6_163 = arith.constant 6 : index
    %242 = vector.load %arg1[%c0_160, %c0_161, %c2_162, %c6_163] : memref<1x2x14x14xf32, #tpu.memory_space<vmem>>, vector<1x1x8x8xf32>
    %243 = vector.shape_cast %242 : vector<1x1x8x8xf32> to vector<8x8xf32>
    %244 = vector.broadcast %241 : f32 to vector<8x8xf32>
    %245 = arith.mulf %244, %243 : vector<8x8xf32>
    %246 = arith.addf %240, %245 : vector<8x8xf32>
    %c69 = arith.constant 69 : index
    %247 = memref.load %arg2[%c69] : memref<98xf32, #tpu.memory_space<smem>>
    %c0_164 = arith.constant 0 : index
    %c1_165 = arith.constant 1 : index
    %c2_166 = arith.constant 2 : index
    %c6_167 = arith.constant 6 : index
    %248 = vector.load %arg1[%c0_164, %c1_165, %c2_166, %c6_167] : memref<1x2x14x14xf32, #tpu.memory_space<vmem>>, vector<1x1x8x8xf32>
    %249 = vector.shape_cast %248 : vector<1x1x8x8xf32> to vector<8x8xf32>
    %250 = vector.broadcast %247 : f32 to vector<8x8xf32>
    %251 = arith.mulf %250, %249 : vector<8x8xf32>
    %252 = arith.addf %246, %251 : vector<8x8xf32>
    %c21 = arith.constant 21 : index
    %253 = memref.load %arg2[%c21] : memref<98xf32, #tpu.memory_space<smem>>
    %c0_168 = arith.constant 0 : index
    %c0_169 = arith.constant 0 : index
    %c3_170 = arith.constant 3 : index
    %c0_171 = arith.constant 0 : index
    %254 = vector.load %arg1[%c0_168, %c0_169, %c3_170, %c0_171] : memref<1x2x14x14xf32, #tpu.memory_space<vmem>>, vector<1x1x8x8xf32>
    %255 = vector.shape_cast %254 : vector<1x1x8x8xf32> to vector<8x8xf32>
    %256 = vector.broadcast %253 : f32 to vector<8x8xf32>
    %257 = arith.mulf %256, %255 : vector<8x8xf32>
    %258 = arith.addf %252, %257 : vector<8x8xf32>
    %c70 = arith.constant 70 : index
    %259 = memref.load %arg2[%c70] : memref<98xf32, #tpu.memory_space<smem>>
    %c0_172 = arith.constant 0 : index
    %c1_173 = arith.constant 1 : index
    %c3_174 = arith.constant 3 : index
    %c0_175 = arith.constant 0 : index
    %260 = vector.load %arg1[%c0_172, %c1_173, %c3_174, %c0_175] : memref<1x2x14x14xf32, #tpu.memory_space<vmem>>, vector<1x1x8x8xf32>
    %261 = vector.shape_cast %260 : vector<1x1x8x8xf32> to vector<8x8xf32>
    %262 = vector.broadcast %259 : f32 to vector<8x8xf32>
    %263 = arith.mulf %262, %261 : vector<8x8xf32>
    %264 = arith.addf %258, %263 : vector<8x8xf32>
    %c22 = arith.constant 22 : index
    %265 = memref.load %arg2[%c22] : memref<98xf32, #tpu.memory_space<smem>>
    %c0_176 = arith.constant 0 : index
    %c0_177 = arith.constant 0 : index
    %c3_178 = arith.constant 3 : index
    %c1_179 = arith.constant 1 : index
    %266 = vector.load %arg1[%c0_176, %c0_177, %c3_178, %c1_179] : memref<1x2x14x14xf32, #tpu.memory_space<vmem>>, vector<1x1x8x8xf32>
    %267 = vector.shape_cast %266 : vector<1x1x8x8xf32> to vector<8x8xf32>
    %268 = vector.broadcast %265 : f32 to vector<8x8xf32>
    %269 = arith.mulf %268, %267 : vector<8x8xf32>
    %270 = arith.addf %264, %269 : vector<8x8xf32>
    %c71 = arith.constant 71 : index
    %271 = memref.load %arg2[%c71] : memref<98xf32, #tpu.memory_space<smem>>
    %c0_180 = arith.constant 0 : index
    %c1_181 = arith.constant 1 : index
    %c3_182 = arith.constant 3 : index
    %c1_183 = arith.constant 1 : index
    %272 = vector.load %arg1[%c0_180, %c1_181, %c3_182, %c1_183] : memref<1x2x14x14xf32, #tpu.memory_space<vmem>>, vector<1x1x8x8xf32>
    %273 = vector.shape_cast %272 : vector<1x1x8x8xf32> to vector<8x8xf32>
    %274 = vector.broadcast %271 : f32 to vector<8x8xf32>
    %275 = arith.mulf %274, %273 : vector<8x8xf32>
    %276 = arith.addf %270, %275 : vector<8x8xf32>
    %c23 = arith.constant 23 : index
    %277 = memref.load %arg2[%c23] : memref<98xf32, #tpu.memory_space<smem>>
    %c0_184 = arith.constant 0 : index
    %c0_185 = arith.constant 0 : index
    %c3_186 = arith.constant 3 : index
    %c2_187 = arith.constant 2 : index
    %278 = vector.load %arg1[%c0_184, %c0_185, %c3_186, %c2_187] : memref<1x2x14x14xf32, #tpu.memory_space<vmem>>, vector<1x1x8x8xf32>
    %279 = vector.shape_cast %278 : vector<1x1x8x8xf32> to vector<8x8xf32>
    %280 = vector.broadcast %277 : f32 to vector<8x8xf32>
    %281 = arith.mulf %280, %279 : vector<8x8xf32>
    %282 = arith.addf %276, %281 : vector<8x8xf32>
    %c72 = arith.constant 72 : index
    %283 = memref.load %arg2[%c72] : memref<98xf32, #tpu.memory_space<smem>>
    %c0_188 = arith.constant 0 : index
    %c1_189 = arith.constant 1 : index
    %c3_190 = arith.constant 3 : index
    %c2_191 = arith.constant 2 : index
    %284 = vector.load %arg1[%c0_188, %c1_189, %c3_190, %c2_191] : memref<1x2x14x14xf32, #tpu.memory_space<vmem>>, vector<1x1x8x8xf32>
    %285 = vector.shape_cast %284 : vector<1x1x8x8xf32> to vector<8x8xf32>
    %286 = vector.broadcast %283 : f32 to vector<8x8xf32>
    %287 = arith.mulf %286, %285 : vector<8x8xf32>
    %288 = arith.addf %282, %287 : vector<8x8xf32>
    %c24 = arith.constant 24 : index
    %289 = memref.load %arg2[%c24] : memref<98xf32, #tpu.memory_space<smem>>
    %c0_192 = arith.constant 0 : index
    %c0_193 = arith.constant 0 : index
    %c3_194 = arith.constant 3 : index
    %c3_195 = arith.constant 3 : index
    %290 = vector.load %arg1[%c0_192, %c0_193, %c3_194, %c3_195] : memref<1x2x14x14xf32, #tpu.memory_space<vmem>>, vector<1x1x8x8xf32>
    %291 = vector.shape_cast %290 : vector<1x1x8x8xf32> to vector<8x8xf32>
    %292 = vector.broadcast %289 : f32 to vector<8x8xf32>
    %293 = arith.mulf %292, %291 : vector<8x8xf32>
    %294 = arith.addf %288, %293 : vector<8x8xf32>
    %c73 = arith.constant 73 : index
    %295 = memref.load %arg2[%c73] : memref<98xf32, #tpu.memory_space<smem>>
    %c0_196 = arith.constant 0 : index
    %c1_197 = arith.constant 1 : index
    %c3_198 = arith.constant 3 : index
    %c3_199 = arith.constant 3 : index
    %296 = vector.load %arg1[%c0_196, %c1_197, %c3_198, %c3_199] : memref<1x2x14x14xf32, #tpu.memory_space<vmem>>, vector<1x1x8x8xf32>
    %297 = vector.shape_cast %296 : vector<1x1x8x8xf32> to vector<8x8xf32>
    %298 = vector.broadcast %295 : f32 to vector<8x8xf32>
    %299 = arith.mulf %298, %297 : vector<8x8xf32>
    %300 = arith.addf %294, %299 : vector<8x8xf32>
    %c25 = arith.constant 25 : index
    %301 = memref.load %arg2[%c25] : memref<98xf32, #tpu.memory_space<smem>>
    %c0_200 = arith.constant 0 : index
    %c0_201 = arith.constant 0 : index
    %c3_202 = arith.constant 3 : index
    %c4_203 = arith.constant 4 : index
    %302 = vector.load %arg1[%c0_200, %c0_201, %c3_202, %c4_203] : memref<1x2x14x14xf32, #tpu.memory_space<vmem>>, vector<1x1x8x8xf32>
    %303 = vector.shape_cast %302 : vector<1x1x8x8xf32> to vector<8x8xf32>
    %304 = vector.broadcast %301 : f32 to vector<8x8xf32>
    %305 = arith.mulf %304, %303 : vector<8x8xf32>
    %306 = arith.addf %300, %305 : vector<8x8xf32>
    %c74 = arith.constant 74 : index
    %307 = memref.load %arg2[%c74] : memref<98xf32, #tpu.memory_space<smem>>
    %c0_204 = arith.constant 0 : index
    %c1_205 = arith.constant 1 : index
    %c3_206 = arith.constant 3 : index
    %c4_207 = arith.constant 4 : index
    %308 = vector.load %arg1[%c0_204, %c1_205, %c3_206, %c4_207] : memref<1x2x14x14xf32, #tpu.memory_space<vmem>>, vector<1x1x8x8xf32>
    %309 = vector.shape_cast %308 : vector<1x1x8x8xf32> to vector<8x8xf32>
    %310 = vector.broadcast %307 : f32 to vector<8x8xf32>
    %311 = arith.mulf %310, %309 : vector<8x8xf32>
    %312 = arith.addf %306, %311 : vector<8x8xf32>
    %c26 = arith.constant 26 : index
    %313 = memref.load %arg2[%c26] : memref<98xf32, #tpu.memory_space<smem>>
    %c0_208 = arith.constant 0 : index
    %c0_209 = arith.constant 0 : index
    %c3_210 = arith.constant 3 : index
    %c5_211 = arith.constant 5 : index
    %314 = vector.load %arg1[%c0_208, %c0_209, %c3_210, %c5_211] : memref<1x2x14x14xf32, #tpu.memory_space<vmem>>, vector<1x1x8x8xf32>
    %315 = vector.shape_cast %314 : vector<1x1x8x8xf32> to vector<8x8xf32>
    %316 = vector.broadcast %313 : f32 to vector<8x8xf32>
    %317 = arith.mulf %316, %315 : vector<8x8xf32>
    %318 = arith.addf %312, %317 : vector<8x8xf32>
    %c75 = arith.constant 75 : index
    %319 = memref.load %arg2[%c75] : memref<98xf32, #tpu.memory_space<smem>>
    %c0_212 = arith.constant 0 : index
    %c1_213 = arith.constant 1 : index
    %c3_214 = arith.constant 3 : index
    %c5_215 = arith.constant 5 : index
    %320 = vector.load %arg1[%c0_212, %c1_213, %c3_214, %c5_215] : memref<1x2x14x14xf32, #tpu.memory_space<vmem>>, vector<1x1x8x8xf32>
    %321 = vector.shape_cast %320 : vector<1x1x8x8xf32> to vector<8x8xf32>
    %322 = vector.broadcast %319 : f32 to vector<8x8xf32>
    %323 = arith.mulf %322, %321 : vector<8x8xf32>
    %324 = arith.addf %318, %323 : vector<8x8xf32>
    %c27 = arith.constant 27 : index
    %325 = memref.load %arg2[%c27] : memref<98xf32, #tpu.memory_space<smem>>
    %c0_216 = arith.constant 0 : index
    %c0_217 = arith.constant 0 : index
    %c3_218 = arith.constant 3 : index
    %c6_219 = arith.constant 6 : index
    %326 = vector.load %arg1[%c0_216, %c0_217, %c3_218, %c6_219] : memref<1x2x14x14xf32, #tpu.memory_space<vmem>>, vector<1x1x8x8xf32>
    %327 = vector.shape_cast %326 : vector<1x1x8x8xf32> to vector<8x8xf32>
    %328 = vector.broadcast %325 : f32 to vector<8x8xf32>
    %329 = arith.mulf %328, %327 : vector<8x8xf32>
    %330 = arith.addf %324, %329 : vector<8x8xf32>
    %c76 = arith.constant 76 : index
    %331 = memref.load %arg2[%c76] : memref<98xf32, #tpu.memory_space<smem>>
    %c0_220 = arith.constant 0 : index
    %c1_221 = arith.constant 1 : index
    %c3_222 = arith.constant 3 : index
    %c6_223 = arith.constant 6 : index
    %332 = vector.load %arg1[%c0_220, %c1_221, %c3_222, %c6_223] : memref<1x2x14x14xf32, #tpu.memory_space<vmem>>, vector<1x1x8x8xf32>
    %333 = vector.shape_cast %332 : vector<1x1x8x8xf32> to vector<8x8xf32>
    %334 = vector.broadcast %331 : f32 to vector<8x8xf32>
    %335 = arith.mulf %334, %333 : vector<8x8xf32>
    %336 = arith.addf %330, %335 : vector<8x8xf32>
    %c28 = arith.constant 28 : index
    %337 = memref.load %arg2[%c28] : memref<98xf32, #tpu.memory_space<smem>>
    %c0_224 = arith.constant 0 : index
    %c0_225 = arith.constant 0 : index
    %c4_226 = arith.constant 4 : index
    %c0_227 = arith.constant 0 : index
    %338 = vector.load %arg1[%c0_224, %c0_225, %c4_226, %c0_227] : memref<1x2x14x14xf32, #tpu.memory_space<vmem>>, vector<1x1x8x8xf32>
    %339 = vector.shape_cast %338 : vector<1x1x8x8xf32> to vector<8x8xf32>
    %340 = vector.broadcast %337 : f32 to vector<8x8xf32>
    %341 = arith.mulf %340, %339 : vector<8x8xf32>
    %342 = arith.addf %336, %341 : vector<8x8xf32>
    %c77 = arith.constant 77 : index
    %343 = memref.load %arg2[%c77] : memref<98xf32, #tpu.memory_space<smem>>
    %c0_228 = arith.constant 0 : index
    %c1_229 = arith.constant 1 : index
    %c4_230 = arith.constant 4 : index
    %c0_231 = arith.constant 0 : index
    %344 = vector.load %arg1[%c0_228, %c1_229, %c4_230, %c0_231] : memref<1x2x14x14xf32, #tpu.memory_space<vmem>>, vector<1x1x8x8xf32>
    %345 = vector.shape_cast %344 : vector<1x1x8x8xf32> to vector<8x8xf32>
    %346 = vector.broadcast %343 : f32 to vector<8x8xf32>
    %347 = arith.mulf %346, %345 : vector<8x8xf32>
    %348 = arith.addf %342, %347 : vector<8x8xf32>
    %c29 = arith.constant 29 : index
    %349 = memref.load %arg2[%c29] : memref<98xf32, #tpu.memory_space<smem>>
    %c0_232 = arith.constant 0 : index
    %c0_233 = arith.constant 0 : index
    %c4_234 = arith.constant 4 : index
    %c1_235 = arith.constant 1 : index
    %350 = vector.load %arg1[%c0_232, %c0_233, %c4_234, %c1_235] : memref<1x2x14x14xf32, #tpu.memory_space<vmem>>, vector<1x1x8x8xf32>
    %351 = vector.shape_cast %350 : vector<1x1x8x8xf32> to vector<8x8xf32>
    %352 = vector.broadcast %349 : f32 to vector<8x8xf32>
    %353 = arith.mulf %352, %351 : vector<8x8xf32>
    %354 = arith.addf %348, %353 : vector<8x8xf32>
    %c78 = arith.constant 78 : index
    %355 = memref.load %arg2[%c78] : memref<98xf32, #tpu.memory_space<smem>>
    %c0_236 = arith.constant 0 : index
    %c1_237 = arith.constant 1 : index
    %c4_238 = arith.constant 4 : index
    %c1_239 = arith.constant 1 : index
    %356 = vector.load %arg1[%c0_236, %c1_237, %c4_238, %c1_239] : memref<1x2x14x14xf32, #tpu.memory_space<vmem>>, vector<1x1x8x8xf32>
    %357 = vector.shape_cast %356 : vector<1x1x8x8xf32> to vector<8x8xf32>
    %358 = vector.broadcast %355 : f32 to vector<8x8xf32>
    %359 = arith.mulf %358, %357 : vector<8x8xf32>
    %360 = arith.addf %354, %359 : vector<8x8xf32>
    %c30 = arith.constant 30 : index
    %361 = memref.load %arg2[%c30] : memref<98xf32, #tpu.memory_space<smem>>
    %c0_240 = arith.constant 0 : index
    %c0_241 = arith.constant 0 : index
    %c4_242 = arith.constant 4 : index
    %c2_243 = arith.constant 2 : index
    %362 = vector.load %arg1[%c0_240, %c0_241, %c4_242, %c2_243] : memref<1x2x14x14xf32, #tpu.memory_space<vmem>>, vector<1x1x8x8xf32>
    %363 = vector.shape_cast %362 : vector<1x1x8x8xf32> to vector<8x8xf32>
    %364 = vector.broadcast %361 : f32 to vector<8x8xf32>
    %365 = arith.mulf %364, %363 : vector<8x8xf32>
    %366 = arith.addf %360, %365 : vector<8x8xf32>
    %c79 = arith.constant 79 : index
    %367 = memref.load %arg2[%c79] : memref<98xf32, #tpu.memory_space<smem>>
    %c0_244 = arith.constant 0 : index
    %c1_245 = arith.constant 1 : index
    %c4_246 = arith.constant 4 : index
    %c2_247 = arith.constant 2 : index
    %368 = vector.load %arg1[%c0_244, %c1_245, %c4_246, %c2_247] : memref<1x2x14x14xf32, #tpu.memory_space<vmem>>, vector<1x1x8x8xf32>
    %369 = vector.shape_cast %368 : vector<1x1x8x8xf32> to vector<8x8xf32>
    %370 = vector.broadcast %367 : f32 to vector<8x8xf32>
    %371 = arith.mulf %370, %369 : vector<8x8xf32>
    %372 = arith.addf %366, %371 : vector<8x8xf32>
    %c31 = arith.constant 31 : index
    %373 = memref.load %arg2[%c31] : memref<98xf32, #tpu.memory_space<smem>>
    %c0_248 = arith.constant 0 : index
    %c0_249 = arith.constant 0 : index
    %c4_250 = arith.constant 4 : index
    %c3_251 = arith.constant 3 : index
    %374 = vector.load %arg1[%c0_248, %c0_249, %c4_250, %c3_251] : memref<1x2x14x14xf32, #tpu.memory_space<vmem>>, vector<1x1x8x8xf32>
    %375 = vector.shape_cast %374 : vector<1x1x8x8xf32> to vector<8x8xf32>
    %376 = vector.broadcast %373 : f32 to vector<8x8xf32>
    %377 = arith.mulf %376, %375 : vector<8x8xf32>
    %378 = arith.addf %372, %377 : vector<8x8xf32>
    %c80 = arith.constant 80 : index
    %379 = memref.load %arg2[%c80] : memref<98xf32, #tpu.memory_space<smem>>
    %c0_252 = arith.constant 0 : index
    %c1_253 = arith.constant 1 : index
    %c4_254 = arith.constant 4 : index
    %c3_255 = arith.constant 3 : index
    %380 = vector.load %arg1[%c0_252, %c1_253, %c4_254, %c3_255] : memref<1x2x14x14xf32, #tpu.memory_space<vmem>>, vector<1x1x8x8xf32>
    %381 = vector.shape_cast %380 : vector<1x1x8x8xf32> to vector<8x8xf32>
    %382 = vector.broadcast %379 : f32 to vector<8x8xf32>
    %383 = arith.mulf %382, %381 : vector<8x8xf32>
    %384 = arith.addf %378, %383 : vector<8x8xf32>
    %c32 = arith.constant 32 : index
    %385 = memref.load %arg2[%c32] : memref<98xf32, #tpu.memory_space<smem>>
    %c0_256 = arith.constant 0 : index
    %c0_257 = arith.constant 0 : index
    %c4_258 = arith.constant 4 : index
    %c4_259 = arith.constant 4 : index
    %386 = vector.load %arg1[%c0_256, %c0_257, %c4_258, %c4_259] : memref<1x2x14x14xf32, #tpu.memory_space<vmem>>, vector<1x1x8x8xf32>
    %387 = vector.shape_cast %386 : vector<1x1x8x8xf32> to vector<8x8xf32>
    %388 = vector.broadcast %385 : f32 to vector<8x8xf32>
    %389 = arith.mulf %388, %387 : vector<8x8xf32>
    %390 = arith.addf %384, %389 : vector<8x8xf32>
    %c81 = arith.constant 81 : index
    %391 = memref.load %arg2[%c81] : memref<98xf32, #tpu.memory_space<smem>>
    %c0_260 = arith.constant 0 : index
    %c1_261 = arith.constant 1 : index
    %c4_262 = arith.constant 4 : index
    %c4_263 = arith.constant 4 : index
    %392 = vector.load %arg1[%c0_260, %c1_261, %c4_262, %c4_263] : memref<1x2x14x14xf32, #tpu.memory_space<vmem>>, vector<1x1x8x8xf32>
    %393 = vector.shape_cast %392 : vector<1x1x8x8xf32> to vector<8x8xf32>
    %394 = vector.broadcast %391 : f32 to vector<8x8xf32>
    %395 = arith.mulf %394, %393 : vector<8x8xf32>
    %396 = arith.addf %390, %395 : vector<8x8xf32>
    %c33 = arith.constant 33 : index
    %397 = memref.load %arg2[%c33] : memref<98xf32, #tpu.memory_space<smem>>
    %c0_264 = arith.constant 0 : index
    %c0_265 = arith.constant 0 : index
    %c4_266 = arith.constant 4 : index
    %c5_267 = arith.constant 5 : index
    %398 = vector.load %arg1[%c0_264, %c0_265, %c4_266, %c5_267] : memref<1x2x14x14xf32, #tpu.memory_space<vmem>>, vector<1x1x8x8xf32>
    %399 = vector.shape_cast %398 : vector<1x1x8x8xf32> to vector<8x8xf32>
    %400 = vector.broadcast %397 : f32 to vector<8x8xf32>
    %401 = arith.mulf %400, %399 : vector<8x8xf32>
    %402 = arith.addf %396, %401 : vector<8x8xf32>
    %c82 = arith.constant 82 : index
    %403 = memref.load %arg2[%c82] : memref<98xf32, #tpu.memory_space<smem>>
    %c0_268 = arith.constant 0 : index
    %c1_269 = arith.constant 1 : index
    %c4_270 = arith.constant 4 : index
    %c5_271 = arith.constant 5 : index
    %404 = vector.load %arg1[%c0_268, %c1_269, %c4_270, %c5_271] : memref<1x2x14x14xf32, #tpu.memory_space<vmem>>, vector<1x1x8x8xf32>
    %405 = vector.shape_cast %404 : vector<1x1x8x8xf32> to vector<8x8xf32>
    %406 = vector.broadcast %403 : f32 to vector<8x8xf32>
    %407 = arith.mulf %406, %405 : vector<8x8xf32>
    %408 = arith.addf %402, %407 : vector<8x8xf32>
    %c34 = arith.constant 34 : index
    %409 = memref.load %arg2[%c34] : memref<98xf32, #tpu.memory_space<smem>>
    %c0_272 = arith.constant 0 : index
    %c0_273 = arith.constant 0 : index
    %c4_274 = arith.constant 4 : index
    %c6_275 = arith.constant 6 : index
    %410 = vector.load %arg1[%c0_272, %c0_273, %c4_274, %c6_275] : memref<1x2x14x14xf32, #tpu.memory_space<vmem>>, vector<1x1x8x8xf32>
    %411 = vector.shape_cast %410 : vector<1x1x8x8xf32> to vector<8x8xf32>
    %412 = vector.broadcast %409 : f32 to vector<8x8xf32>
    %413 = arith.mulf %412, %411 : vector<8x8xf32>
    %414 = arith.addf %408, %413 : vector<8x8xf32>
    %c83 = arith.constant 83 : index
    %415 = memref.load %arg2[%c83] : memref<98xf32, #tpu.memory_space<smem>>
    %c0_276 = arith.constant 0 : index
    %c1_277 = arith.constant 1 : index
    %c4_278 = arith.constant 4 : index
    %c6_279 = arith.constant 6 : index
    %416 = vector.load %arg1[%c0_276, %c1_277, %c4_278, %c6_279] : memref<1x2x14x14xf32, #tpu.memory_space<vmem>>, vector<1x1x8x8xf32>
    %417 = vector.shape_cast %416 : vector<1x1x8x8xf32> to vector<8x8xf32>
    %418 = vector.broadcast %415 : f32 to vector<8x8xf32>
    %419 = arith.mulf %418, %417 : vector<8x8xf32>
    %420 = arith.addf %414, %419 : vector<8x8xf32>
    %c35 = arith.constant 35 : index
    %421 = memref.load %arg2[%c35] : memref<98xf32, #tpu.memory_space<smem>>
    %c0_280 = arith.constant 0 : index
    %c0_281 = arith.constant 0 : index
    %c5_282 = arith.constant 5 : index
    %c0_283 = arith.constant 0 : index
    %422 = vector.load %arg1[%c0_280, %c0_281, %c5_282, %c0_283] : memref<1x2x14x14xf32, #tpu.memory_space<vmem>>, vector<1x1x8x8xf32>
    %423 = vector.shape_cast %422 : vector<1x1x8x8xf32> to vector<8x8xf32>
    %424 = vector.broadcast %421 : f32 to vector<8x8xf32>
    %425 = arith.mulf %424, %423 : vector<8x8xf32>
    %426 = arith.addf %420, %425 : vector<8x8xf32>
    %c84 = arith.constant 84 : index
    %427 = memref.load %arg2[%c84] : memref<98xf32, #tpu.memory_space<smem>>
    %c0_284 = arith.constant 0 : index
    %c1_285 = arith.constant 1 : index
    %c5_286 = arith.constant 5 : index
    %c0_287 = arith.constant 0 : index
    %428 = vector.load %arg1[%c0_284, %c1_285, %c5_286, %c0_287] : memref<1x2x14x14xf32, #tpu.memory_space<vmem>>, vector<1x1x8x8xf32>
    %429 = vector.shape_cast %428 : vector<1x1x8x8xf32> to vector<8x8xf32>
    %430 = vector.broadcast %427 : f32 to vector<8x8xf32>
    %431 = arith.mulf %430, %429 : vector<8x8xf32>
    %432 = arith.addf %426, %431 : vector<8x8xf32>
    %c36 = arith.constant 36 : index
    %433 = memref.load %arg2[%c36] : memref<98xf32, #tpu.memory_space<smem>>
    %c0_288 = arith.constant 0 : index
    %c0_289 = arith.constant 0 : index
    %c5_290 = arith.constant 5 : index
    %c1_291 = arith.constant 1 : index
    %434 = vector.load %arg1[%c0_288, %c0_289, %c5_290, %c1_291] : memref<1x2x14x14xf32, #tpu.memory_space<vmem>>, vector<1x1x8x8xf32>
    %435 = vector.shape_cast %434 : vector<1x1x8x8xf32> to vector<8x8xf32>
    %436 = vector.broadcast %433 : f32 to vector<8x8xf32>
    %437 = arith.mulf %436, %435 : vector<8x8xf32>
    %438 = arith.addf %432, %437 : vector<8x8xf32>
    %c85 = arith.constant 85 : index
    %439 = memref.load %arg2[%c85] : memref<98xf32, #tpu.memory_space<smem>>
    %c0_292 = arith.constant 0 : index
    %c1_293 = arith.constant 1 : index
    %c5_294 = arith.constant 5 : index
    %c1_295 = arith.constant 1 : index
    %440 = vector.load %arg1[%c0_292, %c1_293, %c5_294, %c1_295] : memref<1x2x14x14xf32, #tpu.memory_space<vmem>>, vector<1x1x8x8xf32>
    %441 = vector.shape_cast %440 : vector<1x1x8x8xf32> to vector<8x8xf32>
    %442 = vector.broadcast %439 : f32 to vector<8x8xf32>
    %443 = arith.mulf %442, %441 : vector<8x8xf32>
    %444 = arith.addf %438, %443 : vector<8x8xf32>
    %c37 = arith.constant 37 : index
    %445 = memref.load %arg2[%c37] : memref<98xf32, #tpu.memory_space<smem>>
    %c0_296 = arith.constant 0 : index
    %c0_297 = arith.constant 0 : index
    %c5_298 = arith.constant 5 : index
    %c2_299 = arith.constant 2 : index
    %446 = vector.load %arg1[%c0_296, %c0_297, %c5_298, %c2_299] : memref<1x2x14x14xf32, #tpu.memory_space<vmem>>, vector<1x1x8x8xf32>
    %447 = vector.shape_cast %446 : vector<1x1x8x8xf32> to vector<8x8xf32>
    %448 = vector.broadcast %445 : f32 to vector<8x8xf32>
    %449 = arith.mulf %448, %447 : vector<8x8xf32>
    %450 = arith.addf %444, %449 : vector<8x8xf32>
    %c86 = arith.constant 86 : index
    %451 = memref.load %arg2[%c86] : memref<98xf32, #tpu.memory_space<smem>>
    %c0_300 = arith.constant 0 : index
    %c1_301 = arith.constant 1 : index
    %c5_302 = arith.constant 5 : index
    %c2_303 = arith.constant 2 : index
    %452 = vector.load %arg1[%c0_300, %c1_301, %c5_302, %c2_303] : memref<1x2x14x14xf32, #tpu.memory_space<vmem>>, vector<1x1x8x8xf32>
    %453 = vector.shape_cast %452 : vector<1x1x8x8xf32> to vector<8x8xf32>
    %454 = vector.broadcast %451 : f32 to vector<8x8xf32>
    %455 = arith.mulf %454, %453 : vector<8x8xf32>
    %456 = arith.addf %450, %455 : vector<8x8xf32>
    %c38 = arith.constant 38 : index
    %457 = memref.load %arg2[%c38] : memref<98xf32, #tpu.memory_space<smem>>
    %c0_304 = arith.constant 0 : index
    %c0_305 = arith.constant 0 : index
    %c5_306 = arith.constant 5 : index
    %c3_307 = arith.constant 3 : index
    %458 = vector.load %arg1[%c0_304, %c0_305, %c5_306, %c3_307] : memref<1x2x14x14xf32, #tpu.memory_space<vmem>>, vector<1x1x8x8xf32>
    %459 = vector.shape_cast %458 : vector<1x1x8x8xf32> to vector<8x8xf32>
    %460 = vector.broadcast %457 : f32 to vector<8x8xf32>
    %461 = arith.mulf %460, %459 : vector<8x8xf32>
    %462 = arith.addf %456, %461 : vector<8x8xf32>
    %c87 = arith.constant 87 : index
    %463 = memref.load %arg2[%c87] : memref<98xf32, #tpu.memory_space<smem>>
    %c0_308 = arith.constant 0 : index
    %c1_309 = arith.constant 1 : index
    %c5_310 = arith.constant 5 : index
    %c3_311 = arith.constant 3 : index
    %464 = vector.load %arg1[%c0_308, %c1_309, %c5_310, %c3_311] : memref<1x2x14x14xf32, #tpu.memory_space<vmem>>, vector<1x1x8x8xf32>
    %465 = vector.shape_cast %464 : vector<1x1x8x8xf32> to vector<8x8xf32>
    %466 = vector.broadcast %463 : f32 to vector<8x8xf32>
    %467 = arith.mulf %466, %465 : vector<8x8xf32>
    %468 = arith.addf %462, %467 : vector<8x8xf32>
    %c39 = arith.constant 39 : index
    %469 = memref.load %arg2[%c39] : memref<98xf32, #tpu.memory_space<smem>>
    %c0_312 = arith.constant 0 : index
    %c0_313 = arith.constant 0 : index
    %c5_314 = arith.constant 5 : index
    %c4_315 = arith.constant 4 : index
    %470 = vector.load %arg1[%c0_312, %c0_313, %c5_314, %c4_315] : memref<1x2x14x14xf32, #tpu.memory_space<vmem>>, vector<1x1x8x8xf32>
    %471 = vector.shape_cast %470 : vector<1x1x8x8xf32> to vector<8x8xf32>
    %472 = vector.broadcast %469 : f32 to vector<8x8xf32>
    %473 = arith.mulf %472, %471 : vector<8x8xf32>
    %474 = arith.addf %468, %473 : vector<8x8xf32>
    %c88 = arith.constant 88 : index
    %475 = memref.load %arg2[%c88] : memref<98xf32, #tpu.memory_space<smem>>
    %c0_316 = arith.constant 0 : index
    %c1_317 = arith.constant 1 : index
    %c5_318 = arith.constant 5 : index
    %c4_319 = arith.constant 4 : index
    %476 = vector.load %arg1[%c0_316, %c1_317, %c5_318, %c4_319] : memref<1x2x14x14xf32, #tpu.memory_space<vmem>>, vector<1x1x8x8xf32>
    %477 = vector.shape_cast %476 : vector<1x1x8x8xf32> to vector<8x8xf32>
    %478 = vector.broadcast %475 : f32 to vector<8x8xf32>
    %479 = arith.mulf %478, %477 : vector<8x8xf32>
    %480 = arith.addf %474, %479 : vector<8x8xf32>
    %c40 = arith.constant 40 : index
    %481 = memref.load %arg2[%c40] : memref<98xf32, #tpu.memory_space<smem>>
    %c0_320 = arith.constant 0 : index
    %c0_321 = arith.constant 0 : index
    %c5_322 = arith.constant 5 : index
    %c5_323 = arith.constant 5 : index
    %482 = vector.load %arg1[%c0_320, %c0_321, %c5_322, %c5_323] : memref<1x2x14x14xf32, #tpu.memory_space<vmem>>, vector<1x1x8x8xf32>
    %483 = vector.shape_cast %482 : vector<1x1x8x8xf32> to vector<8x8xf32>
    %484 = vector.broadcast %481 : f32 to vector<8x8xf32>
    %485 = arith.mulf %484, %483 : vector<8x8xf32>
    %486 = arith.addf %480, %485 : vector<8x8xf32>
    %c89 = arith.constant 89 : index
    %487 = memref.load %arg2[%c89] : memref<98xf32, #tpu.memory_space<smem>>
    %c0_324 = arith.constant 0 : index
    %c1_325 = arith.constant 1 : index
    %c5_326 = arith.constant 5 : index
    %c5_327 = arith.constant 5 : index
    %488 = vector.load %arg1[%c0_324, %c1_325, %c5_326, %c5_327] : memref<1x2x14x14xf32, #tpu.memory_space<vmem>>, vector<1x1x8x8xf32>
    %489 = vector.shape_cast %488 : vector<1x1x8x8xf32> to vector<8x8xf32>
    %490 = vector.broadcast %487 : f32 to vector<8x8xf32>
    %491 = arith.mulf %490, %489 : vector<8x8xf32>
    %492 = arith.addf %486, %491 : vector<8x8xf32>
    %c41 = arith.constant 41 : index
    %493 = memref.load %arg2[%c41] : memref<98xf32, #tpu.memory_space<smem>>
    %c0_328 = arith.constant 0 : index
    %c0_329 = arith.constant 0 : index
    %c5_330 = arith.constant 5 : index
    %c6_331 = arith.constant 6 : index
    %494 = vector.load %arg1[%c0_328, %c0_329, %c5_330, %c6_331] : memref<1x2x14x14xf32, #tpu.memory_space<vmem>>, vector<1x1x8x8xf32>
    %495 = vector.shape_cast %494 : vector<1x1x8x8xf32> to vector<8x8xf32>
    %496 = vector.broadcast %493 : f32 to vector<8x8xf32>
    %497 = arith.mulf %496, %495 : vector<8x8xf32>
    %498 = arith.addf %492, %497 : vector<8x8xf32>
    %c90 = arith.constant 90 : index
    %499 = memref.load %arg2[%c90] : memref<98xf32, #tpu.memory_space<smem>>
    %c0_332 = arith.constant 0 : index
    %c1_333 = arith.constant 1 : index
    %c5_334 = arith.constant 5 : index
    %c6_335 = arith.constant 6 : index
    %500 = vector.load %arg1[%c0_332, %c1_333, %c5_334, %c6_335] : memref<1x2x14x14xf32, #tpu.memory_space<vmem>>, vector<1x1x8x8xf32>
    %501 = vector.shape_cast %500 : vector<1x1x8x8xf32> to vector<8x8xf32>
    %502 = vector.broadcast %499 : f32 to vector<8x8xf32>
    %503 = arith.mulf %502, %501 : vector<8x8xf32>
    %504 = arith.addf %498, %503 : vector<8x8xf32>
    %c42 = arith.constant 42 : index
    %505 = memref.load %arg2[%c42] : memref<98xf32, #tpu.memory_space<smem>>
    %c0_336 = arith.constant 0 : index
    %c0_337 = arith.constant 0 : index
    %c6_338 = arith.constant 6 : index
    %c0_339 = arith.constant 0 : index
    %506 = vector.load %arg1[%c0_336, %c0_337, %c6_338, %c0_339] : memref<1x2x14x14xf32, #tpu.memory_space<vmem>>, vector<1x1x8x8xf32>
    %507 = vector.shape_cast %506 : vector<1x1x8x8xf32> to vector<8x8xf32>
    %508 = vector.broadcast %505 : f32 to vector<8x8xf32>
    %509 = arith.mulf %508, %507 : vector<8x8xf32>
    %510 = arith.addf %504, %509 : vector<8x8xf32>
    %c91 = arith.constant 91 : index
    %511 = memref.load %arg2[%c91] : memref<98xf32, #tpu.memory_space<smem>>
    %c0_340 = arith.constant 0 : index
    %c1_341 = arith.constant 1 : index
    %c6_342 = arith.constant 6 : index
    %c0_343 = arith.constant 0 : index
    %512 = vector.load %arg1[%c0_340, %c1_341, %c6_342, %c0_343] : memref<1x2x14x14xf32, #tpu.memory_space<vmem>>, vector<1x1x8x8xf32>
    %513 = vector.shape_cast %512 : vector<1x1x8x8xf32> to vector<8x8xf32>
    %514 = vector.broadcast %511 : f32 to vector<8x8xf32>
    %515 = arith.mulf %514, %513 : vector<8x8xf32>
    %516 = arith.addf %510, %515 : vector<8x8xf32>
    %c43 = arith.constant 43 : index
    %517 = memref.load %arg2[%c43] : memref<98xf32, #tpu.memory_space<smem>>
    %c0_344 = arith.constant 0 : index
    %c0_345 = arith.constant 0 : index
    %c6_346 = arith.constant 6 : index
    %c1_347 = arith.constant 1 : index
    %518 = vector.load %arg1[%c0_344, %c0_345, %c6_346, %c1_347] : memref<1x2x14x14xf32, #tpu.memory_space<vmem>>, vector<1x1x8x8xf32>
    %519 = vector.shape_cast %518 : vector<1x1x8x8xf32> to vector<8x8xf32>
    %520 = vector.broadcast %517 : f32 to vector<8x8xf32>
    %521 = arith.mulf %520, %519 : vector<8x8xf32>
    %522 = arith.addf %516, %521 : vector<8x8xf32>
    %c92 = arith.constant 92 : index
    %523 = memref.load %arg2[%c92] : memref<98xf32, #tpu.memory_space<smem>>
    %c0_348 = arith.constant 0 : index
    %c1_349 = arith.constant 1 : index
    %c6_350 = arith.constant 6 : index
    %c1_351 = arith.constant 1 : index
    %524 = vector.load %arg1[%c0_348, %c1_349, %c6_350, %c1_351] : memref<1x2x14x14xf32, #tpu.memory_space<vmem>>, vector<1x1x8x8xf32>
    %525 = vector.shape_cast %524 : vector<1x1x8x8xf32> to vector<8x8xf32>
    %526 = vector.broadcast %523 : f32 to vector<8x8xf32>
    %527 = arith.mulf %526, %525 : vector<8x8xf32>
    %528 = arith.addf %522, %527 : vector<8x8xf32>
    %c44 = arith.constant 44 : index
    %529 = memref.load %arg2[%c44] : memref<98xf32, #tpu.memory_space<smem>>
    %c0_352 = arith.constant 0 : index
    %c0_353 = arith.constant 0 : index
    %c6_354 = arith.constant 6 : index
    %c2_355 = arith.constant 2 : index
    %530 = vector.load %arg1[%c0_352, %c0_353, %c6_354, %c2_355] : memref<1x2x14x14xf32, #tpu.memory_space<vmem>>, vector<1x1x8x8xf32>
    %531 = vector.shape_cast %530 : vector<1x1x8x8xf32> to vector<8x8xf32>
    %532 = vector.broadcast %529 : f32 to vector<8x8xf32>
    %533 = arith.mulf %532, %531 : vector<8x8xf32>
    %534 = arith.addf %528, %533 : vector<8x8xf32>
    %c93 = arith.constant 93 : index
    %535 = memref.load %arg2[%c93] : memref<98xf32, #tpu.memory_space<smem>>
    %c0_356 = arith.constant 0 : index
    %c1_357 = arith.constant 1 : index
    %c6_358 = arith.constant 6 : index
    %c2_359 = arith.constant 2 : index
    %536 = vector.load %arg1[%c0_356, %c1_357, %c6_358, %c2_359] : memref<1x2x14x14xf32, #tpu.memory_space<vmem>>, vector<1x1x8x8xf32>
    %537 = vector.shape_cast %536 : vector<1x1x8x8xf32> to vector<8x8xf32>
    %538 = vector.broadcast %535 : f32 to vector<8x8xf32>
    %539 = arith.mulf %538, %537 : vector<8x8xf32>
    %540 = arith.addf %534, %539 : vector<8x8xf32>
    %c45 = arith.constant 45 : index
    %541 = memref.load %arg2[%c45] : memref<98xf32, #tpu.memory_space<smem>>
    %c0_360 = arith.constant 0 : index
    %c0_361 = arith.constant 0 : index
    %c6_362 = arith.constant 6 : index
    %c3_363 = arith.constant 3 : index
    %542 = vector.load %arg1[%c0_360, %c0_361, %c6_362, %c3_363] : memref<1x2x14x14xf32, #tpu.memory_space<vmem>>, vector<1x1x8x8xf32>
    %543 = vector.shape_cast %542 : vector<1x1x8x8xf32> to vector<8x8xf32>
    %544 = vector.broadcast %541 : f32 to vector<8x8xf32>
    %545 = arith.mulf %544, %543 : vector<8x8xf32>
    %546 = arith.addf %540, %545 : vector<8x8xf32>
    %c94 = arith.constant 94 : index
    %547 = memref.load %arg2[%c94] : memref<98xf32, #tpu.memory_space<smem>>
    %c0_364 = arith.constant 0 : index
    %c1_365 = arith.constant 1 : index
    %c6_366 = arith.constant 6 : index
    %c3_367 = arith.constant 3 : index
    %548 = vector.load %arg1[%c0_364, %c1_365, %c6_366, %c3_367] : memref<1x2x14x14xf32, #tpu.memory_space<vmem>>, vector<1x1x8x8xf32>
    %549 = vector.shape_cast %548 : vector<1x1x8x8xf32> to vector<8x8xf32>
    %550 = vector.broadcast %547 : f32 to vector<8x8xf32>
    %551 = arith.mulf %550, %549 : vector<8x8xf32>
    %552 = arith.addf %546, %551 : vector<8x8xf32>
    %c46 = arith.constant 46 : index
    %553 = memref.load %arg2[%c46] : memref<98xf32, #tpu.memory_space<smem>>
    %c0_368 = arith.constant 0 : index
    %c0_369 = arith.constant 0 : index
    %c6_370 = arith.constant 6 : index
    %c4_371 = arith.constant 4 : index
    %554 = vector.load %arg1[%c0_368, %c0_369, %c6_370, %c4_371] : memref<1x2x14x14xf32, #tpu.memory_space<vmem>>, vector<1x1x8x8xf32>
    %555 = vector.shape_cast %554 : vector<1x1x8x8xf32> to vector<8x8xf32>
    %556 = vector.broadcast %553 : f32 to vector<8x8xf32>
    %557 = arith.mulf %556, %555 : vector<8x8xf32>
    %558 = arith.addf %552, %557 : vector<8x8xf32>
    %c95 = arith.constant 95 : index
    %559 = memref.load %arg2[%c95] : memref<98xf32, #tpu.memory_space<smem>>
    %c0_372 = arith.constant 0 : index
    %c1_373 = arith.constant 1 : index
    %c6_374 = arith.constant 6 : index
    %c4_375 = arith.constant 4 : index
    %560 = vector.load %arg1[%c0_372, %c1_373, %c6_374, %c4_375] : memref<1x2x14x14xf32, #tpu.memory_space<vmem>>, vector<1x1x8x8xf32>
    %561 = vector.shape_cast %560 : vector<1x1x8x8xf32> to vector<8x8xf32>
    %562 = vector.broadcast %559 : f32 to vector<8x8xf32>
    %563 = arith.mulf %562, %561 : vector<8x8xf32>
    %564 = arith.addf %558, %563 : vector<8x8xf32>
    %c47 = arith.constant 47 : index
    %565 = memref.load %arg2[%c47] : memref<98xf32, #tpu.memory_space<smem>>
    %c0_376 = arith.constant 0 : index
    %c0_377 = arith.constant 0 : index
    %c6_378 = arith.constant 6 : index
    %c5_379 = arith.constant 5 : index
    %566 = vector.load %arg1[%c0_376, %c0_377, %c6_378, %c5_379] : memref<1x2x14x14xf32, #tpu.memory_space<vmem>>, vector<1x1x8x8xf32>
    %567 = vector.shape_cast %566 : vector<1x1x8x8xf32> to vector<8x8xf32>
    %568 = vector.broadcast %565 : f32 to vector<8x8xf32>
    %569 = arith.mulf %568, %567 : vector<8x8xf32>
    %570 = arith.addf %564, %569 : vector<8x8xf32>
    %c96 = arith.constant 96 : index
    %571 = memref.load %arg2[%c96] : memref<98xf32, #tpu.memory_space<smem>>
    %c0_380 = arith.constant 0 : index
    %c1_381 = arith.constant 1 : index
    %c6_382 = arith.constant 6 : index
    %c5_383 = arith.constant 5 : index
    %572 = vector.load %arg1[%c0_380, %c1_381, %c6_382, %c5_383] : memref<1x2x14x14xf32, #tpu.memory_space<vmem>>, vector<1x1x8x8xf32>
    %573 = vector.shape_cast %572 : vector<1x1x8x8xf32> to vector<8x8xf32>
    %574 = vector.broadcast %571 : f32 to vector<8x8xf32>
    %575 = arith.mulf %574, %573 : vector<8x8xf32>
    %576 = arith.addf %570, %575 : vector<8x8xf32>
    %c48 = arith.constant 48 : index
    %577 = memref.load %arg2[%c48] : memref<98xf32, #tpu.memory_space<smem>>
    %c0_384 = arith.constant 0 : index
    %c0_385 = arith.constant 0 : index
    %c6_386 = arith.constant 6 : index
    %c6_387 = arith.constant 6 : index
    %578 = vector.load %arg1[%c0_384, %c0_385, %c6_386, %c6_387] : memref<1x2x14x14xf32, #tpu.memory_space<vmem>>, vector<1x1x8x8xf32>
    %579 = vector.shape_cast %578 : vector<1x1x8x8xf32> to vector<8x8xf32>
    %580 = vector.broadcast %577 : f32 to vector<8x8xf32>
    %581 = arith.mulf %580, %579 : vector<8x8xf32>
    %582 = arith.addf %576, %581 : vector<8x8xf32>
    %c97 = arith.constant 97 : index
    %583 = memref.load %arg2[%c97] : memref<98xf32, #tpu.memory_space<smem>>
    %c0_388 = arith.constant 0 : index
    %c1_389 = arith.constant 1 : index
    %c6_390 = arith.constant 6 : index
    %c6_391 = arith.constant 6 : index
    %584 = vector.load %arg1[%c0_388, %c1_389, %c6_390, %c6_391] : memref<1x2x14x14xf32, #tpu.memory_space<vmem>>, vector<1x1x8x8xf32>
    %585 = vector.shape_cast %584 : vector<1x1x8x8xf32> to vector<8x8xf32>
    %586 = vector.broadcast %583 : f32 to vector<8x8xf32>
    %587 = arith.mulf %586, %585 : vector<8x8xf32>
    %588 = arith.addf %582, %587 : vector<8x8xf32>
    %589 = arith.negf %588 : vector<8x8xf32>
    %590 = math.exp %589 : vector<8x8xf32>
    %cst_392 = arith.constant 1.000000e+00 : f32
    %591 = vector.broadcast %cst_392 : f32 to vector<8x8xf32>
    %592 = arith.addf %591, %590 : vector<8x8xf32>
    %593 = arith.divf %591, %592 : vector<8x8xf32>
    %c0_393 = arith.constant 0 : index
    %c0_394 = arith.constant 0 : index
    %c0_395 = arith.constant 0 : index
    %594 = vector.load %arg3[%c0_393, %c0_394, %c0_395] : memref<1x8x8xf32, #tpu.memory_space<vmem>>, vector<1x8x8xf32>
    %595 = vector.shape_cast %594 : vector<1x8x8xf32> to vector<8x8xf32>
    %596 = vector.shape_cast %593 : vector<8x8xf32> to vector<1x8x8xf32>
    tpu.vector_store %arg3[%c0_393, %c0_394, %c0_395], %596 {strides = array<i32>} : memref<1x8x8xf32, #tpu.memory_space<vmem>>, vector<1x8x8xf32>,
    return
  }
  func.func @transform_0(%arg0: i32) -> (i32, i32, i32, i32) {
    %c0_i32 = arith.constant 0 : i32
    %c0_i32_0 = arith.constant 0 : i32
    %c0_i32_1 = arith.constant 0 : i32
    %c0_i32_2 = arith.constant 0 : i32
    return %arg0, %c0_i32, %c0_i32_0, %c0_i32_1 : i32, i32, i32, i32
  }
  func.func @transform_1(%arg0: i32) -> i32 {
    %c0_i32 = arith.constant 0 : i32
    %c0_i32_0 = arith.constant 0 : i32
    return %c0_i32 : i32
  }
  func.func @transform_2(%arg0: i32) -> (i32, i32, i32) {
    %c0_i32 = arith.constant 0 : i32
    %c0_i32_0 = arith.constant 0 : i32
    %c0_i32_1 = arith.constant 0 : i32
    return %arg0, %c0_i32, %c0_i32_0 : i32, i32, i32
  }
}

module attributes {stable_mosaic.version = 11 : i64} {
  func.func @_gate_res_kernel(%arg0: i32, %arg1: memref<128x16xf32, #tpu.memory_space<vmem>>, %arg2: memref<128x1xf32, #tpu.memory_space<vmem>>, %arg3: memref<128x16xf32, #tpu.memory_space<vmem>>, %arg4: memref<128x16xf32, #tpu.memory_space<vmem>>) attributes {dimension_semantics = [#tpu.dimension_semantics<parallel>], iteration_bounds = array<i64: 1>, scalar_prefetch = 0 : i64, scratch_operands = 0 : i64, tpu.core_type = #tpu.core_type<tc>, window_params = [{transform_indices = @transform_0, window_bounds = array<i64: 128, 16>}, {transform_indices = @transform_1, window_bounds = array<i64: 128, 1>}, {transform_indices = @transform_2, window_bounds = array<i64: 128, 16>}, {transform_indices = @transform_3, window_bounds = array<i64: 128, 16>}]} {
    %c0 = arith.constant 0 : index
    %c0_0 = arith.constant 0 : index
    %0 = vector.load %arg1[%c0, %c0_0] : memref<128x16xf32, #tpu.memory_space<vmem>>, vector<128x16xf32>
    %c0_1 = arith.constant 0 : index
    %c0_2 = arith.constant 0 : index
    %1 = vector.load %arg2[%c0_1, %c0_2] : memref<128x1xf32, #tpu.memory_space<vmem>>, vector<128x1xf32>
    %2 = vector.broadcast %1 : vector<128x1xf32> to vector<128x16xf32>
    %3 = arith.mulf %0, %2 : vector<128x16xf32>
    %c0_3 = arith.constant 0 : index
    %c0_4 = arith.constant 0 : index
    %4 = vector.load %arg3[%c0_3, %c0_4] : memref<128x16xf32, #tpu.memory_space<vmem>>, vector<128x16xf32>
    %5 = arith.addf %3, %4 : vector<128x16xf32>
    %cst = arith.constant 0.000000e+00 : f32
    %6 = vector.broadcast %cst : f32 to vector<128x16xf32>
    %7 = arith.maximumf %5, %6 : vector<128x16xf32>
    %c0_5 = arith.constant 0 : index
    %c0_6 = arith.constant 0 : index
    %8 = vector.load %arg4[%c0_5, %c0_6] : memref<128x16xf32, #tpu.memory_space<vmem>>, vector<128x16xf32>
    tpu.vector_store %arg4[%c0_5, %c0_6], %7 {strides = array<i32>} : memref<128x16xf32, #tpu.memory_space<vmem>>, vector<128x16xf32>,
    return
  }
  func.func @transform_0(%arg0: i32) -> (i32, i32) {
    %c0_i32 = arith.constant 0 : i32
    %c0_i32_0 = arith.constant 0 : i32
    return %arg0, %c0_i32 : i32, i32
  }
  func.func @transform_1(%arg0: i32) -> (i32, i32) {
    %c0_i32 = arith.constant 0 : i32
    %c0_i32_0 = arith.constant 0 : i32
    return %arg0, %c0_i32 : i32, i32
  }
  func.func @transform_2(%arg0: i32) -> (i32, i32) {
    %c0_i32 = arith.constant 0 : i32
    %c0_i32_0 = arith.constant 0 : i32
    return %arg0, %c0_i32 : i32, i32
  }
  func.func @transform_3(%arg0: i32) -> (i32, i32) {
    %c0_i32 = arith.constant 0 : i32
    %c0_i32_0 = arith.constant 0 : i32
    return %arg0, %c0_i32 : i32, i32
  }
}

</mosaic_0001>

<bundles_post_ra>
// kernel: basic_block_forward.7
= control target key start
LH: loop header
LB: loop body
LE: loop exit
PB: predicated region body
PF: predicated region fallthrough
CT: control target
= control target key end

     0   :  { %v169_v0 = vmov 128.0   ;;  %vm19_vm0 = vcmask 123904   ;;  %vm143_vm5 = vcmask 125952   ;;  %s337_s1 = inlined_call_operand.vmem [shape: f32[2,2,16], index: 1, kind: input, shape index: {}]   ;;  %s338_s2 = inlined_call_operand.vmem [shape: f32[1,16], index: 2, kind: input, shape index: {}]   ;;  %s339_s3 = inlined_call_operand.vmem [shape: f32[1,16], index: 3, kind: input, shape index: {}]   ;;  %s340_s0 = inlined_call_operand.vmem [shape: f32[128,16], index: 0, kind: input, shape index: {}]   ;;  %s341_s4 = inlined_call_operand.vmem [shape: bf16[128,16], index: 4, kind: output, shape index: {}]  }
   0x1   :  { %165 = vrcp.f32 %v169_v0  ;;  %v17_v2 = vld [vmem:[%s337_s1] sm:$0x3]  ;;  %v18_v3 = vld [vmem:[%s337_s1 + $0x2] sm:$0x3]  ;;  %v58_v29 = vld [vmem:[%s340_s0 + $0x8] sm:$0xff] }
   0x2   :  { %v20_v5 = vsel %vm19_vm0, %v17_v2, 0.0  ;;  %v21_v6 = vsel %vm19_vm0, %v18_v3, 0.0  ;;  %v36_v24 = vld [vmem:[%s338_s2] sm:$0x1]  ;;  %v59_v30 = vld [vmem:[%s340_s0 + $0x10] sm:$0xff]  ;;  %v60_v33 = vld [vmem:[%s340_s0 + $0x18] sm:$0xff] }
   0x3   :  { %v22_v9 = vadd.f32 %v21_v6, %v20_v5  ;;  %v54_v27 = vld [vmem:[%s339_s3] sm:$0x1]  ;;  %v62_v35 = vld [vmem:[%s340_s0 + $0x28] sm:$0xff]  ;;  %v63_v36 = vld [vmem:[%s340_s0 + $0x30] sm:$0xff] }
   0x4   :  { %v57_v28 = vld [vmem:[%s340_s0] sm:$0xff]  ;;  %v64_v37 = vld [vmem:[%s340_s0 + $0x38] sm:$0xff]  ;;  %v66_v41 = vld [vmem:[%s340_s0 + $0x48] sm:$0xff] }
   0x5   :  { %v61_v34 = vld [vmem:[%s340_s0 + $0x20] sm:$0xff]  ;;  %v67_v42 = vld [vmem:[%s340_s0 + $0x50] sm:$0xff]  ;;  %v68_v43 = vld [vmem:[%s340_s0 + $0x58] sm:$0xff] }
   0x6   :  { %v65_v38 = vld [vmem:[%s340_s0 + $0x40] sm:$0xff]  ;;  %v70_v61 = vld [vmem:[%s340_s0 + $0x68] sm:$0xff] }
   0x7   :  { %v166_v1 = vpop.eup %165  ;;  %v69_v60 = vld [vmem:[%s340_s0 + $0x60] sm:$0xff] }
   0x8   :  { %v24_v4 = vmul.f32 128.0, %v166_v1  ;;  %vm28_vm1 = vweird.f32 %v166_v1 }
   0xa   :  { %v25_v7 = vsub.f32 1.0, %v24_v4 }
   0xc   :  { %v26_v8 = vmul.f32 %v166_v1, %v25_v7 }
   0xe   :  { %v27_v10 = vadd.f32 %v166_v1, %v26_v8 }
  0x10   :  { %v29_v11 = vsel %vm28_vm1, %v166_v1, %v27_v10 }
  0x11   :  { %v30_v12 = vmul.f32 %v29_v11, %v22_v9 }
  0x13   :  { %v31_v13 = vmul.f32 %v30_v12, %v30_v12 }
  0x15   :  { %v33_v14 = vrot.slane %v31_v13, 7 }
  0x17   :  { %v35_v15 = vsub.f32 %v30_v12, %v33_v14  ;;  %v71_v14 = vld [vmem:[%s340_s0 + $0x70] sm:$0xff] }
  0x19   :  { %v37_v16 = vadd.f32 1e-05, %v35_v15  ;;  %v72_v15 = vld [vmem:[%s340_s0 + $0x78] sm:$0xff] }
  0x1b   :  { %167 = vrsqrt.f32 %v37_v16  ;;  %vm44_vm2 = vweird.f32 %v37_v16 }
  0x21   :  { %v168_v17 = vpop.eup %167 }
  0x22   :  { %v39_v18 = vmul.f32 %v168_v17, %v37_v16  ;;  %vm45_vm3 = vweird.f32 %v168_v17 }
  0x23   :  { %vm46_vm4 = vmor %vm44_vm2, %vm45_vm3 }
  0x24   :  { %v40_v19 = vmul.f32 %v168_v17, %v39_v18 }
  0x26   :  { %v41_v20 = vmul.f32 0.5, %v40_v19 }
  0x28   :  { %v42_v21 = vsub.f32 1.5, %v41_v20 }
  0x2a   :  { %v43_v22 = vmul.f32 %v168_v17, %v42_v21 }
  0x2c   :  { %v47_v23 = vsel %vm46_vm4, %v168_v17, %v43_v22 }
  0x2d   :  { %49 = vst [vmem:[#allocation1] sm:$0xff] %v47_v23 }
  0x34   :  { %v51_v25 = vld [vmem:[#allocation1 + $0x1] ss:$9 sm:$0xff] }
  0x35   :  { %v53_v26 = vmul.f32 %v51_v25, %v36_v24 }
  0x37   :  { %v55_v31 = vmul.f32 %v53_v26, %v30_v12  ;;  %v216_v32 = vperm.slane %v53_v26, 0 }
  0x39   :  { %v56_v39 = vsub.f32 %v54_v27, %v55_v31  ;;  %v76_v40 = vmul.f32 %v216_v32, %v57_v28  ;;  %v77_v44 = vmul.f32 %v216_v32, %v58_v29  ;;  %v78_v45 = vmul.f32 %v216_v32, %v59_v30 }
  0x3a   :  { %v79_v46 = vmul.f32 %v216_v32, %v60_v33  ;;  %v80_v47 = vmul.f32 %v216_v32, %v61_v34  ;;  %v81_v49 = vmul.f32 %v216_v32, %v62_v35  ;;  %v82_v50 = vmul.f32 %v216_v32, %v63_v36 }
  0x3b   :  { %v93_v48 = vperm.slane %v56_v39, 0  ;;  %v83_v51 = vmul.f32 %v216_v32, %v64_v37  ;;  %v84_v52 = vmul.f32 %v216_v32, %v65_v38  ;;  %v85_v53 = vmul.f32 %v216_v32, %v66_v41 }
  0x3c   :  { %v86_v54 = vmul.f32 %v216_v32, %v67_v42  ;;  %v87_v55 = vmul.f32 %v216_v32, %v68_v43  ;;  %v88_v8 = vmul.f32 %v216_v32, %v69_v60  ;;  %v89_v9 = vmul.f32 %v216_v32, %v70_v61 }
  0x3d   :  { %v95_v56 = vadd.f32 %v93_v48, %v76_v40  ;;  %v96_v57 = vadd.f32 %v93_v48, %v77_v44  ;;  %v97_v58 = vadd.f32 %v93_v48, %v78_v45  ;;  %v98_v59 = vadd.f32 %v93_v48, %v79_v46 }
  0x3e   :  { %v99_v62 = vadd.f32 %v93_v48, %v80_v47  ;;  %v100_v63 = vadd.f32 %v93_v48, %v81_v49  ;;  %v101_v0 = vadd.f32 %v93_v48, %v82_v50  ;;  %v102_v1 = vadd.f32 %v93_v48, %v83_v51 }
  0x3f   :  { %v111_v2 = vmax.f32 %v95_v56, 0.0  ;;  %v112_v3 = vmax.f32 %v96_v57, 0.0  ;;  %v113_v4 = vmax.f32 %v97_v58, 0.0  ;;  %v114_v5 = vmax.f32 %v98_v59, 0.0 }
  0x40   :  { %v115_v6 = vmax.f32 %v99_v62, 0.0  ;;  %v116_v7 = vmax.f32 %v100_v63, 0.0  ;;  %v117_v13 = vmax.f32 %v101_v0, 0.0  ;;  %v118_v19 = vmax.f32 %v102_v1, 0.0 }
  0x41   :  { %v127_v10 = vpack.c.bf16 %v111_v2, %v111_v2  ;;  %v128_v11 = vpack.c.bf16 %v112_v3, %v112_v3  ;;  %v129_v12 = vpack.c.bf16 %v113_v4, %v113_v4  ;;  %v130_v16 = vpack.c.bf16 %v114_v5, %v114_v5 }
  0x42   :  { %v131_v17 = vpack.c.bf16 %v115_v6, %v115_v6  ;;  %v132_v18 = vpack.c.bf16 %v116_v7, %v116_v7  ;;  %v103_v20 = vadd.f32 %v93_v48, %v84_v52  ;;  %v104_v21 = vadd.f32 %v93_v48, %v85_v53 }
  0x43   :  { %144 = vst.msk [vmem:[%s341_s4] sm:$0xf] %vm143_vm5, %v127_v10  ;;  %v105_v22 = vadd.f32 %v93_v48, %v86_v54  ;;  %v106_v23 = vadd.f32 %v93_v48, %v87_v55  ;;  %v107_v24 = vadd.f32 %v93_v48, %v88_v8  ;;  %v108_v25 = vadd.f32 %v93_v48, %v89_v9 }
  0x44   :  { %145 = vst.msk [vmem:[%s341_s4 + $0x4] sm:$0xf] %vm143_vm5, %v128_v11  ;;  %v90_v26 = vmul.f32 %v216_v32, %v71_v14  ;;  %v91_v27 = vmul.f32 %v216_v32, %v72_v15  ;;  %v133_v28 = vpack.c.bf16 %v117_v13, %v117_v13  ;;  %v119_v29 = vmax.f32 %v103_v20, 0.0 }
  0x45   :  { %146 = vst.msk [vmem:[%s341_s4 + $0x8] sm:$0xf] %vm143_vm5, %v129_v12  ;;  %v120_v30 = vmax.f32 %v104_v21, 0.0  ;;  %v121_v31 = vmax.f32 %v105_v22, 0.0  ;;  %v134_v33 = vpack.c.bf16 %v118_v19, %v118_v19  ;;  %v122_v34 = vmax.f32 %v106_v23, 0.0 }
  0x46   :  { %147 = vst.msk [vmem:[%s341_s4 + $0xc] sm:$0xf] %vm143_vm5, %v130_v16  ;;  %v109_v35 = vadd.f32 %v93_v48, %v90_v26  ;;  %v110_v36 = vadd.f32 %v93_v48, %v91_v27  ;;  %v135_v32 = vpack.c.bf16 %v119_v29, %v119_v29  ;;  %v123_v37 = vmax.f32 %v107_v24, 0.0 }
  0x47   :  { %148 = vst.msk [vmem:[%s341_s4 + $0x10] sm:$0xf] %vm143_vm5, %v131_v17  ;;  %v136_v38 = vpack.c.bf16 %v120_v30, %v120_v30  ;;  %v124_v39 = vmax.f32 %v108_v25, 0.0  ;;  %v137_v40 = vpack.c.bf16 %v121_v31, %v121_v31  ;;  %v138_v42 = vpack.c.bf16 %v122_v34, %v122_v34 }
  0x48   :  { %149 = vst.msk [vmem:[%s341_s4 + $0x14] sm:$0xf] %vm143_vm5, %v132_v18  ;;  %v125_v41 = vmax.f32 %v109_v35, 0.0  ;;  %v126_v43 = vmax.f32 %v110_v36, 0.0  ;;  %v139_v44 = vpack.c.bf16 %v123_v37, %v123_v37 }
  0x49   :  { %150 = vst.msk [vmem:[%s341_s4 + $0x18] sm:$0xf] %vm143_vm5, %v133_v28  ;;  %v140_v45 = vpack.c.bf16 %v124_v39, %v124_v39 }
  0x4a   :  { %151 = vst.msk [vmem:[%s341_s4 + $0x1c] sm:$0xf] %vm143_vm5, %v134_v33  ;;  %v141_v46 = vpack.c.bf16 %v125_v41, %v125_v41  ;;  %v142_v47 = vpack.c.bf16 %v126_v43, %v126_v43 }
  0x4b   :  { %152 = vst.msk [vmem:[%s341_s4 + $0x20] sm:$0xf] %vm143_vm5, %v135_v32 }
  0x4c   :  { %153 = vst.msk [vmem:[%s341_s4 + $0x24] sm:$0xf] %vm143_vm5, %v136_v38 }
  0x4d   :  { %154 = vst.msk [vmem:[%s341_s4 + $0x28] sm:$0xf] %vm143_vm5, %v137_v40 }
  0x4e   :  { %155 = vst.msk [vmem:[%s341_s4 + $0x2c] sm:$0xf] %vm143_vm5, %v138_v42 }
  0x4f   :  { %156 = vst.msk [vmem:[%s341_s4 + $0x30] sm:$0xf] %vm143_vm5, %v139_v44 }
  0x50   :  { %157 = vst.msk [vmem:[%s341_s4 + $0x34] sm:$0xf] %vm143_vm5, %v140_v45 }
  0x51   :  { %158 = vst.msk [vmem:[%s341_s4 + $0x38] sm:$0xf] %vm143_vm5, %v141_v46 }
  0x52   :  { %159 = vst.msk [vmem:[%s341_s4 + $0x3c] sm:$0xf] %vm143_vm5, %v142_v47 }

// kernel: basic_block_forward.9
= control target key start
LH: loop header
LB: loop body
LE: loop exit
PB: predicated region body
PF: predicated region fallthrough
CT: control target
= control target key end

     0   :  { %s816_s24 = smov 0   ;;  %s984_s0 = inlined_call_operand.vmem [shape: f32[2,64,16], index: 0, kind: input, shape index: {}]   ;;  %s985_s1 = inlined_call_operand.vmem [shape: f32[2,2,16], index: 1, kind: input, shape index: {}]   ;;  %s986_s2 = inlined_call_operand.vmem [shape: f32[1,16], index: 2, kind: input, shape index: {}]   ;;  %s987_s3 = inlined_call_operand.vmem [shape: f32[1,16], index: 3, kind: input, shape index: {}]   ;;  %s988_s4 = inlined_call_operand.vmem [shape: f32[16,1], index: 4, kind: input, shape index: {}]   ;;  %s989_s5 = inlined_call_operand.vmem [shape: f32[1,16], index: 5, kind: input, shape index: {}]   ;;  %s990_s6 = inlined_call_operand.vmem [shape: f32[2,64,16], index: 6, kind: output, shape index: {0}]   ;;  %s991_s7 = inlined_call_operand.vmem [shape: f32[2,64,2], index: 7, kind: output, shape index: {1}]  }
   0x1 LB: > { %s719_s25 = sadd.s32 4294967295, %s771_s24   ;;  %p723_p0 = scmp.ge.s32.totalorder %s771_s24, 1  ;;  %s771_s24 = sphi %s816_s24, %s18_s24  }
   0x2   : > { %p240_p1 = scmp.lt.s32.totalorder %s771_s24, 3 }
   0x4   : > { %p241_p2 = pnand %p723_p0, %p240_p1 }
   0x5   : > { %p277_p3 = scmp.lt.s32.totalorder (!%p241_p2), %s719_s25, 1 }
   0x6   : > { %244 = sbr.rel (%p241_p2) target bundleno = 556 (0x22c), region = 44 }
   0xb   : > { %v414_v0 = vld [vmem:[%s988_s4 + $0x8] sm:$0xff]  ;;  %v413_v1 = vld [vmem:[%s988_s4] sm:$0xff]  ;;  %v773_v2 = vmov 128.0   ;;  %vm294_vm0 = vcmask 123904   ;;  %s993_s25 = smov (!%p277_p3, %s719_s25), 1  ;;  %vm362_vm5 = vcmask 130048  }
   0xc   : > { %433 = vmatpush.msra.mxu0 %v414_v0  ;;  %457 = vmatpush.msra.mxu1 %v414_v0  ;;  %753 = vrcp.f32 %v773_v2  ;;  %v292_v4 = vld [vmem:[%s985_s1] sm:$0x3]  ;;  %v293_v5 = vld [vmem:[%s985_s1 + $0x2] sm:$0x3]  ;;  %s840_s11 = sshll.u32 %s993_s25, 6  ;;  %v774_v56 = vmov 64.0  }
   0xd   : > { %v295_v7 = vsel %vm294_vm0, %v292_v4, 0.0  ;;  %v296_v8 = vsel %vm294_vm0, %v293_v5, 0.0  ;;  %v311_v26 = vld [vmem:[%s986_s2] sm:$0x1]  ;;  %s281_s16 = scalar_lea.vmem %s984_s0, %s840_s11  ;;  %vm468_vm7 = vcmask 1040384   ;;  %vm464_vm8 = vcmask 7168   ;;  %s286_s23 = scalar_lea.vmem %s990_s6, %s840_s11 }
   0xe   : > { %434 = vmatpush.msra.mxu0 %v413_v1  ;;  %458 = vmatpush.msra.mxu1 %v413_v1  ;;  %v297_v11 = vadd.f32 %v296_v8, %v295_v7  ;;  %v329_v29 = vld [vmem:[%s987_s3] sm:$0x1]  ;;  %v333_v31 = vld [vmem:[%s281_s16 + $0x8] sm:$0xff]  ;;  %v334_v32 = vld [vmem:[%s281_s16 + $0x10] sm:$0xff]  ;;  %s947_s27 = scalar_lea.vmem %s991_s7, %s840_s11  ;;  %vm622_vm14 = vcmask 15368  }
   0xf   : > { %v332_v30 = vld [vmem:[%s281_s16] sm:$0xff]  ;;  %v335_v34 = vld [vmem:[%s281_s16 + $0x18] sm:$0xff]  ;;  %v338_v36 = vld [vmem:[%s281_s16 + $0x30] sm:$0xff] }
  0x10   : > { %v336_v35 = vld [vmem:[%s281_s16 + $0x20] sm:$0xff]  ;;  %v339_v38 = vld [vmem:[%s281_s16 + $0x38] sm:$0xff]  ;;  %v337_v40 = vld [vmem:[%s281_s16 + $0x28] sm:$0xff] }
  0x12   : > { %v754_v3 = vpop.eup %753 }
  0x13   : > { %v299_v6 = vmul.f32 128.0, %v754_v3  ;;  %vm303_vm1 = vweird.f32 %v754_v3 }
  0x15   : > { %v300_v9 = vsub.f32 1.0, %v299_v6 }
  0x17   : > { %v301_v10 = vmul.f32 %v754_v3, %v300_v9 }
  0x19   : > { %v302_v12 = vadd.f32 %v754_v3, %v301_v10 }
  0x1b   : > { %v304_v13 = vsel %vm303_vm1, %v754_v3, %v302_v12 }
  0x1c   : > { %v305_v14 = vmul.f32 %v304_v13, %v297_v11 }
  0x1e   : > { %v306_v15 = vmul.f32 %v305_v14, %v305_v14 }
  0x20   : > { %v308_v16 = vrot.slane %v306_v15, 7 }
  0x22   : > { %v310_v17 = vsub.f32 %v305_v14, %v308_v16 }
  0x24   : > { %v312_v18 = vadd.f32 1e-05, %v310_v17 }
  0x26   : > { %755 = vrsqrt.f32 %v312_v18  ;;  %vm319_vm2 = vweird.f32 %v312_v18 }
  0x27   : > { %757 = vrcp.f32 %v774_v56 }
  0x2c   : > { %v756_v19 = vpop.eup %755 }
  0x2d   : > { %v314_v20 = vmul.f32 %v756_v19, %v312_v18  ;;  %vm320_vm3 = vweird.f32 %v756_v19  ;;  %v758_v12 = vpop.eup %757 }
  0x2e   : > { %vm321_vm4 = vmor %vm319_vm2, %vm320_vm3  ;;  %vm389_vm6 = vweird.f32 %v758_v12 }
  0x2f   : > { %v315_v21 = vmul.f32 %v756_v19, %v314_v20 }
  0x31   : > { %v316_v22 = vmul.f32 0.5, %v315_v21  ;;  %v385_v21 = vmul.f32 64.0, %v758_v12 }
  0x33   : > { %v317_v23 = vsub.f32 1.5, %v316_v22 }
  0x35   : > { %v318_v24 = vmul.f32 %v756_v19, %v317_v23 }
  0x37   : > { %v322_v25 = vsel %vm321_vm4, %v756_v19, %v318_v24 }
  0x38   : > { %324 = vst [vmem:[#allocation1] sm:$0xff] %v322_v25 }
  0x3f   : > { %v326_v27 = vld [vmem:[#allocation1 + $0x1] ss:$9 sm:$0xff] }
  0x40   : > { %v328_v28 = vmul.f32 %v326_v27, %v311_v26  ;;  %v386_v27 = vsub.f32 1.0, %v385_v21 }
  0x42   : > { %v330_v33 = vmul.f32 %v328_v28, %v305_v14  ;;  %v341_v37 = vperm.slane %v328_v28, 0 }
  0x44   : > { %v331_v39 = vsub.f32 %v329_v29, %v330_v33  ;;  %v343_v41 = vmul.f32 %v341_v37, %v332_v30  ;;  %v344_v42 = vmul.f32 %v341_v37, %v333_v31  ;;  %v345_v43 = vmul.f32 %v341_v37, %v334_v32 }
  0x45   : > { %v346_v44 = vmul.f32 %v341_v37, %v335_v34  ;;  %v347_v45 = vmul.f32 %v341_v37, %v336_v35  ;;  %v349_v46 = vmul.f32 %v341_v37, %v338_v36  ;;  %v350_v47 = vmul.f32 %v341_v37, %v339_v38 }
  0x46   : > { %v352_v48 = vperm.slane %v331_v39, 0  ;;  %v348_v49 = vmul.f32 %v341_v37, %v337_v40  ;;  %v387_v32 = vmul.f32 %v758_v12, %v386_v27 }
  0x48   : > { %v852_v50 = vadd.f32 %v352_v48, %v343_v41  ;;  %v854_v51 = vadd.f32 %v352_v48, %v344_v42  ;;  %v856_v52 = vadd.f32 %v352_v48, %v345_v43  ;;  %v858_v53 = vadd.f32 %v352_v48, %v346_v44  ;;  %v415_v44 = vld [vmem:[%s989_s5] sm:$0x1] }
  0x49   : > { %v860_v54 = vadd.f32 %v352_v48, %v347_v45  ;;  %v862_v55 = vadd.f32 %v352_v48, %v349_v46  ;;  %v864_v57 = vadd.f32 %v352_v48, %v350_v47  ;;  %v872_v61 = vadd.f32 %v352_v48, %v348_v49  ;;  %732 = vmatpush.msk.msra.mxu2 %vm468_vm7, %v415_v44 }
  0x4a   : > { %v363_v58 = vsel %vm362_vm5, %v852_v50, 0.0  ;;  %v364_v59 = vsel %vm362_vm5, %v854_v51, 0.0  ;;  %v366_v60 = vsel %vm362_vm5, %v856_v52, 0.0  ;;  %v368_v63 = vsel %vm362_vm5, %v858_v53, 0.0  ;;  %734 = vmatpush.msk.msra.mxu3 %vm468_vm7, %v415_v44 }
  0x4b   : > { %v365_v62 = vadd.f32 %v364_v59, %v363_v58  ;;  %v370_v0 = vsel %vm362_vm5, %v860_v54, 0.0  ;;  %v392_v1 = vsel %vm362_vm5, %v852_v50, -inf  ;;  %v393_v2 = vsel %vm362_vm5, %v854_v51, -inf }
  0x4c   : > { %v394_v3 = vsel %vm362_vm5, %v856_v52, -inf  ;;  %v395_v5 = vsel %vm362_vm5, %v858_v53, -inf  ;;  %v396_v6 = vsel %vm362_vm5, %v860_v54, -inf  ;;  %v398_v7 = vsel %vm362_vm5, %v872_v61, -inf }
  0x4d   : > { %v367_v4 = vadd.f32 %v366_v60, %v365_v62  ;;  %v397_v8 = vmax.f32 %v392_v1, %v396_v6  ;;  %v399_v9 = vmax.f32 %v393_v2, %v398_v7  ;;  %v400_v10 = vsel %vm362_vm5, %v862_v55, -inf }
  0x4e   : > { %v402_v11 = vsel %vm362_vm5, %v864_v57, -inf  ;;  %v401_v14 = vmax.f32 %v394_v3, %v400_v10  ;;  %v372_v16 = vsel %vm362_vm5, %v872_v61, 0.0  ;;  %v374_v20 = vsel %vm362_vm5, %v862_v55, 0.0 }
  0x4f   : > { %v369_v13 = vadd.f32 %v368_v63, %v367_v4  ;;  %v403_v15 = vmax.f32 %v395_v5, %v402_v11  ;;  %v404_v17 = vmax.f32 %v397_v8, %v399_v9  ;;  %v376_v24 = vsel %vm362_vm5, %v864_v57, 0.0 }
  0x50   : > { %v388_v37 = vadd.f32 %v758_v12, %v387_v32 }
  0x51   : > { %v371_v18 = vadd.f32 %v370_v0, %v369_v13  ;;  %v405_v19 = vmax.f32 %v401_v14, %v403_v15 }
  0x52   : > { %v390_v41 = vsel %vm389_vm6, %v758_v12, %v388_v37 }
  0x53   : > { %v373_v22 = vadd.f32 %v372_v16, %v371_v18  ;;  %v406_v23 = vmax.f32 %v404_v17, %v405_v19 }
  0x55   : > { %v375_v25 = vadd.f32 %v374_v20, %v373_v22  ;;  %v407_v26 = vrot.slane %v406_v23, 4 }
  0x57   : > { %v377_v28 = vadd.f32 %v376_v24, %v375_v25  ;;  %v408_v29 = vmax.f32 %v406_v23, %v407_v26  ;;  %v775_v26 = vmov 16.0  }
  0x59   : > { %v378_v30 = vrot.slane %v377_v28, 4  ;;  %v409_v31 = vrot.slane %v408_v29, 2 }
  0x5b   : > { %v379_v33 = vadd.f32 %v378_v30, %v377_v28  ;;  %v410_v34 = vmax.f32 %v408_v29, %v409_v31 }
  0x5d   : > { %v380_v35 = vrot.slane %v379_v33, 2  ;;  %v411_v36 = vrot.slane %v410_v34, 1 }
  0x5f   : > { %v381_v38 = vadd.f32 %v380_v35, %v379_v33  ;;  %v412_v39 = vmax.f32 %v410_v34, %v411_v36 }
  0x61   : > { %v382_v40 = vrot.slane %v381_v38, 1  ;;  %731 = vmatmul.msk.f32.vlgmr.msra.gmra.mxu1 %vm362_vm5, %v412_v39 }
  0x63   : > { %v383_v42 = vadd.f32 %v382_v40, %v381_v38 }
  0x65   : > { %v391_v43 = vmul.f32 %v390_v41, %v383_v42 }
  0x67   : > { %730 = vmatmul.msk.f32.vlgmr.msra.gmra.mxu0 %vm362_vm5, %v391_v43 }
  0xde   : > { %v460_v45 = vpop.f32.mrf.mxu1 }
  0xdf   : > { %v463_v46 = vmax.f32 %v460_v45, 0.0 }
  0xe1   : > { %733 = vmatmul.msk.f32.vlgmr.msra.gmra.mxu2 %vm464_vm8, %v463_v46 }
  0xe4   : > { %v436_v47 = vpop.f32.mrf.mxu0 }
  0xe5   : > { %v439_v48 = vmax.f32 %v436_v47, 0.0 }
  0xe7   : > { %735 = vmatmul.msk.f32.vlgmr.msra.gmra.mxu3 %vm464_vm8, %v439_v48 }
 0x164   : > { %v489_v49 = vpop.f32.mrf.mxu2 }
 0x16a   : > { %v512_v56 = vpop.f32.mrf.mxu3 }
 0x16b   : > { %v513_v58 = vadd.f32 %v512_v56, %v489_v49 }
 0x16d   : > { %v736_v59 = vmul.f32 -1.442695, %v513_v58 }
 0x16f   : > { %759 = vpow2.f32 %v736_v59 }
 0x175   : > { %v760_v60 = vpop.eup %759 }
 0x176   : > { %v518_v62 = vadd.f32 1.0, %v760_v60 }
 0x178   : > { %761 = vrcp.f32 %v518_v62  ;;  %v530_v2 = vand.u32 2147483648, %v518_v62  ;;  %v528_v4 = vand.u32 2147483647, %v518_v62  ;;  %vm524_vm10 = vweird.f32 %v518_v62 }
 0x179   : > { %763 = vrcp.f32 %v775_v26 }
 0x17a   : > { %v531_v6 = vor.u32 1.1754944e-38, %v530_v2  ;;  %vm529_vm12 = vcmp.eq.f32.partialorder %v528_v4, 8.507059e+37 }
 0x17e   : > { %v762_v63 = vpop.eup %761 }
 0x17f   : > { %v520_v0 = vmul.f32 %v762_v63, %v518_v62  ;;  %vm525_vm9 = vweird.f32 %v762_v63  ;;  %v764_v27 = vpop.eup %763 }
 0x180   : > { %vm526_vm11 = vmor %vm524_vm10, %vm525_vm9  ;;  %v576_v28 = vmul.f32 16.0, %v764_v27  ;;  %vm580_vm13 = vweird.f32 %v764_v27 }
 0x181   : > { %v521_v1 = vsub.f32 1.0, %v520_v0 }
 0x182   : > { %v577_v29 = vsub.f32 1.0, %v576_v28 }
 0x183   : > { %v522_v3 = vmul.f32 %v762_v63, %v521_v1 }
 0x184   : > { %v578_v30 = vmul.f32 %v764_v27, %v577_v29 }
 0x185   : > { %v523_v5 = vadd.f32 %v762_v63, %v522_v3 }
 0x186   : > { %v579_v31 = vadd.f32 %v764_v27, %v578_v30 }
 0x187   : > { %v527_v7 = vsel %vm526_vm11, %v762_v63, %v523_v5 }
 0x188   : > { %v532_v8 = vsel %vm529_vm12, %v531_v6, %v527_v7  ;;  %v581_v32 = vsel %vm580_vm13, %v764_v27, %v579_v31 }
 0x189   : > { %v534_v9 = vperm.slane %v532_v8, 0 }
 0x18b   : > { %v539_v10 = vmul.f32 %v534_v9, %v860_v54  ;;  %v537_v11 = vmul.f32 %v534_v9, %v856_v52  ;;  %v535_v12 = vmul.f32 %v534_v9, %v852_v50  ;;  %v540_v13 = vmul.f32 %v534_v9, %v872_v61 }
 0x18c   : > { %v538_v17 = vmul.f32 %v534_v9, %v858_v53  ;;  %v536_v52 = vmul.f32 %v534_v9, %v854_v51  ;;  %v542_v50 = vmul.f32 %v534_v9, %v864_v57  ;;  %v541_v54 = vmul.f32 %v534_v9, %v862_v55 }
 0x18d   : > { %v563_v14 = vsel %vm362_vm5, %v539_v10, 0.0  ;;  %547 = vst.msk [vmem:[%s286_s23 + $0x20] sm:$0xff] %vm362_vm5, %v539_v10  ;;  %v557_v15 = vsel %vm362_vm5, %v537_v11, 0.0  ;;  %v551_v16 = vsel %vm362_vm5, %v535_v12, 0.0  ;;  %v566_v53 = vsel %vm362_vm5, %v540_v13, 0.0 }
 0x18e   : > { %564 = vadd.xlane.f32.xlu2 %v563_v14  ;;  %558 = vadd.xlane.f32.xlu1 %v557_v15  ;;  %545 = vst.msk [vmem:[%s286_s23 + $0x10] sm:$0xff] %vm362_vm5, %v537_v11  ;;  %v560_v51 = vsel %vm362_vm5, %v538_v17, 0.0  ;;  %v554_v57 = vsel %vm362_vm5, %v536_v52, 0.0  ;;  %v572_v61 = vsel %vm362_vm5, %v542_v50, 0.0  ;;  %v598_v55 = vsel %vm362_vm5, %v535_v12, -inf }
 0x18f   : > { %552 = vadd.xlane.f32.xlu0 %v551_v16  ;;  %543 = vst.msk [vmem:[%s286_s23] sm:$0xff] %vm362_vm5, %v535_v12  ;;  %v569_v18 = vsel %vm362_vm5, %v541_v54, 0.0  ;;  %v604_v19 = vsel %vm362_vm5, %v537_v11, -inf  ;;  %v607_v20 = vsel %vm362_vm5, %v538_v17, -inf  ;;  %v601_v21 = vsel %vm362_vm5, %v536_v52, -inf }
 0x190   : > { %548 = vst.msk [vmem:[%s286_s23 + $0x28] sm:$0xff] %vm362_vm5, %v540_v13  ;;  %v613_v22 = vsel %vm362_vm5, %v540_v13, -inf  ;;  %v616_v23 = vsel %vm362_vm5, %v541_v54, -inf  ;;  %v610_v24 = vsel %vm362_vm5, %v539_v10, -inf  ;;  %v619_v25 = vsel %vm362_vm5, %v542_v50, -inf }
 0x191   : > { %546 = vst.msk [vmem:[%s286_s23 + $0x18] sm:$0xff] %vm362_vm5, %v538_v17 }
 0x192   : > { %544 = vst.msk [vmem:[%s286_s23 + $0x8] sm:$0xff] %vm362_vm5, %v536_v52 }
 0x193   : > { %550 = vst.msk [vmem:[%s286_s23 + $0x38] sm:$0xff] %vm362_vm5, %v542_v50 }
 0x194   : > { %549 = vst.msk [vmem:[%s286_s23 + $0x30] sm:$0xff] %vm362_vm5, %v541_v54 }
 0x196   : > { %567 = vadd.xlane.f32.xlu2 %v566_v53  ;;  %561 = vadd.xlane.f32.xlu1 %v560_v51 }
 0x197   : > { %555 = vadd.xlane.f32.xlu0 %v554_v57 }
 0x19e   : > { %573 = vadd.xlane.f32.xlu1 %v572_v61  ;;  %599 = vmax.xlane.f32.xlu2 %v598_v55 }
 0x19f   : > { %570 = vadd.xlane.f32.xlu0 %v569_v18 }
 0x1a6   : > { %605 = vmax.xlane.f32.xlu1 %v604_v19  ;;  %608 = vmax.xlane.f32.xlu2 %v607_v20 }
 0x1a7   : > { %602 = vmax.xlane.f32.xlu0 %v601_v21 }
 0x1ae   : > { %614 = vmax.xlane.f32.xlu1 %v613_v22  ;;  %617 = vmax.xlane.f32.xlu2 %v616_v23 }
 0x1af   : > { %611 = vmax.xlane.f32.xlu0 %v610_v24 }
 0x1b7   : > { %620 = vmax.xlane.f32.xlu0 %v619_v25 }
 0x201   : > { %v565_v33 = vpop.xlane.xlu2 %564  ;;  %v559_v34 = vpop.xlane.xlu1 %558 }
 0x202   : > { %v586_v35 = vmul.f32 %v581_v32, %v565_v33  ;;  %v584_v36 = vmul.f32 %v581_v32, %v559_v34  ;;  %v553_v37 = vpop.xlane.xlu0 %552 }
 0x203   : > { %v582_v38 = vmul.f32 %v581_v32, %v553_v37 }
 0x204   : > { %594 = vst.msk [vmem:[%s947_s27 + $0x20] sm:$0xff] %vm464_vm8, %v586_v35 }
 0x205   : > { %592 = vst.msk [vmem:[%s947_s27 + $0x10] sm:$0xff] %vm464_vm8, %v584_v36 }
 0x206   : > { %590 = vst.msk [vmem:[%s947_s27] sm:$0xff] %vm464_vm8, %v582_v38 }
 0x209   : > { %v568_v39 = vpop.xlane.xlu2 %567  ;;  %v562_v40 = vpop.xlane.xlu1 %561 }
 0x20a   : > { %v587_v41 = vmul.f32 %v581_v32, %v568_v39  ;;  %v585_v42 = vmul.f32 %v581_v32, %v562_v40  ;;  %v556_v43 = vpop.xlane.xlu0 %555 }
 0x20b   : > { %v583_v44 = vmul.f32 %v581_v32, %v556_v43 }
 0x20c   : > { %595 = vst.msk [vmem:[%s947_s27 + $0x28] sm:$0xff] %vm464_vm8, %v587_v41 }
 0x20d   : > { %593 = vst.msk [vmem:[%s947_s27 + $0x18] sm:$0xff] %vm464_vm8, %v585_v42 }
 0x20e   : > { %591 = vst.msk [vmem:[%s947_s27 + $0x8] sm:$0xff] %vm464_vm8, %v583_v44 }
 0x211   : > { %v574_v45 = vpop.xlane.xlu1 %573  ;;  %v600_v46 = vpop.xlane.xlu2 %599 }
 0x212   : > { %v589_v47 = vmul.f32 %v581_v32, %v574_v45  ;;  %623 = vst.msk [vmem:[%s947_s27] sm:$0xff] %vm622_vm14, %v600_v46  ;;  %v571_v48 = vpop.xlane.xlu0 %570 }
 0x213   : > { %v588_v49 = vmul.f32 %v581_v32, %v571_v48 }
 0x214   : > { %597 = vst.msk [vmem:[%s947_s27 + $0x38] sm:$0xff] %vm464_vm8, %v589_v47 }
 0x215   : > { %596 = vst.msk [vmem:[%s947_s27 + $0x30] sm:$0xff] %vm464_vm8, %v588_v49 }
 0x219   : > { %v606_v56 = vpop.xlane.xlu1 %605  ;;  %v609_v58 = vpop.xlane.xlu2 %608 }
 0x21a   : > { %625 = vst.msk [vmem:[%s947_s27 + $0x10] sm:$0xff] %vm622_vm14, %v606_v56  ;;  %v603_v59 = vpop.xlane.xlu0 %602 }
 0x21b   : > { %626 = vst.msk [vmem:[%s947_s27 + $0x18] sm:$0xff] %vm622_vm14, %v609_v58 }
 0x21c   : > { %624 = vst.msk [vmem:[%s947_s27 + $0x8] sm:$0xff] %vm622_vm14, %v603_v59 }
 0x221   : > { %v615_v60 = vpop.xlane.xlu1 %614  ;;  %v618_v62 = vpop.xlane.xlu2 %617 }
 0x222   : > { %628 = vst.msk [vmem:[%s947_s27 + $0x28] sm:$0xff] %vm622_vm14, %v615_v60  ;;  %v612_v63 = vpop.xlane.xlu0 %611 }
 0x223   : > { %629 = vst.msk [vmem:[%s947_s27 + $0x30] sm:$0xff] %vm622_vm14, %v618_v62 }
 0x224   : > { %627 = vst.msk [vmem:[%s947_s27 + $0x20] sm:$0xff] %vm622_vm14, %v612_v63 }
 0x22a   : > { %v621_v0 = vpop.xlane.xlu0 %620 }
 0x22b   : > { %630 = vst.msk [vmem:[%s947_s27 + $0x38] sm:$0xff] %vm622_vm14, %v621_v0 }
 0x22c PF: > { %s18_s24 = sadd.s32 1, %s771_s24  }
 0x22d   : > { %p15_p4 = scmp.ge.s32.totalorder %s18_s24, 4  }
 0x22f   :  { %17 = sbr.rel (!%p15_p4) target bundleno = 1 (0x1), region = 87 }

// kernel: basic_block_forward.11
= control target key start
LH: loop header
LB: loop body
LE: loop exit
PB: predicated region body
PF: predicated region fallthrough
CT: control target
= control target key end

     0   :  { %v259_v3 = vmov 0   ;;  %s446_s0 = inlined_call_operand.vmem [shape: f32[128,16], index: 0, kind: input, shape index: {}]   ;;  %s447_s1 = inlined_call_operand.vmem [shape: f32[128,1], index: 1, kind: input, shape index: {}]   ;;  %s448_s2 = inlined_call_operand.vmem [shape: f32[128,16], index: 2, kind: input, shape index: {}]   ;;  %s449_s3 = inlined_call_operand.hbm [shape: f32[128,16], index: 3, kind: output, shape index: {}]  }
   0x1   :  { %v35_v0 = vld [vmem:[%s447_s1 + $0x20] sm:$0xff]  ;;  %v33_v1 = vld [vmem:[%s447_s1 + $0x10] sm:$0xff]  ;;  %232 = vset.pattern.permute.xlu2 %v259_v3  ;;  %231 = vset.pattern.permute.xlu1 %v259_v3 }
   0x2   :  { %v31_v2 = vld [vmem:[%s447_s1] sm:$0xff]  ;;  %230 = vset.pattern.permute.xlu0 %v259_v3  ;;  %69 = vperm.xlu2 %232, %v35_v0  }
   0x3   :  { %59 = vperm.xlu1 %231, %v33_v1   ;;  %49 = vperm.xlu0 %230, %v31_v2  }
   0x4   :  { %8 = vsyncpa [#allocation3], 0  ;;  %v36_v4 = vld [vmem:[%s447_s1 + $0x28] sm:$0xff]  ;;  %v34_v5 = vld [vmem:[%s447_s1 + $0x18] sm:$0xff]  ;;  %vm191_vm0 = vcmask 130048   ;;  %s260_s24 = smov [#allocation2]  }
   0x5   :  { %v32_v6 = vld [vmem:[%s447_s1 + $0x8] sm:$0xff]  ;;  %v39_v7 = vld [vmem:[%s447_s1 + $0x40] sm:$0xff]  ;;  %v38_v8 = vld [vmem:[%s447_s1 + $0x38] sm:$0xff]  ;;  %s212_s25 = sshll.u32 %s260_s24, 4  ;;  %s214_s28 = sshll.u32 %s449_s3, 4  ;;  %s213_s25 = int_to_ptr.vmem [resolvable:$true] %s212_s25  ;;  %s215_s28 = int_to_ptr.hbm [resolvable:$true] %s214_s28 }
   0x6   :  { %v37_v9 = vld [vmem:[%s447_s1 + $0x30] sm:$0xff]  ;;  %v42_v10 = vld [vmem:[%s447_s1 + $0x58] sm:$0xff]  ;;  %v40_v12 = vld [vmem:[%s447_s1 + $0x48] sm:$0xff]  ;;  %s262_s29 = smov 8  }
   0x7   :  { %v41_v11 = vld [vmem:[%s447_s1 + $0x50] sm:$0xff]  ;;  %v44_v14 = vld [vmem:[%s447_s1 + $0x68] sm:$0xff]  ;;  %v43_v15 = vld [vmem:[%s447_s1 + $0x60] sm:$0xff] }
   0x8   :  { %v45_v13 = vld [vmem:[%s447_s1 + $0x70] sm:$0xff]  ;;  %v46_v16 = vld [vmem:[%s447_s1 + $0x78] sm:$0xff]  ;;  %v19_v17 = vld [vmem:[%s446_s0 + $0x20] sm:$0xff] }
   0x9   :  { %v147_v18 = vld [vmem:[%s448_s2 + $0x20] sm:$0xff]  ;;  %v20_v23 = vld [vmem:[%s446_s0 + $0x28] sm:$0xff]  ;;  %v26_v35 = vld [vmem:[%s446_s0 + $0x58] sm:$0xff] }
   0xa   :  { %74 = vperm.xlu2 %232, %v36_v4   ;;  %v148_v24 = vld [vmem:[%s448_s2 + $0x28] sm:$0xff]  ;;  %v23_v29 = vld [vmem:[%s446_s0 + $0x40] sm:$0xff]  ;;  %v17_v36 = vld [vmem:[%s446_s0 + $0x10] sm:$0xff] }
   0xb   :  { %64 = vperm.xlu1 %231, %v34_v5   ;;  %54 = vperm.xlu0 %230, %v32_v6   ;;  %v151_v30 = vld [vmem:[%s448_s2 + $0x40] sm:$0xff]  ;;  %v154_v38 = vld [vmem:[%s448_s2 + $0x58] sm:$0xff]  ;;  %v145_v41 = vld [vmem:[%s448_s2 + $0x10] sm:$0xff] }
   0xc   :  { %v15_v37 = vld [vmem:[%s446_s0] sm:$0xff]  ;;  %v29_v53 = vld [vmem:[%s446_s0 + $0x70] sm:$0xff]  ;;  %v18_v54 = vld [vmem:[%s446_s0 + $0x18] sm:$0xff] }
   0xd   :  { %v143_v43 = vld [vmem:[%s448_s2] sm:$0xff]  ;;  %v16_v55 = vld [vmem:[%s446_s0 + $0x8] sm:$0xff]  ;;  %v157_v56 = vld [vmem:[%s448_s2 + $0x70] sm:$0xff] }
   0xe   :  { %v146_v59 = vld [vmem:[%s448_s2 + $0x18] sm:$0xff]  ;;  %v144_v61 = vld [vmem:[%s448_s2 + $0x8] sm:$0xff] }
  0x12   :  { %89 = vperm.xlu2 %232, %v39_v7   ;;  %v22_v7 = vld [vmem:[%s446_s0 + $0x38] sm:$0xff] }
  0x13   :  { %84 = vperm.xlu1 %231, %v38_v8   ;;  %79 = vperm.xlu0 %230, %v37_v9   ;;  %v21_v8 = vld [vmem:[%s446_s0 + $0x30] sm:$0xff]  ;;  %v150_v9 = vld [vmem:[%s448_s2 + $0x38] sm:$0xff] }
  0x1a   :  { %104 = vperm.xlu2 %232, %v42_v10  }
  0x1b   :  { %99 = vperm.xlu1 %231, %v41_v11   ;;  %94 = vperm.xlu0 %230, %v40_v12   ;;  %v149_v11 = vld [vmem:[%s448_s2 + $0x30] sm:$0xff] }
  0x22   :  { %119 = vperm.xlu2 %232, %v45_v13  }
  0x23   :  { %114 = vperm.xlu1 %231, %v44_v14   ;;  %109 = vperm.xlu0 %230, %v43_v15  }
  0x2b   :  { %124 = vperm.xlu0 %230, %v46_v16  }
  0x5c   :  { %v70_v19 = vpop.permute.xlu2 %69 }
  0x5d   :  { %v131_v20 = vmul.f32 %v70_v19, %v19_v17  ;;  %v25_v19 = vld [vmem:[%s446_s0 + $0x50] sm:$0xff] }
  0x5f   :  { %v163_v21 = vadd.f32 %v147_v18, %v131_v20  ;;  %v24_v20 = vld [vmem:[%s446_s0 + $0x48] sm:$0xff] }
  0x61   :  { %v179_v22 = vmax.f32 %v163_v21, 0.0  ;;  %v153_v21 = vld [vmem:[%s448_s2 + $0x50] sm:$0xff] }
  0x63   :  { %196 = vst.msk [vmem:[#allocation2 + $0x20] sm:$0xff] %vm191_vm0, %v179_v22 }
  0x64   :  { %v75_v25 = vpop.permute.xlu2 %74 }
  0x65   :  { %v132_v26 = vmul.f32 %v75_v25, %v20_v23  ;;  %v152_v23 = vld [vmem:[%s448_s2 + $0x48] sm:$0xff] }
  0x67   :  { %v164_v27 = vadd.f32 %v148_v24, %v132_v26 }
  0x69   :  { %v180_v28 = vmax.f32 %v164_v27, 0.0 }
  0x6b   :  { %197 = vst.msk [vmem:[#allocation2 + $0x28] sm:$0xff] %vm191_vm0, %v180_v28 }
  0x6c   :  { %v90_v31 = vpop.permute.xlu2 %89 }
  0x6d   :  { %v135_v32 = vmul.f32 %v90_v31, %v23_v29  ;;  %v28_v31 = vld [vmem:[%s446_s0 + $0x68] sm:$0xff] }
  0x6f   :  { %v167_v33 = vadd.f32 %v151_v30, %v135_v32  ;;  %v27_v32 = vld [vmem:[%s446_s0 + $0x60] sm:$0xff] }
  0x71   :  { %v183_v34 = vmax.f32 %v167_v33, 0.0  ;;  %v156_v33 = vld [vmem:[%s448_s2 + $0x68] sm:$0xff] }
  0x73   :  { %200 = vst.msk [vmem:[#allocation2 + $0x40] sm:$0xff] %vm191_vm0, %v183_v34 }
  0x74   :  { %v105_v39 = vpop.permute.xlu2 %104 }
  0x75   :  { %v138_v40 = vmul.f32 %v105_v39, %v26_v35  ;;  %v60_v42 = vpop.permute.xlu1 %59  ;;  %v50_v44 = vpop.permute.xlu0 %49  ;;  %v155_v35 = vld [vmem:[%s448_s2 + $0x60] sm:$0xff] }
  0x76   :  { %v129_v45 = vmul.f32 %v60_v42, %v17_v36  ;;  %v127_v46 = vmul.f32 %v50_v44, %v15_v37  ;;  %v158_v44 = vld [vmem:[%s448_s2 + $0x78] sm:$0xff] }
  0x77   :  { %v170_v47 = vadd.f32 %v154_v38, %v138_v40 }
  0x78   :  { %v161_v48 = vadd.f32 %v145_v41, %v129_v45  ;;  %v159_v49 = vadd.f32 %v143_v43, %v127_v46  ;;  %v30_v43 = vld [vmem:[%s446_s0 + $0x78] sm:$0xff]  ;;  %s261_s0 = smov 128  }
  0x79   :  { %v186_v50 = vmax.f32 %v170_v47, 0.0 }
  0x7a   :  { %v177_v51 = vmax.f32 %v161_v48, 0.0  ;;  %v175_v52 = vmax.f32 %v159_v49, 0.0 }
  0x7b   :  { %203 = vst.msk [vmem:[#allocation2 + $0x58] sm:$0xff] %vm191_vm0, %v186_v50 }
  0x7c   :  { %194 = vst.msk [vmem:[#allocation2 + $0x10] sm:$0xff] %vm191_vm0, %v177_v51  ;;  %v120_v57 = vpop.permute.xlu2 %119 }
  0x7d   :  { %192 = vst.msk [vmem:[#allocation2] sm:$0xff] %vm191_vm0, %v175_v52  ;;  %v141_v58 = vmul.f32 %v120_v57, %v29_v53  ;;  %v65_v60 = vpop.permute.xlu1 %64  ;;  %v55_v62 = vpop.permute.xlu0 %54 }
  0x7e   :  { %v130_v63 = vmul.f32 %v65_v60, %v18_v54  ;;  %v128_v0 = vmul.f32 %v55_v62, %v16_v55 }
  0x7f   :  { %v173_v1 = vadd.f32 %v157_v56, %v141_v58 }
  0x80   :  { %v162_v2 = vadd.f32 %v146_v59, %v130_v63  ;;  %v160_v3 = vadd.f32 %v144_v61, %v128_v0 }
  0x81   :  { %v189_v4 = vmax.f32 %v173_v1, 0.0 }
  0x82   :  { %v178_v5 = vmax.f32 %v162_v2, 0.0  ;;  %v176_v6 = vmax.f32 %v160_v3, 0.0 }
  0x83   :  { %206 = vst.msk [vmem:[#allocation2 + $0x70] sm:$0xff] %vm191_vm0, %v189_v4 }
  0x84   :  { %195 = vst.msk [vmem:[#allocation2 + $0x18] sm:$0xff] %vm191_vm0, %v178_v5 }
  0x85   :  { %193 = vst.msk [vmem:[#allocation2 + $0x8] sm:$0xff] %vm191_vm0, %v176_v6  ;;  %v85_v10 = vpop.permute.xlu1 %84  ;;  %v80_v12 = vpop.permute.xlu0 %79 }
  0x86   :  { %v134_v13 = vmul.f32 %v85_v10, %v22_v7  ;;  %v133_v14 = vmul.f32 %v80_v12, %v21_v8 }
  0x88   :  { %v166_v15 = vadd.f32 %v150_v9, %v134_v13  ;;  %v165_v16 = vadd.f32 %v149_v11, %v133_v14 }
  0x8a   :  { %v182_v17 = vmax.f32 %v166_v15, 0.0  ;;  %v181_v18 = vmax.f32 %v165_v16, 0.0 }
  0x8c   :  { %199 = vst.msk [vmem:[#allocation2 + $0x38] sm:$0xff] %vm191_vm0, %v182_v17 }
  0x8d   :  { %198 = vst.msk [vmem:[#allocation2 + $0x30] sm:$0xff] %vm191_vm0, %v181_v18  ;;  %v100_v22 = vpop.permute.xlu1 %99  ;;  %v95_v24 = vpop.permute.xlu0 %94 }
  0x8e   :  { %v137_v25 = vmul.f32 %v100_v22, %v25_v19  ;;  %v136_v26 = vmul.f32 %v95_v24, %v24_v20 }
  0x90   :  { %v169_v27 = vadd.f32 %v153_v21, %v137_v25  ;;  %v168_v28 = vadd.f32 %v152_v23, %v136_v26 }
  0x92   :  { %v185_v29 = vmax.f32 %v169_v27, 0.0  ;;  %v184_v30 = vmax.f32 %v168_v28, 0.0 }
  0x94   :  { %202 = vst.msk [vmem:[#allocation2 + $0x50] sm:$0xff] %vm191_vm0, %v185_v29 }
  0x95   :  { %201 = vst.msk [vmem:[#allocation2 + $0x48] sm:$0xff] %vm191_vm0, %v184_v30  ;;  %v115_v34 = vpop.permute.xlu1 %114  ;;  %v110_v36 = vpop.permute.xlu0 %109 }
  0x96   :  { %v140_v37 = vmul.f32 %v115_v34, %v28_v31  ;;  %v139_v38 = vmul.f32 %v110_v36, %v27_v32 }
  0x98   :  { %v172_v39 = vadd.f32 %v156_v33, %v140_v37  ;;  %v171_v40 = vadd.f32 %v155_v35, %v139_v38 }
  0x9a   :  { %v188_v41 = vmax.f32 %v172_v39, 0.0  ;;  %v187_v42 = vmax.f32 %v171_v40, 0.0 }
  0x9c   :  { %205 = vst.msk [vmem:[#allocation2 + $0x68] sm:$0xff] %vm191_vm0, %v188_v41 }
  0x9d   :  { %204 = vst.msk [vmem:[#allocation2 + $0x60] sm:$0xff] %vm191_vm0, %v187_v42  ;;  %v125_v45 = vpop.permute.xlu0 %124 }
  0x9e   :  { %v142_v46 = vmul.f32 %v125_v45, %v30_v43 }
  0xa0   :  { %v174_v47 = vadd.f32 %v158_v44, %v142_v46 }
  0xa2   :  { %v190_v48 = vmax.f32 %v174_v47, 0.0 }
  0xa4   :  { %207 = vst.msk [vmem:[#allocation2 + $0x78] sm:$0xff] %vm191_vm0, %v190_v48 }
  0xa5   :  { %220 = dma.vmem_to_hbm [thread:$0]  %s213_s25, 2048, %s215_s28, [#allocation3], %s261_s0, %s261_s0, %s262_s29  }
  0xa6   :  { %257 = dma.done.wait [#allocation3], 2048  }
  0xa7   :  { %258 = vsyncadd [#allocation3], 4294965248 }
  0xa8   :  { %225 = vsyncpa [#allocation3], 1 }

// kernel: basic_block_forward.6
= control target key start
LH: loop header
LB: loop body
LE: loop exit
PB: predicated region body
PF: predicated region fallthrough
CT: control target
= control target key end

     0   :  { %s1841_s12 = smov 0   ;;  %s2294_s0 = inlined_call_operand.vmem [shape: bf16[2,10,10,16], index: 0, kind: input, shape index: {}]   ;;  %s2295_s1 = inlined_call_operand.vmem [shape: bf16[9,16,16], index: 1, kind: input, shape index: {}]   ;;  %s2296_s2 = inlined_call_operand.vmem [shape: f32[2,64,16], index: 2, kind: output, shape index: {0}]   ;;  %s2297_s3 = inlined_call_operand.vmem [shape: f32[2,2,16], index: 3, kind: output, shape index: {1}]  }
   0x1 LB: > { %s1544_s13 = sadd.s32 4294967295, %s1819_s12   ;;  %p1548_p0 = scmp.ge.s32.totalorder %s1819_s12, 1  ;;  %s1819_s12 = sphi %s1841_s12, %s14_s12  }
   0x2   : > { %p140_p1 = scmp.lt.s32.totalorder %s1819_s12, 3 }
   0x4   : > { %p141_p2 = pnand %p1548_p0, %p140_p1 }
   0x5   : > { %p168_p3 = scmp.lt.s32.totalorder (!%p141_p2), %s1544_s13, 1 }
   0x6   : > { %144 = sbr.rel (%p141_p2) target bundleno = 330 (0x14a), region = 28 }
   0xb   : > { %v1785_v0 = vld [vmem:[%s2295_s1 + $0x8] sm:$0xff]  ;;  %v1786_v1 = vld [vmem:[%s2295_s1 + $0x10] sm:$0xff]  ;;  %s2303_s13 = smov (!%p168_p3, %s1544_s13), 1  ;;  %v1791_v2 = vld [vmem:[%s2295_s1 + $0x18] sm:$0xff]  ;;  %vm201_vm0 = vsmask.f32 3328 }
   0xc   : > { %1801 = vmatpush.bf16.msra.mxu1 %v1785_v0  ;;  %1802 = vmatpush.bf16.msra.mxu2 %v1785_v0  ;;  %s1804_s18 = smul.u32 80, %s2303_s13  ;;  %v1784_v3 = vld [vmem:[%s2295_s1] sm:$0xff]  ;;  %vm202_vm1 = vsmask.f32 7440  ;;  %vm337_vm2 = vcmask 130048   ;;  %vm470_vm4 = vcmask 1042432  }
   0xd   : > { %1803 = vmatpush.bf16.msra.mxu3 %v1785_v0  ;;  %357 = vmatpush.bf16.msra.mxu0 %v1785_v0  ;;  %v1792_v4 = vld [vmem:[%s2295_s1 + $0x20] sm:$0xff]  ;;  %vm1894_vm3 = vmor %vm201_vm0, %vm202_vm1  ;;  %vm471_vm5 = vcmask 1046532   ;;  %s1779_s9 = sshll.u32 %s2303_s13, 6  ;;  %s1552_s15 = sshll.u32 %s2303_s13, 1  ;;  %vm1426_vm7 = vcmask 122880  }
   0xe   : > { %s1870_s27 = scalar_lea.vmem %s2294_s0, %s1804_s18  ;;  %vm1934_vm6 = vmor %vm470_vm4, %vm471_vm5  ;;  %s2231_s14 = scalar_lea.vmem %s2296_s2, %s1779_s9 }
   0xf   : > { %v185_v5 = vld [vmem:[%s1870_s27 + $0x10] sm:$0xf]  ;;  %v186_v6 = vld [vmem:[%s1870_s27 + $0x18] sm:$0xf]  ;;  %v1875_v7 = vld [vmem:[%s1870_s27 + $0x14] sm:$0x1]  ;;  %s181_s18 = scalar_lea.vmem %s2297_s3, %s1552_s15 }
  0x10   : > { %545 = vmatpush.bf16.msrb.mxu2 %v1786_v1  ;;  %424 = vmatpush.bf16.msrb.mxu1 %v1784_v3  ;;  %v1878_v8 = vld [vmem:[%s1870_s27 + $0x1c] sm:$0x1]  ;;  %v233_v9 = vshrl.u32 %v185_v5, 16  ;;  %v236_v10 = vshll.u32 %v185_v5, 16  ;;  %v242_v11 = vshll.u32 %v1875_v7, 16  ;;  %v247_v12 = vshrl.u32 %v186_v6, 16 }
  0x11   : > { %632 = vmatpush.bf16.msrb.mxu3 %v1791_v2  ;;  %830 = vmatpush.bf16.msrb.mxu0 %v1792_v4  ;;  %v250_v13 = vshll.u32 %v186_v6, 16  ;;  %v256_v14 = vshll.u32 %v1878_v8, 16  ;;  %v187_v15 = vld [vmem:[%s1870_s27 + $0x20] sm:$0xf]  ;;  %v188_v16 = vld [vmem:[%s1870_s27 + $0x28] sm:$0xf] }
  0x12   : > { %v235_v17 = vrot.slane %v233_v9, 4  ;;  %v238_v18 = vrot.slane %v236_v10, 5  ;;  %v244_v19 = vrot.slane %v242_v11, 5  ;;  %v249_v20 = vrot.slane %v247_v12, 4  ;;  %v1885_v21 = vld [vmem:[%s1870_s27 + $0x24] sm:$0x1] }
  0x13   : > { %v252_v22 = vrot.slane %v250_v13, 5  ;;  %v258_v23 = vrot.slane %v256_v14, 5  ;;  %v1888_v24 = vld [vmem:[%s1870_s27 + $0x2c] sm:$0x1]  ;;  %v261_v25 = vshrl.u32 %v187_v15, 16  ;;  %v264_v26 = vshll.u32 %v187_v15, 16 }
  0x14   : > { %v239_v27 = vor.u32 %v238_v18, %v235_v17  ;;  %v270_v28 = vshll.u32 %v1885_v21, 16  ;;  %v275_v29 = vshrl.u32 %v188_v16, 16  ;;  %v278_v30 = vshll.u32 %v188_v16, 16  ;;  %v189_v31 = vld [vmem:[%s1870_s27 + $0x30] sm:$0xf] }
  0x15   : > { %v253_v33 = vor.u32 %v252_v22, %v249_v20  ;;  %v263_v34 = vrot.slane %v261_v25, 4  ;;  %v266_v35 = vrot.slane %v264_v26, 5  ;;  %v284_v36 = vshll.u32 %v1888_v24, 16  ;;  %v1900_v41 = vld [vmem:[%s1870_s27 + $0x34] sm:$0x1] }
  0x16   : > { %v240_v37 = vrot.slane %v239_v27, 4  ;;  %v272_v38 = vrot.slane %v270_v28, 5  ;;  %v277_v39 = vrot.slane %v275_v29, 4  ;;  %v280_v40 = vrot.slane %v278_v30, 5  ;;  %v190_v48 = vld [vmem:[%s1870_s27 + $0x38] sm:$0xf] }
  0x17   : > { %v254_v42 = vrot.slane %v253_v33, 4  ;;  %v267_v43 = vor.u32 %v266_v35, %v263_v34  ;;  %v286_v44 = vrot.slane %v284_v36, 5  ;;  %v289_v45 = vshrl.u32 %v189_v31, 16  ;;  %v1906_v49 = vld [vmem:[%s1870_s27 + $0x3c] sm:$0x1]  ;;  %v1798_v17 = vld [vmem:[%s2295_s1 + $0x30] sm:$0xff] }
  0x18   : > { %v245_v46 = vsel %vm1894_vm3, %v240_v37, %v244_v19  ;;  %v281_v47 = vor.u32 %v280_v40, %v277_v39  ;;  %v292_v50 = vshll.u32 %v189_v31, 16  ;;  %v298_v51 = vshll.u32 %v1900_v41, 16  ;;  %v183_v60 = vld [vmem:[%s1870_s27] sm:$0xf]  ;;  %v193_v1 = vld [vmem:[%s1870_s27 + $0x4] sm:$0x1] }
  0x19   : > { %v259_v52 = vsel %vm1894_vm3, %v254_v42, %v258_v23  ;;  %v321_v53 = vunpack.c.l.b16 %v245_v46  ;;  %v268_v54 = vrot.slane %v267_v43, 4  ;;  %v291_v55 = vrot.slane %v289_v45, 4  ;;  %v184_v6 = vld [vmem:[%s1870_s27 + $0x8] sm:$0xf]  ;;  %v194_v20 = vld [vmem:[%s1870_s27 + $0xc] sm:$0x1] }
  0x1a   : > { %v322_v56 = vunpack.c.l.b16 %v259_v52  ;;  %v282_v57 = vrot.slane %v281_v47, 4  ;;  %v294_v58 = vrot.slane %v292_v50, 5  ;;  %v300_v59 = vrot.slane %v298_v51, 5  ;;  %v446_v29 = vld [vmem:[%s1870_s27] sm:$0xe]  ;;  %v1793_v30 = vld [vmem:[%s2295_s1 + $0x28] sm:$0xff] }
  0x1b   : > { %v273_v61 = vsel %vm1894_vm3, %v268_v54, %v272_v38  ;;  %v303_v62 = vshrl.u32 %v190_v48, 16  ;;  %v306_v63 = vshll.u32 %v190_v48, 16  ;;  %v312_v0 = vshll.u32 %v1906_v49, 16  ;;  %v447_v36 = vld [vmem:[%s1870_s27 + $0x8] sm:$0xe] }
  0x1c   : > { %v328_v2 = vpack.c.b16 %v322_v56, %v321_v53  ;;  %v287_v3 = vsel %vm1894_vm3, %v282_v57, %v286_v44  ;;  %v323_v4 = vunpack.c.l.b16 %v273_v61  ;;  %v295_v5 = vor.u32 %v294_v58, %v291_v55  ;;  %v1639_v43 = vld [vmem:[%s1870_s27 + $0x8] sm:$0xf]  ;;  %v1641_v54 = vld [vmem:[%s1870_s27 + $0x10] sm:$0xf]  ;;  %v1799_v56 = vld [vmem:[%s2295_s1 + $0x38] sm:$0xff] }
  0x1d   : > { %v324_v9 = vunpack.c.l.b16 %v287_v3  ;;  %v305_v10 = vrot.slane %v303_v62, 4  ;;  %v308_v11 = vrot.slane %v306_v63, 5  ;;  %v314_v12 = vrot.slane %v312_v0, 5  ;;  %v1955_v61 = vld [vmem:[%s1870_s27 + $0x14] sm:$0x1] }
  0x1e   : > { %1560 = vmatmul.msk.bf16.vlgmr.msra.gmra.mxu1 %vm337_vm2, %v328_v2  ;;  %v296_v13 = vrot.slane %v295_v5, 4  ;;  %v205_v14 = vshrl.u32 %v183_v60, 16  ;;  %v208_v15 = vshll.u32 %v183_v60, 16  ;;  %v214_v16 = vshll.u32 %v193_v1, 16  ;;  %v1952_v60 = vld [vmem:[%s1870_s27 + $0xc] sm:$0x1] }
  0x1f   : > { %v329_v18 = vpack.c.b16 %v324_v9, %v323_v4  ;;  %v309_v19 = vor.u32 %v308_v11, %v305_v10  ;;  %v219_v22 = vshrl.u32 %v184_v6, 16  ;;  %v222_v23 = vshll.u32 %v184_v6, 16  ;;  %956 = vmatpush.bf16.msra.mxu1 %v1793_v30  ;;  %v1565_v0 = vld [vmem:[%s1870_s27] sm:$0xf] }
  0x20   : > { %v301_v25 = vsel %vm1894_vm3, %v296_v13, %v300_v59  ;;  %v207_v26 = vrot.slane %v205_v14, 4  ;;  %v210_v27 = vrot.slane %v208_v15, 5  ;;  %v216_v28 = vrot.slane %v214_v16, 5  ;;  %v1800_v13 = vld [vmem:[%s2295_s1 + $0x40] sm:$0xff] }
  0x21   : > { %1561 = vmatmul.msk.bf16.vlgmr.msra.gmra.mxu2 %vm337_vm2, %v329_v18  ;;  %v310_v31 = vrot.slane %v309_v19, 4  ;;  %v325_v33 = vunpack.c.l.b16 %v301_v25  ;;  %v221_v34 = vrot.slane %v219_v22, 4  ;;  %v224_v35 = vrot.slane %v222_v23, 5 }
  0x22   : > { %v211_v37 = vor.u32 %v210_v27, %v207_v26  ;;  %v228_v38 = vshll.u32 %v194_v20, 16  ;;  %v475_v39 = vrot.slane %v193_v1, 5  ;;  %v479_v40 = vrot.slane %v194_v20, 5  ;;  %1043 = vmatpush.bf16.msra.mxu2 %v1798_v17  ;;  %v1780_v1 = vld [vmem:[%s1870_s27 + $0x4] sm:$0xf0] }
  0x23   : > { %v315_v44 = vsel %vm1894_vm3, %v310_v31, %v314_v12  ;;  %v225_v45 = vor.u32 %v224_v35, %v221_v34  ;;  %v1587_v46 = vrot.slane %v446_v29, 9  ;;  %v1588_v51 = vrot.slane %v447_v36, 9  ;;  %v448_v26 = vld [vmem:[%s1870_s27 + $0x10] sm:$0xe]  ;;  %v1643_v27 = vld [vmem:[%s1870_s27 + $0x18] sm:$0xf] }
  0x24   : > { %v326_v47 = vunpack.c.l.b16 %v315_v44  ;;  %v212_v48 = vrot.slane %v211_v37, 4  ;;  %v230_v50 = vrot.slane %v228_v38, 5  ;;  %v679_v55 = vshrl.u32 %v1639_v43, 16  ;;  %v1645_v29 = vld [vmem:[%s1870_s27 + $0x20] sm:$0xf] }
  0x25   : > { %v226_v52 = vrot.slane %v225_v45, 4  ;;  %v476_v53 = vsel %vm1934_vm6, %v1587_v46, %v475_v39  ;;  %v480_v59 = vsel %vm1934_vm6, %v1588_v51, %v479_v40  ;;  %v682_v5 = vshll.u32 %v1639_v43, 16  ;;  %v449_v31 = vld [vmem:[%s1870_s27 + $0x18] sm:$0xe]  ;;  %v1617_v37 = vld [vmem:[%s1870_s27 + $0x8] sm:$0xf] }
  0x26   : > { %v330_v57 = vpack.c.b16 %v326_v47, %v325_v33  ;;  %v217_v58 = vsel %vm1894_vm3, %v212_v48, %v216_v28  ;;  %v508_v2 = vunpack.c.l.b16 %v476_v53  ;;  %v681_v4 = vrot.slane %v679_v55, 4  ;;  %v1787_v38 = vld [vmem:[%s1870_s27 + $0xc] sm:$0xf0]  ;;  %v1985_v51 = vld [vmem:[%s1870_s27 + $0x1c] sm:$0x1] }
  0x27   : > { %v231_v62 = vsel %vm1894_vm3, %v226_v52, %v230_v50  ;;  %v319_v63 = vunpack.c.l.b16 %v217_v58  ;;  %v693_v6 = vshrl.u32 %v1641_v54, 16  ;;  %v509_v9 = vunpack.c.l.b16 %v480_v59  ;;  %v1569_v58 = vld [vmem:[%s1870_s27 + $0x10] sm:$0xf] }
  0x28   : > { %1562 = vmatmul.msk.bf16.vlgmr.msra.gmra.mxu3 %vm337_vm2, %v330_v57  ;;  %v320_v3 = vunpack.c.l.b16 %v231_v62  ;;  %v688_v10 = vshll.u32 %v1952_v60, 16  ;;  %v696_v11 = vshll.u32 %v1641_v54, 16  ;;  %v702_v12 = vshll.u32 %v1955_v61, 16  ;;  %v1990_v57 = vld [vmem:[%s1870_s27 + $0x24] sm:$0x1] }
  0x29   : > { %1241 = vmatpush.bf16.msra.mxu3 %v1799_v56  ;;  %v1566_v15 = vor.u32 %v1780_v1, %v1565_v0  ;;  %v684_v16 = vrot.slane %v682_v5, 5  ;;  %v695_v17 = vrot.slane %v693_v6, 4  ;;  %v516_v20 = vpack.c.b16 %v509_v9, %v508_v2  ;;  %v1647_v6 = vld [vmem:[%s1870_s27 + $0x28] sm:$0xf] }
  0x2a   : > { %v327_v14 = vpack.c.b16 %v320_v3, %v319_v63  ;;  %v698_v18 = vrot.slane %v696_v11, 5  ;;  %v690_v22 = vrot.slane %v688_v10, 5  ;;  %v704_v25 = vrot.slane %v702_v12, 5 }
  0x2b   : > { %v685_v19 = vor.u32 %v684_v16, %v681_v4  ;;  %v1589_v33 = vrot.slane %v448_v26, 9  ;;  %v483_v34 = vrot.slane %v1875_v7, 5  ;;  %v707_v35 = vshrl.u32 %v1643_v27, 16 }
  0x2c   : > { %1559 = vmatmul.msk.bf16.vlgmr.msra.gmra.mxu0 %vm337_vm2, %v327_v14  ;;  %v699_v23 = vor.u32 %v698_v18, %v695_v17  ;;  %v710_v36 = vshll.u32 %v1643_v27, 16  ;;  %v721_v43 = vshrl.u32 %v1645_v29, 16  ;;  %v724_v44 = vshll.u32 %v1645_v29, 16  ;;  %v450_v14 = vld [vmem:[%s1870_s27 + $0x20] sm:$0xe] }
  0x2d   : > { %1367 = vmatpush.bf16.msra.mxu0 %v1800_v13  ;;  %v686_v28 = vrot.slane %v685_v19, 4  ;;  %v1590_v45 = vrot.slane %v449_v31, 9  ;;  %v487_v7 = vrot.slane %v1878_v8, 5  ;;  %v1618_v46 = vor.u32 %v1787_v38, %v1617_v37  ;;  %v1781_v8 = vld [vmem:[%s1870_s27 + $0x14] sm:$0xf0] }
  0x2e   : > { %1583 = vmatmul.msk.bf16.vlgmr.msrb.gmra.mxu1 %vm337_vm2, %v1566_v15  ;;  %v700_v30 = vrot.slane %v699_v23, 4  ;;  %v484_v50 = vsel %vm1934_vm6, %v1589_v33, %v483_v34  ;;  %v709_v52 = vrot.slane %v707_v35, 4  ;;  %v712_v53 = vrot.slane %v710_v36, 5  ;;  %v1649_v13 = vld [vmem:[%s1870_s27 + $0x30] sm:$0xf] }
  0x2f   : > { %v691_v39 = vsel %vm1894_vm3, %v686_v28, %v690_v22  ;;  %v723_v54 = vrot.slane %v721_v43, 4  ;;  %v726_v55 = vrot.slane %v724_v44, 5  ;;  %v488_v56 = vsel %vm1934_vm6, %v1590_v45, %v487_v7  ;;  %v451_v15 = vld [vmem:[%s1870_s27 + $0x28] sm:$0xe]  ;;  %v1621_v18 = vld [vmem:[%s1870_s27 + $0x18] sm:$0xf] }
  0x30   : > { %v705_v40 = vsel %vm1894_vm3, %v700_v30, %v704_v25  ;;  %v793_v47 = vunpack.c.l.b16 %v691_v39  ;;  %v510_v62 = vunpack.c.l.b16 %v484_v50  ;;  %v716_v63 = vshll.u32 %v1985_v51, 16  ;;  %v1788_v19 = vld [vmem:[%s1870_s27 + $0x1c] sm:$0xf0]  ;;  %v2013_v36 = vld [vmem:[%s1870_s27 + $0x2c] sm:$0x1] }
  0x31   : > { %1601 = vmatmul.msk.bf16.vlgmr.msrb.gmra.mxu2 %vm337_vm2, %v516_v20  ;;  %v794_v48 = vunpack.c.l.b16 %v705_v40  ;;  %v511_v0 = vunpack.c.l.b16 %v488_v56  ;;  %v713_v1 = vor.u32 %v712_v53, %v709_v52  ;;  %v727_v2 = vor.u32 %v726_v55, %v723_v54  ;;  %v1573_v43 = vld [vmem:[%s1870_s27 + $0x20] sm:$0xf]  ;;  %v452_v55 = vld [vmem:[%s1870_s27 + $0x30] sm:$0xe] }
  0x32   : > { %v730_v3 = vshll.u32 %v1990_v57, 16  ;;  %v1570_v4 = vor.u32 %v1781_v8, %v1569_v58  ;;  %v718_v5 = vrot.slane %v716_v63, 5  ;;  %v735_v16 = vshrl.u32 %v1647_v6, 16  ;;  %v1653_v63 = vld [vmem:[%s1870_s27 + $0x40] sm:$0xf] }
  0x33   : > { %v801_v59 = vpack.c.b16 %v794_v48, %v793_v47  ;;  %v517_v9 = vpack.c.b16 %v511_v0, %v510_v62  ;;  %v714_v10 = vrot.slane %v713_v1, 4  ;;  %v728_v11 = vrot.slane %v727_v2, 4  ;;  %v1651_v62 = vld [vmem:[%s1870_s27 + $0x38] sm:$0xf]  ;;  %v1625_v0 = vld [vmem:[%s1870_s27 + $0x28] sm:$0xf] }
  0x34   : > { %v732_v12 = vrot.slane %v730_v3, 5  ;;  %v738_v17 = vshll.u32 %v1647_v6, 16  ;;  %v749_v23 = vshrl.u32 %v1649_v13, 16  ;;  %v752_v25 = vshll.u32 %v1649_v13, 16  ;;  %v1789_v3 = vld [vmem:[%s1870_s27 + $0x2c] sm:$0xf0] }
  0x35   : > { %v719_v20 = vsel %vm1894_vm3, %v714_v10, %v718_v5  ;;  %v1591_v26 = vrot.slane %v450_v14, 9  ;;  %v491_v27 = vrot.slane %v1885_v21, 5  ;;  %v1592_v28 = vrot.slane %v451_v15, 9  ;;  %v2020_v21 = vld [vmem:[%s1870_s27 + $0x34] sm:$0x1] }
  0x36   : > { %v733_v22 = vsel %vm1894_vm3, %v728_v11, %v732_v12  ;;  %v495_v29 = vrot.slane %v1888_v24, 5  ;;  %v737_v30 = vrot.slane %v735_v16, 4  ;;  %v740_v31 = vrot.slane %v738_v17, 5  ;;  %v1782_v24 = vld [vmem:[%s1870_s27 + $0x24] sm:$0xf0] }
  0x37   : > { %v1622_v33 = vor.u32 %v1788_v19, %v1621_v18  ;;  %v795_v34 = vunpack.c.l.b16 %v719_v20  ;;  %v796_v35 = vunpack.c.l.b16 %v733_v22  ;;  %v751_v37 = vrot.slane %v749_v23, 4  ;;  %v2047_v17 = vld [vmem:[%s1870_s27 + $0x3c] sm:$0x1]  ;;  %v2050_v18 = vld [vmem:[%s1870_s27 + $0x44] sm:$0x1] }
  0x38   : > { %1635 = vmatmul.msk.bf16.vlgmr.msrb.gmra.mxu3 %vm337_vm2, %v1618_v46  ;;  %v754_v38 = vrot.slane %v752_v25, 5  ;;  %v492_v39 = vsel %vm1934_vm6, %v1591_v26, %v491_v27  ;;  %v496_v40 = vsel %vm1934_vm6, %v1592_v28, %v495_v29  ;;  %v741_v44 = vor.u32 %v740_v31, %v737_v30  ;;  %v1577_v25 = vld [vmem:[%s1870_s27 + $0x30] sm:$0xf]  ;;  %v1783_v26 = vld [vmem:[%s1870_s27 + $0x34] sm:$0xf0] }
  0x39   : > { %v744_v45 = vshll.u32 %v2013_v36, 16  ;;  %v802_v7 = vpack.c.b16 %v796_v35, %v795_v34  ;;  %v512_v46 = vunpack.c.l.b16 %v492_v39  ;;  %v513_v47 = vunpack.c.l.b16 %v496_v40 }
  0x3a   : > { %v755_v48 = vor.u32 %v754_v38, %v751_v37  ;;  %v758_v50 = vshll.u32 %v2020_v21, 16  ;;  %v1574_v52 = vor.u32 %v1782_v24, %v1573_v43  ;;  %v742_v53 = vrot.slane %v741_v44, 4  ;;  %v1727_v38 = vld [vmem:[%s1870_s27 + $0x18] sm:$0xf] }
  0x3b   : > { %v746_v54 = vrot.slane %v744_v45, 5  ;;  %v518_v56 = vpack.c.b16 %v513_v47, %v512_v46  ;;  %v499_v2 = vrot.slane %v1900_v41, 5  ;;  %v503_v6 = vrot.slane %v1906_v49, 5  ;;  %v1665_v45 = vld [vmem:[%s1870_s27 + $0x8] sm:$0xe] }
  0x3c   : > { %1661 = vmatmul.msk.bf16.vlgmr.msrb.gmra.mxu0 %vm337_vm2, %v801_v59  ;;  %v756_v58 = vrot.slane %v755_v48, 4  ;;  %v760_v8 = vrot.slane %v758_v50, 5  ;;  %v453_v59 = vld [vmem:[%s1870_s27 + $0x38] sm:$0xe]  ;;  %v766_v11 = vshll.u32 %v1651_v62, 16  ;;  %v777_v12 = vshrl.u32 %v1653_v63, 16 }
  0x3d   : > { %v747_v1 = vsel %vm1894_vm3, %v742_v53, %v746_v54  ;;  %v1594_v5 = vrot.slane %v453_v59, 9  ;;  %v780_v13 = vshll.u32 %v1653_v63, 16  ;;  %v1626_v14 = vor.u32 %v1789_v3, %v1625_v0  ;;  %v1629_v59 = vld [vmem:[%s1870_s27 + $0x38] sm:$0xf] }
  0x3e   : > { %1584 = vmatmul.msk.bf16.gmra.mxu1 %vm337_vm2, %v1570_v4  ;;  %v1593_v4 = vrot.slane %v452_v55, 9  ;;  %v761_v10 = vsel %vm1894_vm3, %v756_v58, %v760_v8  ;;  %v797_v41 = vunpack.c.l.b16 %v747_v1  ;;  %v768_v20 = vrot.slane %v766_v11, 5  ;;  %v1726_v8 = vld [vmem:[%s1870_s27 + $0x14] sm:$0x1] }
  0x3f   : > { %v798_v15 = vunpack.c.l.b16 %v761_v10  ;;  %v504_v49 = vsel %vm1934_vm6, %v1594_v5, %v503_v6  ;;  %v779_v22 = vrot.slane %v777_v12, 4  ;;  %v782_v23 = vrot.slane %v780_v13, 5 }
  0x40   : > { %v500_v16 = vsel %vm1934_vm6, %v1593_v4, %v499_v2  ;;  %v515_v29 = vunpack.c.l.b16 %v504_v49  ;;  %v772_v30 = vshll.u32 %v2047_v17, 16  ;;  %v786_v31 = vshll.u32 %v2050_v18, 16  ;;  %v1703_v49 = vld [vmem:[%s1870_s27 + $0x10] sm:$0xf] }
  0x41   : > { %1602 = vmatmul.msk.bf16.gmra.mxu2 %vm337_vm2, %v517_v9  ;;  %v763_v9 = vshrl.u32 %v1651_v62, 16  ;;  %v514_v27 = vunpack.c.l.b16 %v500_v16  ;;  %v803_v28 = vpack.c.b16 %v798_v15, %v797_v41  ;;  %v783_v35 = vor.u32 %v782_v23, %v779_v22  ;;  %v1790_v62 = vld [vmem:[%s1870_s27 + $0x3c] sm:$0xf0]  ;;  %v1794_v22 = vld [vmem:[%s1870_s27 + $0x14] sm:$0xf0] }
  0x42   : > { %v1578_v37 = vor.u32 %v1783_v26, %v1577_v25  ;;  %v774_v24 = vrot.slane %v772_v30, 5  ;;  %v788_v44 = vrot.slane %v786_v31, 5  ;;  %v1104_v48 = vshrl.u32 %v1727_v38, 16  ;;  %v1729_v26 = vld [vmem:[%s1870_s27 + $0x20] sm:$0xf] }
  0x43   : > { %v765_v19 = vrot.slane %v763_v9, 4  ;;  %v519_v43 = vpack.c.b16 %v515_v29, %v514_v27  ;;  %v784_v47 = vrot.slane %v783_v35, 4  ;;  %v1107_v50 = vshll.u32 %v1727_v38, 16  ;;  %v1667_v35 = vld [vmem:[%s1870_s27 + $0x18] sm:$0xe] }
  0x44   : > { %v890_v53 = vrot.slane %v1955_v61, 5  ;;  %v1673_v54 = vrot.slane %v1665_v45, 9  ;;  %v1728_v61 = vld [vmem:[%s1870_s27 + $0x1c] sm:$0x1]  ;;  %v1099_v5 = vshll.u32 %v1726_v8, 16  ;;  %v1630_v6 = vor.u32 %v1790_v62, %v1629_v59 }
  0x45   : > { %v769_v34 = vor.u32 %v768_v20, %v765_v19  ;;  %v789_v0 = vsel %vm1894_vm3, %v784_v47, %v788_v44  ;;  %v1109_v1 = vrot.slane %v1107_v50, 5  ;;  %v1113_v12 = vshll.u32 %v1728_v61, 16  ;;  %v1751_v19 = vld [vmem:[%s1870_s27 + $0x10] sm:$0xe]  ;;  %v1752_v20 = vld [vmem:[%s1870_s27 + $0x18] sm:$0xe] }
  0x46   : > { %v800_v10 = vunpack.c.l.b16 %v789_v0  ;;  %v1101_v15 = vrot.slane %v1099_v5, 5  ;;  %v1759_v30 = vrot.slane %v1751_v19, 9  ;;  %v1297_v31 = vrot.slane %v1726_v8, 5  ;;  %v1732_v59 = vld [vmem:[%s1870_s27 + $0x2c] sm:$0x1] }
  0x47   : > { %v770_v46 = vrot.slane %v769_v34, 4  ;;  %v1115_v25 = vrot.slane %v1113_v12, 5  ;;  %v1704_v34 = vor.u32 %v1794_v22, %v1703_v49  ;;  %v1118_v38 = vshrl.u32 %v1729_v26, 16  ;;  %v1707_v5 = vld [vmem:[%s1870_s27 + $0x20] sm:$0xf] }
  0x48   : > { %1636 = vmatmul.msk.bf16.gmra.mxu3 %vm337_vm2, %v1622_v33  ;;  %v1725_v33 = vld [vmem:[%s1870_s27 + $0x10] sm:$0xf]  ;;  %v1735_v49 = vld [vmem:[%s1870_s27 + $0x38] sm:$0xf] }
  0x49   : > { %v1090_v39 = vshrl.u32 %v1725_v33, 16  ;;  %v1093_v40 = vshll.u32 %v1725_v33, 16  ;;  %v775_v63 = vsel %vm1894_vm3, %v770_v46, %v774_v24  ;;  %v1760_v33 = vrot.slane %v1752_v20, 9  ;;  %v1733_v12 = vld [vmem:[%s1870_s27 + $0x30] sm:$0xf] }
  0x4a   : > { %v799_v9 = vunpack.c.l.b16 %v775_v63  ;;  %v894_v46 = vrot.slane %v1985_v51, 5  ;;  %v1146_v20 = vshrl.u32 %v1733_v12, 16  ;;  %v1149_v22 = vshll.u32 %v1733_v12, 16 }
  0x4b   : > { %v1095_v58 = vrot.slane %v1093_v40, 5 }
  0x4c   : > { %1662 = vmatmul.msk.bf16.gmra.mxu0 %vm337_vm2, %v802_v7  ;;  %v1666_v7 = vld [vmem:[%s1870_s27 + $0x10] sm:$0xe]  ;;  %v804_v16 = vpack.c.b16 %v800_v10, %v799_v9 }
  0x4d   : > { %v1674_v55 = vrot.slane %v1666_v7, 9  ;;  %v1675_v7 = vrot.slane %v1667_v35, 9  ;;  %v902_v35 = vrot.slane %v2013_v36, 5  ;;  %v1736_v36 = vld [vmem:[%s1870_s27 + $0x3c] sm:$0x1] }
  0x4e   : > { %1585 = vmatmul.msk.bf16.gmra.mxu1 %vm337_vm2, %v1574_v52  ;;  %v886_v52 = vrot.slane %v1952_v60, 5  ;;  %v1106_v60 = vrot.slane %v1104_v48, 4  ;;  %v898_v48 = vrot.slane %v1990_v57, 5 }
  0x4f   : > { %v891_v3 = vsel %vm1934_vm6, %v1674_v55, %v890_v53  ;;  %v1120_v53 = vrot.slane %v1118_v38, 4  ;;  %v895_v57 = vsel %vm1934_vm6, %v1675_v7, %v894_v46 }
  0x50   : > { %v887_v2 = vsel %vm1934_vm6, %v1673_v54, %v886_v52  ;;  %v1110_v11 = vor.u32 %v1109_v1, %v1106_v60  ;;  %v1298_v52 = vsel %vm1934_vm6, %v1759_v30, %v1297_v31  ;;  %v1309_v31 = vrot.slane %v1732_v59, 5 }
  0x51   : > { %1603 = vmatmul.msk.bf16.gmra.mxu2 %vm337_vm2, %v518_v56  ;;  %v1092_v56 = vrot.slane %v1090_v39, 4  ;;  %v919_v13 = vunpack.c.l.b16 %v887_v2  ;;  %v1121_v39 = vshll.u32 %v1729_v26, 16  ;;  %v1330_v51 = vunpack.c.l.b16 %v1298_v52 }
  0x52   : > { %v1111_v23 = vrot.slane %v1110_v11, 4  ;;  %v1141_v2 = vshll.u32 %v1732_v59, 16  ;;  %v1753_v11 = vld [vmem:[%s1870_s27 + $0x20] sm:$0xe] }
  0x53   : > { %v1096_v4 = vor.u32 %v1095_v58, %v1092_v56  ;;  %v1123_v54 = vrot.slane %v1121_v39, 5  ;;  %v1730_v56 = vld [vmem:[%s1870_s27 + $0x24] sm:$0x1]  ;;  %v1761_v19 = vrot.slane %v1753_v11, 9 }
  0x54   : > { %v1116_v40 = vsel %vm1894_vm3, %v1111_v23, %v1115_v25  ;;  %v1127_v1 = vshll.u32 %v1730_v56, 16  ;;  %v1305_v26 = vrot.slane %v1730_v56, 5 }
  0x55   : > { %v1097_v41 = vrot.slane %v1096_v4, 4  ;;  %v1205_v50 = vunpack.c.l.b16 %v1116_v40  ;;  %v1124_v60 = vor.u32 %v1123_v54, %v1120_v53  ;;  %v1148_v40 = vrot.slane %v1146_v20, 4 }
  0x56   : > { %v1129_v10 = vrot.slane %v1127_v1, 5  ;;  %v1306_v7 = vsel %vm1934_vm6, %v1761_v19, %v1305_v26  ;;  %v1756_v1 = vld [vmem:[%s1870_s27 + $0x38] sm:$0xe]  ;;  %v1317_v19 = vrot.slane %v1736_v36, 5  ;;  %v910_v26 = vrot.slane %v2047_v17, 5 }
  0x57   : > { %v1102_v29 = vsel %vm1894_vm3, %v1097_v41, %v1101_v15  ;;  %v1125_v9 = vrot.slane %v1124_v60, 4  ;;  %v1143_v41 = vrot.slane %v1141_v2, 5  ;;  %v1754_v15 = vld [vmem:[%s1870_s27 + $0x28] sm:$0xe]  ;;  %v1755_v60 = vld [vmem:[%s1870_s27 + $0x30] sm:$0xe] }
  0x58   : > { %1637 = vmatmul.msk.bf16.gmra.mxu3 %vm337_vm2, %v1626_v14  ;;  %v920_v14 = vunpack.c.l.b16 %v891_v3  ;;  %v1204_v45 = vunpack.c.l.b16 %v1102_v29  ;;  %v921_v3 = vunpack.c.l.b16 %v895_v57  ;;  %v1670_v29 = vld [vmem:[%s1870_s27 + $0x30] sm:$0xe]  ;;  %v1764_v12 = vrot.slane %v1756_v1, 9 }
  0x59   : > { %v1130_v25 = vsel %vm1894_vm3, %v1125_v9, %v1129_v10  ;;  %v1678_v39 = vrot.slane %v1670_v29, 9  ;;  %v1763_v10 = vrot.slane %v1755_v60, 9 }
  0x5a   : > { %v927_v27 = vpack.c.b16 %v920_v14, %v919_v13  ;;  %v1212_v63 = vpack.c.b16 %v1205_v50, %v1204_v45  ;;  %v1795_v13 = vld [vmem:[%s1870_s27 + $0x24] sm:$0xf0]  ;;  %v1734_v45 = vld [vmem:[%s1870_s27 + $0x34] sm:$0x1] }
  0x5b   : > { %v1708_v23 = vor.u32 %v1795_v13, %v1707_v5  ;;  %v1155_v53 = vshll.u32 %v1734_v45, 16  ;;  %v1313_v11 = vrot.slane %v1734_v45, 5 }
  0x5c   : > { %1663 = vmatmul.msk.bf16.gmra.mxu0 %vm337_vm2, %v803_v28  ;;  %v1731_v28 = vld [vmem:[%s1870_s27 + $0x28] sm:$0xf] }
  0x5d   : > { %v1132_v24 = vshrl.u32 %v1731_v28, 16  ;;  %v1135_v44 = vshll.u32 %v1731_v28, 16  ;;  %v1669_v28 = vld [vmem:[%s1870_s27 + $0x28] sm:$0xe] }
  0x5e   : > { %1586 = vmatmul.msk.bf16.gmra.mxu1 %vm337_vm2, %v1578_v37  ;;  %v1668_v37 = vld [vmem:[%s1870_s27 + $0x20] sm:$0xe]  ;;  %v1677_v38 = vrot.slane %v1669_v28, 9  ;;  %v914_v28 = vrot.slane %v2050_v18, 5 }
  0x5f   : > { %v1676_v47 = vrot.slane %v1668_v37, 9  ;;  %v1134_v58 = vrot.slane %v1132_v24, 4  ;;  %v1137_v8 = vrot.slane %v1135_v44, 5  ;;  %v906_v37 = vrot.slane %v2020_v21, 5 }
  0x60   : > { %v1206_v24 = vunpack.c.l.b16 %v1130_v25  ;;  %v903_v21 = vsel %vm1934_vm6, %v1677_v38, %v902_v35  ;;  %v1738_v35 = vld [vmem:[%s1870_s27 + $0x44] sm:$0x1] }
  0x61   : > { %1604 = vmatmul.msk.bf16.gmra.mxu2 %vm337_vm2, %v519_v43  ;;  %v1301_v43 = vrot.slane %v1728_v61, 5  ;;  %v899_v62 = vsel %vm1934_vm6, %v1676_v47, %v898_v48  ;;  %v1138_v61 = vor.u32 %v1137_v8, %v1134_v58  ;;  %v907_v50 = vsel %vm1934_vm6, %v1678_v39, %v906_v37  ;;  %v1740_v39 = vld [vmem:[%s1870_s27 + $0x4c] sm:$0x1] }
  0x62   : > { %v922_v4 = vunpack.c.l.b16 %v899_v62  ;;  %v1169_v8 = vshll.u32 %v1736_v36, 16  ;;  %v923_v59 = vunpack.c.l.b16 %v903_v21  ;;  %v1157_v62 = vrot.slane %v1155_v53, 5 }
  0x63   : > { %v1302_v55 = vsel %vm1934_vm6, %v1760_v33, %v1301_v43  ;;  %v1139_v14 = vrot.slane %v1138_v61, 4  ;;  %v1160_v33 = vshrl.u32 %v1735_v49, 16  ;;  %v1151_v43 = vrot.slane %v1149_v22, 5  ;;  %v1796_v61 = vld [vmem:[%s1870_s27 + $0x34] sm:$0xf0] }
  0x64   : > { %v1331_v0 = vunpack.c.l.b16 %v1302_v55  ;;  %v1332_v55 = vunpack.c.l.b16 %v1306_v7  ;;  %v1183_v45 = vshll.u32 %v1738_v35, 16  ;;  %v1325_v1 = vrot.slane %v1740_v39, 5 }
  0x65   : > { %v1144_v30 = vsel %vm1894_vm3, %v1139_v14, %v1143_v41  ;;  %v1162_v47 = vrot.slane %v1160_v33, 4  ;;  %v1152_v52 = vor.u32 %v1151_v43, %v1148_v40  ;;  %v1671_v14 = vld [vmem:[%s1870_s27 + $0x38] sm:$0xe]  ;;  %v1672_v41 = vld [vmem:[%s1870_s27 + $0x40] sm:$0xe] }
  0x66   : > { %v1207_v44 = vunpack.c.l.b16 %v1144_v30  ;;  %v1679_v25 = vrot.slane %v1671_v14, 9  ;;  %v1314_v30 = vsel %vm1934_vm6, %v1763_v10, %v1313_v11 }
  0x67   : > { %v1153_v57 = vrot.slane %v1152_v52, 4  ;;  %v1334_v40 = vunpack.c.l.b16 %v1314_v30 }
  0x68   : > { %1638 = vmatmul.msk.bf16.gmra.mxu3 %vm337_vm2, %v1630_v6  ;;  %v1338_v6 = vpack.c.b16 %v1331_v0, %v1330_v51  ;;  %v1213_v54 = vpack.c.b16 %v1207_v44, %v1206_v24  ;;  %v924_v51 = vunpack.c.l.b16 %v907_v50  ;;  %v1711_v0 = vld [vmem:[%s1870_s27 + $0x30] sm:$0xf]  ;;  %v911_v17 = vsel %vm1934_vm6, %v1679_v25, %v910_v26 }
  0x69   : > { %v1158_v9 = vsel %vm1894_vm3, %v1153_v57, %v1157_v62  ;;  %v1712_v13 = vor.u32 %v1796_v61, %v1711_v0  ;;  %v1185_v50 = vrot.slane %v1183_v45, 5  ;;  %v1321_v62 = vrot.slane %v1738_v35, 5 }
  0x6a   : > { %v929_v5 = vpack.c.b16 %v924_v51, %v923_v59 }
  0x6c   : > { %1664 = vmatmul.msk.bf16.gmra.mxu0 %vm337_vm2, %v804_v16  ;;  %v928_v16 = vpack.c.b16 %v922_v4, %v921_v3  ;;  %v1171_v3 = vrot.slane %v1169_v8, 5  ;;  %v1737_v4 = vld [vmem:[%s1870_s27 + $0x40] sm:$0xf]  ;;  %v1758_v8 = vld [vmem:[%s1870_s27 + $0x48] sm:$0xe] }
  0x6d   : > { %v1766_v60 = vrot.slane %v1758_v8, 9 }
  0x6e   : > { %1687 = vmatmul.msk.bf16.vlgmr.msra.gmra.mxu1 %vm337_vm2, %v927_v27  ;;  %v1762_v27 = vrot.slane %v1754_v15, 9  ;;  %v1174_v15 = vshrl.u32 %v1737_v4, 16 }
  0x70   : > { %v1310_v46 = vsel %vm1934_vm6, %v1762_v27, %v1309_v31  ;;  %v1680_v27 = vrot.slane %v1672_v41, 9  ;;  %v1176_v31 = vrot.slane %v1174_v15, 4 }
  0x71   : > { %1721 = vmatmul.msk.bf16.vlgmr.msra.gmra.mxu2 %vm337_vm2, %v1704_v34  ;;  %v1163_v34 = vshll.u32 %v1735_v49, 16  ;;  %v1333_v56 = vunpack.c.l.b16 %v1310_v46  ;;  %v1197_v46 = vshll.u32 %v1740_v39, 16 }
  0x72   : > { %v915_v18 = vsel %vm1934_vm6, %v1680_v27, %v914_v28 }
  0x73   : > { %v1165_v48 = vrot.slane %v1163_v34, 5  ;;  %v1318_v34 = vsel %vm1934_vm6, %v1764_v12, %v1317_v19  ;;  %v1199_v53 = vrot.slane %v1197_v46, 5 }
  0x74   : > { %v1335_v24 = vunpack.c.l.b16 %v1318_v34 }
  0x75   : > { %v1166_v58 = vor.u32 %v1165_v48, %v1162_v47  ;;  %v925_v47 = vunpack.c.l.b16 %v911_v17  ;;  %v926_v48 = vunpack.c.l.b16 %v915_v18 }
  0x76   : > { %v1340_v36 = vpack.c.b16 %v1335_v24, %v1334_v40 }
  0x77   : > { %v1167_v2 = vrot.slane %v1166_v58, 4  ;;  %v1797_v58 = vld [vmem:[%s1870_s27 + $0x44] sm:$0xf0] }
  0x78   : > { %1747 = vmatmul.msk.bf16.vlgmr.msra.gmra.mxu3 %vm337_vm2, %v1212_v63  ;;  %v1339_v63 = vpack.c.b16 %v1333_v56, %v1332_v55  ;;  %v930_v55 = vpack.c.b16 %v926_v48, %v925_v47  ;;  %v1715_v56 = vld [vmem:[%s1870_s27 + $0x40] sm:$0xf] }
  0x79   : > { %v1172_v49 = vsel %vm1894_vm3, %v1167_v2, %v1171_v3 }
  0x7a   : > { %v1209_v29 = vunpack.c.l.b16 %v1172_v49 }
  0x7c   : > { %1773 = vmatmul.msk.bf16.vlgmr.msra.gmra.mxu0 %vm337_vm2, %v1338_v6  ;;  %v1739_v6 = vld [vmem:[%s1870_s27 + $0x48] sm:$0xf] }
  0x7d   : > { %v1188_v20 = vshrl.u32 %v1739_v6, 16  ;;  %v1191_v22 = vshll.u32 %v1739_v6, 16 }
  0x7e   : > { %1688 = vmatmul.msk.bf16.gmra.mxu1 %vm337_vm2, %v928_v16  ;;  %v1177_v16 = vshll.u32 %v1737_v4, 16  ;;  %v1326_v4 = vsel %vm1934_vm6, %v1766_v60, %v1325_v1 }
  0x7f   : > { %v1190_v37 = vrot.slane %v1188_v20, 4  ;;  %v1193_v38 = vrot.slane %v1191_v22, 5  ;;  %v1337_v32 = vunpack.c.l.b16 %v1326_v4 }
  0x80   : > { %v1179_v33 = vrot.slane %v1177_v16, 5 }
  0x81   : > { %1722 = vmatmul.msk.bf16.gmra.mxu2 %vm337_vm2, %v1708_v23  ;;  %v1208_v23 = vunpack.c.l.b16 %v1158_v9  ;;  %v1194_v7 = vor.u32 %v1193_v38, %v1190_v37 }
  0x82   : > { %v1180_v44 = vor.u32 %v1179_v33, %v1176_v31 }
  0x83   : > { %v1214_v43 = vpack.c.b16 %v1209_v29, %v1208_v23  ;;  %v1195_v52 = vrot.slane %v1194_v7, 4 }
  0x84   : > { %v1181_v21 = vrot.slane %v1180_v44, 4 }
  0x85   : > { %v1200_v0 = vsel %vm1894_vm3, %v1195_v52, %v1199_v53 }
  0x86   : > { %v1186_v51 = vsel %vm1894_vm3, %v1181_v21, %v1185_v50  ;;  %v1211_v2 = vunpack.c.l.b16 %v1200_v0 }
  0x87   : > { %v1210_v61 = vunpack.c.l.b16 %v1186_v51 }
  0x88   : > { %1748 = vmatmul.msk.bf16.gmra.mxu3 %vm337_vm2, %v1213_v54  ;;  %v1757_v54 = vld [vmem:[%s1870_s27 + $0x40] sm:$0xe] }
  0x89   : > { %v1765_v57 = vrot.slane %v1757_v54, 9  ;;  %v1215_v6 = vpack.c.b16 %v1211_v2, %v1210_v61 }
  0x8b   : > { %v1322_v3 = vsel %vm1934_vm6, %v1765_v57, %v1321_v62 }
  0x8c   : > { %1774 = vmatmul.msk.bf16.gmra.mxu0 %vm337_vm2, %v1339_v63  ;;  %v1716_v63 = vor.u32 %v1797_v58, %v1715_v56  ;;  %v1336_v9 = vunpack.c.l.b16 %v1322_v3 }
  0x8e   : > { %1689 = vmatmul.msk.bf16.gmra.mxu1 %vm337_vm2, %v929_v5  ;;  %v1341_v11 = vpack.c.b16 %v1337_v32, %v1336_v9 }
  0x91   : > { %1723 = vmatmul.msk.bf16.gmra.mxu2 %vm337_vm2, %v1712_v13 }
  0x98   : > { %1749 = vmatmul.msk.bf16.gmra.mxu3 %vm337_vm2, %v1214_v43 }
  0x9b   : > { %v2167_v59 = vpop.f32.mrf.mxu1 }
  0x9c   : > { %1775 = vmatmul.msk.bf16.gmra.mxu0 %vm337_vm2, %v1340_v36 }
  0x9e   : > { %1690 = vmatmul.msk.bf16.gmra.mxu1 %vm337_vm2, %v930_v55 }
  0xa1   : > { %1724 = vmatmul.msk.bf16.gmra.mxu2 %vm337_vm2, %v1716_v63 }
  0xa3   : > { %v2180_v5 = vpop.f32.mrf.mxu1 }
  0xa4   : > { %v2182_v10 = vpop.f32.mrf.mxu2 }
  0xa8   : > { %1750 = vmatmul.msk.bf16.gmra.mxu3 %vm337_vm2, %v1215_v6 }
  0xa9   : > { %v359_v12 = vpop.f32.mrf.mxu0 }
  0xab   : > { %v2185_v13 = vpop.f32.mrf.mxu3  ;;  %v426_v14 = vpop.f32.mrf.mxu1 }
  0xac   : > { %1776 = vmatmul.msk.bf16.gmra.mxu0 %vm337_vm2, %v1341_v11  ;;  %v2188_v41 = vpop.f32.mrf.mxu2  ;;  %v427_v46 = vadd.f32 %v426_v14, %v359_v12 }
  0xb1   : > { %v361_v42 = vpop.f32.mrf.mxu0 }
  0xb3   : > { %v2190_v15 = vpop.f32.mrf.mxu3  ;;  %v428_v16 = vpop.f32.mrf.mxu1 }
  0xb4   : > { %v547_v49 = vpop.f32.mrf.mxu2  ;;  %v429_v53 = vadd.f32 %v428_v16, %v361_v42 }
  0xb5   : > { %v567_v36 = vadd.f32 %v547_v49, %v427_v46 }
  0xb9   : > { %v832_v19 = vpop.f32.mrf.mxu0 }
  0xbb   : > { %v634_v20 = vpop.f32.mrf.mxu3  ;;  %v431_v22 = vpop.f32.mrf.mxu1 }
  0xbc   : > { %v549_v23 = vpop.f32.mrf.mxu2  ;;  %v654_v50 = vadd.f32 %v634_v20, %v567_v36  ;;  %v432_v0 = vadd.f32 %v431_v22, %v2167_v59 }
  0xbd   : > { %v568_v56 = vadd.f32 %v549_v23, %v429_v53 }
  0xbe   : > { %v852_v58 = vadd.f32 %v832_v19, %v654_v50 }
  0xc1   : > { %v834_v25 = vpop.f32.mrf.mxu0 }
  0xc3   : > { %v636_v26 = vpop.f32.mrf.mxu3  ;;  %v433_v27 = vpop.f32.mrf.mxu1 }
  0xc4   : > { %v552_v28 = vpop.f32.mrf.mxu2  ;;  %v655_v57 = vadd.f32 %v636_v26, %v568_v56  ;;  %v434_v11 = vadd.f32 %v433_v27, %v2180_v5 }
  0xc5   : > { %v569_v61 = vadd.f32 %v552_v28, %v432_v0 }
  0xc6   : > { %v853_v3 = vadd.f32 %v834_v25, %v655_v57 }
  0xc9   : > { %v837_v29 = vpop.f32.mrf.mxu0 }
  0xcb   : > { %v639_v30 = vpop.f32.mrf.mxu3  ;;  %v2192_v31 = vpop.f32.mrf.mxu1 }
  0xcc   : > { %v554_v33 = vpop.f32.mrf.mxu2  ;;  %v656_v32 = vadd.f32 %v639_v30, %v569_v61 }
  0xcd   : > { %v570_v14 = vadd.f32 %v554_v33, %v434_v11  ;;  %v437_v33 = vadd.f32 %v2192_v31, %v2182_v10 }
  0xce   : > { %v854_v19 = vadd.f32 %v837_v29, %v656_v32 }
  0xd1   : > { %v2194_v34 = vpop.f32.mrf.mxu0 }
  0xd3   : > { %v641_v35 = vpop.f32.mrf.mxu3  ;;  %v2196_v37 = vpop.f32.mrf.mxu1 }
  0xd4   : > { %v2198_v38 = vpop.f32.mrf.mxu2  ;;  %v657_v26 = vadd.f32 %v641_v35, %v570_v14 }
  0xd5   : > { %v571_v53 = vadd.f32 %v2198_v38, %v437_v33  ;;  %v439_v38 = vadd.f32 %v2196_v37, %v2188_v41 }
  0xd6   : > { %v855_v56 = vadd.f32 %v2194_v34, %v657_v26 }
  0xd9   : > { %v2200_v39 = vpop.f32.mrf.mxu0 }
  0xdb   : > { %v2202_v40 = vpop.f32.mrf.mxu3  ;;  %v2204_v17 = vpop.f32.mrf.mxu1 }
  0xdc   : > { %v2206_v18 = vpop.f32.mrf.mxu2 }
  0xe1   : > { %v2208_v43 = vpop.f32.mrf.mxu0 }
  0xe3   : > { %v2210_v24 = vpop.f32.mrf.mxu3  ;;  %v2212_v44 = vpop.f32.mrf.mxu1 }
  0xe4   : > { %v2214_v45 = vpop.f32.mrf.mxu2 }
  0xe9   : > { %v2216_v7 = vpop.f32.mrf.mxu0 }
  0xeb   : > { %v2218_v47 = vpop.f32.mrf.mxu3  ;;  %v958_v48 = vpop.f32.mrf.mxu1 }
  0xec   : > { %v2220_v21 = vpop.f32.mrf.mxu2  ;;  %v978_v51 = vadd.f32 %v958_v48, %v852_v58 }
  0xf1   : > { %v2222_v52 = vpop.f32.mrf.mxu0 }
  0xf3   : > { %v2224_v54 = vpop.f32.mrf.mxu3  ;;  %v960_v55 = vpop.f32.mrf.mxu1 }
  0xf4   : > { %v1045_v8 = vpop.f32.mrf.mxu2  ;;  %v979_v9 = vadd.f32 %v960_v55, %v853_v3 }
  0xf5   : > { %v1065_v62 = vadd.f32 %v1045_v8, %v978_v51 }
  0xf9   : > { %v1369_v63 = vpop.f32.mrf.mxu0 }
  0xfb   : > { %v1243_v60 = vpop.f32.mrf.mxu3  ;;  %v963_v1 = vpop.f32.mrf.mxu1 }
  0xfc   : > { %v1263_v2 = vadd.f32 %v1243_v60, %v1065_v62  ;;  %v1047_v4 = vpop.f32.mrf.mxu2  ;;  %v980_v25 = vadd.f32 %v963_v1, %v854_v19  ;;  %v658_v62 = vadd.f32 %v2202_v40, %v571_v53 }
  0xfd   : > { %v1066_v59 = vadd.f32 %v1047_v4, %v979_v9 }
  0xfe   : > { %v1389_v6 = vadd.f32 %v1369_v63, %v1263_v2  ;;  %v572_v2 = vadd.f32 %v2206_v18, %v439_v38  ;;  %v856_v40 = vadd.f32 %v2200_v39, %v658_v62  ;;  %v442_v18 = vadd.f32 %v2204_v17, %v2185_v13 }
 0x100   : > { %1397 = vst.msk [vmem:[%s2231_s14] sm:$0xff] %vm337_vm2, %v1389_v6  ;;  %v1428_v22 = vmul.f32 %v1389_v6, %v1389_v6  ;;  %v1405_v28 = vsel %vm337_vm2, %v1389_v6, 0.0 }
 0x101   : > { %v1371_v12 = vpop.f32.mrf.mxu0 }
 0x102   : > { %v1436_v29 = vsel %vm337_vm2, %v1428_v22, 0.0 }
 0x103   : > { %v1245_v42 = vpop.f32.mrf.mxu3  ;;  %v965_v16 = vpop.f32.mrf.mxu1 }
 0x104   : > { %v1264_v49 = vadd.f32 %v1245_v42, %v1066_v59  ;;  %v1050_v20 = vpop.f32.mrf.mxu2  ;;  %v981_v57 = vadd.f32 %v965_v16, %v855_v56  ;;  %v659_v59 = vadd.f32 %v2210_v24, %v572_v2 }
 0x105   : > { %v1067_v48 = vadd.f32 %v1050_v20, %v980_v25 }
 0x106   : > { %v1390_v23 = vadd.f32 %v1371_v12, %v1264_v49  ;;  %v573_v49 = vadd.f32 %v2214_v45, %v442_v18  ;;  %v857_v24 = vadd.f32 %v2208_v43, %v659_v59  ;;  %v444_v45 = vadd.f32 %v2212_v44, %v2190_v15 }
 0x108   : > { %1398 = vst.msk [vmem:[%s2231_s14 + $0x8] sm:$0xff] %vm337_vm2, %v1390_v23  ;;  %v1406_v30 = vsel %vm337_vm2, %v1390_v23, 0.0  ;;  %v1429_v46 = vmul.f32 %v1390_v23, %v1390_v23  ;;  %v660_v25 = vadd.f32 %v2218_v47, %v573_v49 }
 0x109   : > { %v1407_v5 = vadd.f32 %v1406_v30, %v1405_v28  ;;  %v1374_v27 = vpop.f32.mrf.mxu0 }
 0x10a   : > { %v1437_v36 = vsel %vm337_vm2, %v1429_v46, 0.0  ;;  %v858_v33 = vadd.f32 %v2216_v7, %v660_v25 }
 0x10b   : > { %v1438_v50 = vadd.f32 %v1437_v36, %v1436_v29  ;;  %v1248_v35 = vpop.f32.mrf.mxu3  ;;  %v968_v8 = vpop.f32.mrf.mxu1 }
 0x10c   : > { %v1265_v55 = vadd.f32 %v1248_v35, %v1067_v48  ;;  %v1052_v58 = vpop.f32.mrf.mxu2  ;;  %v982_v9 = vadd.f32 %v968_v8, %v856_v40 }
 0x10d   : > { %v1068_v63 = vadd.f32 %v1052_v58, %v981_v57 }
 0x10e   : > { %v1391_v51 = vadd.f32 %v1374_v27, %v1265_v55  ;;  %v574_v27 = vadd.f32 %v2220_v21, %v444_v45 }
 0x110   : > { %1399 = vst.msk [vmem:[%s2231_s14 + $0x10] sm:$0xff] %vm337_vm2, %v1391_v51  ;;  %v1408_v10 = vsel %vm337_vm2, %v1391_v51, 0.0  ;;  %v1430_v31 = vmul.f32 %v1391_v51, %v1391_v51  ;;  %v661_v35 = vadd.f32 %v2224_v54, %v574_v27 }
 0x111   : > { %v1409_v0 = vadd.f32 %v1408_v10, %v1407_v5  ;;  %v1376_v60 = vpop.f32.mrf.mxu0 }
 0x112   : > { %v1439_v34 = vsel %vm337_vm2, %v1430_v31, 0.0  ;;  %v859_v57 = vadd.f32 %v2222_v52, %v661_v35 }
 0x113   : > { %v1440_v1 = vadd.f32 %v1439_v34, %v1438_v50  ;;  %v1250_v61 = vpop.f32.mrf.mxu3  ;;  %v970_v32 = vpop.f32.mrf.mxu1 }
 0x114   : > { %v1266_v3 = vadd.f32 %v1250_v61, %v1068_v63  ;;  %v1055_v4 = vpop.f32.mrf.mxu2  ;;  %v983_v23 = vadd.f32 %v970_v32, %v857_v24 }
 0x115   : > { %v1069_v37 = vadd.f32 %v1055_v4, %v982_v9 }
 0x116   : > { %v1392_v6 = vadd.f32 %v1376_v60, %v1266_v3 }
 0x118   : > { %1400 = vst.msk [vmem:[%s2231_s14 + $0x18] sm:$0xff] %vm337_vm2, %v1392_v6  ;;  %v1410_v11 = vsel %vm337_vm2, %v1392_v6, 0.0  ;;  %v1431_v41 = vmul.f32 %v1392_v6, %v1392_v6 }
 0x119   : > { %v1411_v12 = vadd.f32 %v1410_v11, %v1409_v0  ;;  %v1379_v14 = vpop.f32.mrf.mxu0 }
 0x11a   : > { %v1441_v39 = vsel %vm337_vm2, %v1431_v41, 0.0 }
 0x11b   : > { %v1442_v42 = vadd.f32 %v1441_v39, %v1440_v1  ;;  %v1253_v16 = vpop.f32.mrf.mxu3  ;;  %v973_v17 = vpop.f32.mrf.mxu1 }
 0x11c   : > { %v1267_v19 = vadd.f32 %v1253_v16, %v1069_v37  ;;  %v1057_v20 = vpop.f32.mrf.mxu2  ;;  %v984_v50 = vadd.f32 %v973_v17, %v858_v33 }
 0x11d   : > { %v1070_v13 = vadd.f32 %v1057_v20, %v983_v23 }
 0x11e   : > { %v1393_v22 = vadd.f32 %v1379_v14, %v1267_v19 }
 0x120   : > { %1401 = vst.msk [vmem:[%s2231_s14 + $0x20] sm:$0xff] %vm337_vm2, %v1393_v22  ;;  %v1412_v26 = vsel %vm337_vm2, %v1393_v22, 0.0  ;;  %v1432_v28 = vmul.f32 %v1393_v22, %v1393_v22 }
 0x121   : > { %v1413_v30 = vadd.f32 %v1412_v26, %v1411_v12  ;;  %v1381_v46 = vpop.f32.mrf.mxu0 }
 0x122   : > { %v1443_v43 = vsel %vm337_vm2, %v1432_v28, 0.0 }
 0x123   : > { %v1444_v48 = vadd.f32 %v1443_v43, %v1442_v42  ;;  %v1255_v5 = vpop.f32.mrf.mxu3  ;;  %v975_v58 = vpop.f32.mrf.mxu1 }
 0x124   : > { %v1268_v47 = vadd.f32 %v1255_v5, %v1070_v13  ;;  %v1060_v29 = vpop.f32.mrf.mxu2  ;;  %v985_v10 = vadd.f32 %v975_v58, %v859_v57 }
 0x125   : > { %v1071_v44 = vadd.f32 %v1060_v29, %v984_v50 }
 0x126   : > { %v1394_v36 = vadd.f32 %v1381_v46, %v1268_v47 }
 0x128   : > { %1402 = vst.msk [vmem:[%s2231_s14 + $0x28] sm:$0xff] %vm337_vm2, %v1394_v36  ;;  %v1414_v53 = vsel %vm337_vm2, %v1394_v36, 0.0  ;;  %v1433_v15 = vmul.f32 %v1394_v36, %v1394_v36 }
 0x129   : > { %v1415_v55 = vadd.f32 %v1414_v53, %v1413_v30  ;;  %v1384_v8 = vpop.f32.mrf.mxu0 }
 0x12a   : > { %v1445_v56 = vsel %vm337_vm2, %v1433_v15, 0.0 }
 0x12b   : > { %v1446_v21 = vadd.f32 %v1445_v56, %v1444_v48  ;;  %v1258_v51 = vpop.f32.mrf.mxu3 }
 0x12c   : > { %v1269_v7 = vadd.f32 %v1258_v51, %v1071_v44  ;;  %v1062_v62 = vpop.f32.mrf.mxu2 }
 0x12d   : > { %v1072_v0 = vadd.f32 %v1062_v62, %v985_v10 }
 0x12e   : > { %v1395_v54 = vadd.f32 %v1384_v8, %v1269_v7 }
 0x130   : > { %1403 = vst.msk [vmem:[%s2231_s14 + $0x30] sm:$0xff] %vm337_vm2, %v1395_v54  ;;  %v1416_v31 = vsel %vm337_vm2, %v1395_v54, 0.0  ;;  %v1434_v63 = vmul.f32 %v1395_v54, %v1395_v54 }
 0x131   : > { %v1417_v60 = vadd.f32 %v1416_v31, %v1415_v55  ;;  %v1386_v2 = vpop.f32.mrf.mxu0 }
 0x132   : > { %v1447_v38 = vsel %vm337_vm2, %v1434_v63, 0.0 }
 0x133   : > { %v1448_v34 = vadd.f32 %v1447_v38, %v1446_v21  ;;  %v1260_v1 = vpop.f32.mrf.mxu3 }
 0x134   : > { %v1270_v61 = vadd.f32 %v1260_v1, %v1072_v0 }
 0x136   : > { %v1396_v3 = vadd.f32 %v1386_v2, %v1270_v61 }
 0x138   : > { %1404 = vst.msk [vmem:[%s2231_s14 + $0x38] sm:$0xff] %vm337_vm2, %v1396_v3  ;;  %v1418_v52 = vsel %vm337_vm2, %v1396_v3, 0.0  ;;  %v1435_v40 = vmul.f32 %v1396_v3, %v1396_v3 }
 0x139   : > { %v1419_v4 = vadd.f32 %v1418_v52, %v1417_v60 }
 0x13a   : > { %v1449_v6 = vsel %vm337_vm2, %v1435_v40, 0.0 }
 0x13b   : > { %v1420_v9 = vrot.slane %v1419_v4, 4  ;;  %v1450_v32 = vadd.f32 %v1449_v6, %v1448_v34 }
 0x13d   : > { %v1421_v59 = vadd.f32 %v1420_v9, %v1419_v4  ;;  %v1451_v11 = vrot.slane %v1450_v32, 4 }
 0x13f   : > { %v1422_v41 = vrot.slane %v1421_v59, 2  ;;  %v1452_v37 = vadd.f32 %v1451_v11, %v1450_v32 }
 0x141   : > { %v1423_v12 = vadd.f32 %v1422_v41, %v1421_v59  ;;  %v1453_v14 = vrot.slane %v1452_v37, 2 }
 0x143   : > { %v1424_v18 = vrot.slane %v1423_v12, 1  ;;  %v1454_v39 = vadd.f32 %v1453_v14, %v1452_v37 }
 0x145   : > { %v1425_v42 = vadd.f32 %v1424_v18, %v1423_v12  ;;  %v1455_v16 = vrot.slane %v1454_v39, 1 }
 0x147   : > { %1427 = vst.msk [vmem:[%s181_s18] sm:$0x1] %vm1426_vm7, %v1425_v42  ;;  %v1456_v49 = vadd.f32 %v1455_v16, %v1454_v39 }
 0x149   : > { %1457 = vst.msk [vmem:[%s181_s18 + $0x1] sm:$0x1] %vm1426_vm7, %v1456_v49 }
 0x14a PF: > { %s14_s12 = sadd.s32 1, %s1819_s12  }
 0x14b   : > { %p11_p4 = scmp.ge.s32.totalorder %s14_s12, 4  }
 0x14d   :  { %13 = sbr.rel (!%p11_p4) target bundleno = 1 (0x1), region = 80 }

// kernel: basic_block_forward.10
= control target key start
LH: loop header
LB: loop body
LE: loop exit
PB: predicated region body
PF: predicated region fallthrough
CT: control target
= control target key end

     0   :  { %7 = vsyncpa [#allocation3], 0  ;;  %s1181_s9 = smov 0   ;;  %s1512_s0 = inlined_call_operand.vmem [shape: f32[2,2,14,14], index: 0, kind: input, shape index: {}]   ;;  %s1513_s1 = inlined_call_operand.vmem [shape: f32[98], index: 1, kind: input, shape index: {}]   ;;  %s1514_s2 = inlined_call_operand.vmem [shape: f32[2,8,8], index: 2, kind: output, shape index: {}]  }
   0x1 LB: > { %s985_s10 = sadd.s32 4294967295, %s1157_s9   ;;  %p987_p0 = scmp.ge.s32.totalorder %s1157_s9, 1  ;;  %s1157_s9 = sphi %s1181_s9, %s13_s9  }
   0x2   : > { %p91_p1 = scmp.lt.s32.totalorder %s1157_s9, 3  ;;  %s103_s13 = sshll.u32 %s1513_s1, 4  ;;  %s104_s13 = int_to_ptr.vmem [resolvable:$true] %s103_s13 }
   0x3   : > { %p1111_p3 = scmp.eq.s32.totalorder %s985_s10, 0  ;;  %s1159_s14 = smov [#allocation2]  }
   0x4   : > { %p92_p2 = pnand %p987_p0, %p91_p1 }
   0x6   : > { %p1107_p4 = pneg %p92_p2  ;;  %124 = sbr.rel (%p92_p2) target bundleno = 389 (0x185), region = 28 }
   0x8   : > { %p1108_p5 = pnand %p1111_p3, %p1107_p4 }
   0xa   : > { %1110 = dma.vmem_to_smem (!%p1108_p5), %s104_s13, 16, %s1159_s14, [#allocation3]  }
   0xb   : > { %1152 = dma.done.wait (%p1111_p3), [#allocation3], 16  }
   0xc   : > { %1154 = vsyncadd (%p1111_p3), [#allocation3], 4294967280 }
   0xd   : > { %131 = sfence }
   0xe   : > { %p147_p6 = scmp.lt.s32.totalorder %s985_s10, 1  ;;  %s997_s15 = sld [smem:[#allocation2 + $0x1]]  ;;  %vm918_vm2 = vcmask 64512  }
   0xf   : > { %s999_s16 = sld [smem:[#allocation2 + $0x2]]  ;;  %s1160_s23 = smov 127  }
  0x10   : > { %s1516_s10 = smov (!%p147_p6, %s985_s10), 1  ;;  %s998_s17 = sld [smem:[#allocation2 + $0x32]] }
  0x11   : > { %s1102_s18 = sshll.u32 %s1516_s10, 5  ;;  %s1000_s19 = sld [smem:[#allocation2 + $0x33]] }
  0x12   : > { %s1198_s22 = scalar_lea.vmem %s1512_s0, %s1102_s18  ;;  %s1001_s24 = sld [smem:[#allocation2 + $0x3]] }
  0x13   : > { %v1201_v0 = vld [vmem:[%s1198_s22] sm:$0xff]  ;;  %s1161_s25 = smov 126   ;;  %v1208_v5 = vld [vmem:[%s1198_s22 + $0x10] sm:$0xff]  ;;  %s1003_s26 = sld [smem:[#allocation2 + $0x4]] }
  0x14   : > { %v168_v1 = vstv %s997_s15  ;;  %s1004_s27 = sld [smem:[#allocation2 + $0x35]]  ;;  %s1162_s3 = smov 125   ;;  %v1228_v24 = vld [vmem:[%s1198_s22 + $0x1] sm:$0xff]  ;;  %v1232_v26 = vld [vmem:[%s1198_s22 + $0x11] sm:$0xff] }
  0x15   : > { %v169_v2 = vmul.f32 %v168_v1, %v1201_v0  ;;  %v184_v3 = vstv %s999_s16  ;;  %s1002_s28 = sld [smem:[#allocation2 + $0x34]]  ;;  %s1163_s5 = smov 124   ;;  %v1258_v50 = vld [vmem:[%s1198_s22 + $0x2] sm:$0xff]  ;;  %v1262_v52 = vld [vmem:[%s1198_s22 + $0x12] sm:$0xff] }
  0x16   : > { %v185_v4 = vmul.f32 %v184_v3, %v1201_v0  ;;  %v176_v6 = vstv %s998_s17  ;;  %s1006_s29 = sld [smem:[#allocation2 + $0x36]]  ;;  %s1164_s11 = smov 123  }
  0x17   : > { %171 = vrot.lane.b32.xlu0 %v169_v2, %s1160_s23  ;;  %v192_v7 = vstv %s1000_s19  ;;  %v177_v8 = vmul.f32 %v1208_v5, %v176_v6  ;;  %s1007_s30 = sld [smem:[#allocation2 + $0x6]]  ;;  %s1165_s13 = smov 122  }
  0x18   : > { %187 = vrot.lane.b32.xlu1 %v185_v4, %s1161_s25  ;;  %v193_v9 = vmul.f32 %v1208_v5, %v192_v7  ;;  %v200_v10 = vstv %s1001_s24  ;;  %s1005_s4 = sld [smem:[#allocation2 + $0x5]] }
  0x19   : > { %v201_v11 = vmul.f32 %v200_v10, %v1201_v0  ;;  %v216_v12 = vstv %s1003_s26  ;;  %s1012_s6 = sld [smem:[#allocation2 + $0x8]] }
  0x1a   : > { %v224_v13 = vstv %s1004_s27  ;;  %v217_v15 = vmul.f32 %v216_v12, %v1201_v0  ;;  %s1013_s7 = sld [smem:[#allocation2 + $0x39]] }
  0x1b   : > { %203 = vrot.lane.b32.xlu2 %v201_v11, %s1162_s3  ;;  %v208_v14 = vstv %s1002_s28  ;;  %v225_v16 = vmul.f32 %v1208_v5, %v224_v13  ;;  %s1008_s8 = sld [smem:[#allocation2 + $0x37]] }
  0x1c   : > { %v209_v17 = vmul.f32 %v1208_v5, %v208_v14  ;;  %v240_v18 = vstv %s1006_s29  ;;  %s1015_s12 = sld [smem:[#allocation2 + $0x3a]]  ;;  %v1288_v14 = vld [vmem:[%s1198_s22 + $0x3] sm:$0xff] }
  0x1d   : > { %v248_v19 = vstv %s1007_s30  ;;  %v241_v21 = vmul.f32 %v1208_v5, %v240_v18  ;;  %s1016_s14 = sld [smem:[#allocation2 + $0xa]] }
  0x1e   : > { %v232_v20 = vstv %s1005_s4  ;;  %v249_v22 = vmul.f32 %v248_v19, %v1201_v0  ;;  %s1014_s15 = sld [smem:[#allocation2 + $0x9]] }
  0x1f   : > { %179 = vrot.lane.b32.xlu0 %v177_v8, %s1160_s23  ;;  %v233_v23 = vmul.f32 %v232_v20, %v1201_v0  ;;  %v274_v25 = vstv %s1012_s6  ;;  %s1018_s16 = sld [smem:[#allocation2 + $0xb]] }
  0x20   : > { %195 = vrot.lane.b32.xlu1 %v193_v9, %s1161_s25  ;;  %v282_v27 = vstv %s1013_s7  ;;  %v275_v29 = vmul.f32 %v274_v25, %v1228_v24  ;;  %s1019_s17 = sld [smem:[#allocation2 + $0x3c]] }
  0x21   : > { %v256_v28 = vstv %s1008_s8  ;;  %v283_v30 = vmul.f32 %v1232_v26, %v282_v27  ;;  %s1017_s18 = sld [smem:[#allocation2 + $0x3b]] }
  0x22   : > { %v257_v31 = vmul.f32 %v1208_v5, %v256_v28  ;;  %v298_v32 = vstv %s1015_s12  ;;  %s1021_s19 = sld [smem:[#allocation2 + $0x3d]] }
  0x23   : > { %211 = vrot.lane.b32.xlu2 %v209_v17, %s1162_s3  ;;  %v306_v33 = vstv %s1016_s14  ;;  %v299_v35 = vmul.f32 %v1232_v26, %v298_v32  ;;  %s1022_s20 = sld [smem:[#allocation2 + $0xd]] }
  0x24   : > { %v290_v34 = vstv %s1014_s15  ;;  %v307_v36 = vmul.f32 %v306_v33, %v1228_v24  ;;  %s1020_s21 = sld [smem:[#allocation2 + $0xc]] }
  0x25   : > { %v291_v37 = vmul.f32 %v290_v34, %v1228_v24  ;;  %v322_v38 = vstv %s1018_s16  ;;  %s1027_s24 = sld [smem:[#allocation2 + $0xf]] }
  0x26   : > { %v330_v39 = vstv %s1019_s17  ;;  %v323_v41 = vmul.f32 %v322_v38, %v1228_v24  ;;  %s1028_s26 = sld [smem:[#allocation2 + $0x40]] }
  0x27   : > { %219 = vrot.lane.b32.xlu0 %v217_v15, %s1163_s5  ;;  %v314_v40 = vstv %s1017_s18  ;;  %v331_v42 = vmul.f32 %v1232_v26, %v330_v39  ;;  %s1023_s27 = sld [smem:[#allocation2 + $0x3e]] }
  0x28   : > { %227 = vrot.lane.b32.xlu1 %v225_v16, %s1163_s5  ;;  %v315_v43 = vmul.f32 %v1232_v26, %v314_v40  ;;  %v346_v44 = vstv %s1021_s19  ;;  %s1030_s28 = sld [smem:[#allocation2 + $0x41]]  ;;  %v1292_v16 = vld [vmem:[%s1198_s22 + $0x13] sm:$0xff] }
  0x29   : > { %v354_v45 = vstv %s1022_s20  ;;  %v347_v47 = vmul.f32 %v1232_v26, %v346_v44  ;;  %s1031_s29 = sld [smem:[#allocation2 + $0x11]] }
  0x2a   : > { %v338_v46 = vstv %s1020_s21  ;;  %v355_v48 = vmul.f32 %v354_v45, %v1228_v24  ;;  %s1029_s30 = sld [smem:[#allocation2 + $0x10]] }
  0x2b   : > { %235 = vrot.lane.b32.xlu2 %v233_v23, %s1164_s11  ;;  %v339_v49 = vmul.f32 %v338_v46, %v1228_v24  ;;  %v380_v51 = vstv %s1027_s24  ;;  %s1033_s4 = sld [smem:[#allocation2 + $0x12]] }
  0x2c   : > { %v388_v53 = vstv %s1028_s26  ;;  %v381_v55 = vmul.f32 %v380_v51, %v1258_v50  ;;  %s1034_s6 = sld [smem:[#allocation2 + $0x43]] }
  0x2d   : > { %v362_v54 = vstv %s1023_s27  ;;  %v389_v56 = vmul.f32 %v1262_v52, %v388_v53  ;;  %s1032_s7 = sld [smem:[#allocation2 + $0x42]]  ;;  %v1326_v53 = vld [vmem:[%s1198_s22 + $0x4] sm:$0xff] }
  0x2e   : > { %v363_v57 = vmul.f32 %v1232_v26, %v362_v54  ;;  %v404_v58 = vstv %s1030_s28  ;;  %s1036_s8 = sld [smem:[#allocation2 + $0x44]] }
  0x2f   : > { %243 = vrot.lane.b32.xlu0 %v241_v21, %s1164_s11  ;;  %v412_v59 = vstv %s1031_s29  ;;  %v405_v61 = vmul.f32 %v1262_v52, %v404_v58  ;;  %s1037_s12 = sld [smem:[#allocation2 + $0x14]] }
  0x30   : > { %251 = vrot.lane.b32.xlu1 %v249_v22, %s1165_s13  ;;  %v396_v60 = vstv %s1029_s30  ;;  %v413_v62 = vmul.f32 %v412_v59, %v1258_v50  ;;  %s1035_s14 = sld [smem:[#allocation2 + $0x13]] }
  0x31   : > { %v397_v63 = vmul.f32 %v396_v60, %v1258_v50  ;;  %v428_v1 = vstv %s1033_s4  ;;  %s1042_s15 = sld [smem:[#allocation2 + $0x16]] }
  0x32   : > { %v436_v2 = vstv %s1034_s6  ;;  %v429_v4 = vmul.f32 %v428_v1, %v1258_v50  ;;  %s1043_s16 = sld [smem:[#allocation2 + $0x47]] }
  0x33   : > { %259 = vrot.lane.b32.xlu2 %v257_v31, %s1165_s13  ;;  %v420_v3 = vstv %s1032_s7  ;;  %v437_v6 = vmul.f32 %v1262_v52, %v436_v2  ;;  %s1038_s17 = sld [smem:[#allocation2 + $0x45]] }
  0x34   : > { %v421_v7 = vmul.f32 %v1262_v52, %v420_v3  ;;  %v452_v8 = vstv %s1036_s8  ;;  %s1045_s18 = sld [smem:[#allocation2 + $0x48]] }
  0x35   : > { %v460_v9 = vstv %s1037_s12  ;;  %v453_v11 = vmul.f32 %v1262_v52, %v452_v8  ;;  %s1046_s19 = sld [smem:[#allocation2 + $0x18]] }
  0x36   : > { %v444_v10 = vstv %s1035_s14  ;;  %v461_v12 = vmul.f32 %v460_v9, %v1258_v50  ;;  %s1044_s20 = sld [smem:[#allocation2 + $0x17]] }
  0x37   : > { %277 = vrot.lane.b32.xlu0 %v275_v29, %s1160_s23  ;;  %v445_v13 = vmul.f32 %v444_v10, %v1258_v50  ;;  %v486_v15 = vstv %s1042_s15  ;;  %s1048_s21 = sld [smem:[#allocation2 + $0x19]] }
  0x38   : > { %285 = vrot.lane.b32.xlu1 %v283_v30, %s1160_s23  ;;  %v494_v17 = vstv %s1043_s16  ;;  %v487_v19 = vmul.f32 %v486_v15, %v1288_v14  ;;  %s1049_s24 = sld [smem:[#allocation2 + $0x4a]] }
  0x39   : > { %v468_v18 = vstv %s1038_s17  ;;  %v495_v20 = vmul.f32 %v1292_v16, %v494_v17  ;;  %s1047_s26 = sld [smem:[#allocation2 + $0x49]] }
  0x3a   : > { %v469_v21 = vmul.f32 %v1262_v52, %v468_v18  ;;  %v510_v22 = vstv %s1045_s18  ;;  %s156_s27 = sld [smem:[#allocation2]] }
  0x3b   : > { %293 = vrot.lane.b32.xlu2 %v291_v37, %s1161_s25  ;;  %v518_v23 = vstv %s1046_s19  ;;  %v511_v28 = vmul.f32 %v1292_v16, %v510_v22  ;;  %s995_s28 = sld [smem:[#allocation2 + $0x31]] }
  0x3c   : > { %v502_v25 = vstv %s1044_s20  ;;  %v519_v29 = vmul.f32 %v518_v23, %v1288_v14  ;;  %s1051_s29 = sld [smem:[#allocation2 + $0x4b]] }
  0x3d   : > { %v503_v30 = vmul.f32 %v502_v25, %v1288_v14  ;;  %v534_v31 = vstv %s1048_s21  ;;  %s1052_s30 = sld [smem:[#allocation2 + $0x1b]] }
  0x3e   : > { %v542_v32 = vstv %s1049_s24  ;;  %s1050_s4 = sld [smem:[#allocation2 + $0x1a]] }
  0x3f   : > { %301 = vrot.lane.b32.xlu0 %v299_v35, %s1161_s25  ;;  %v526_v33 = vstv %s1047_s26  ;;  %v535_v35 = vmul.f32 %v534_v31, %v1288_v14  ;;  %s1312_s6 = sld [smem:[#allocation2 + $0x1d]] }
  0x40   : > { %309 = vrot.lane.b32.xlu1 %v307_v36, %s1162_s3  ;;  %v543_v36 = vmul.f32 %v1292_v16, %v542_v32  ;;  %v527_v37 = vmul.f32 %v1292_v16, %v526_v33  ;;  %v158_v38 = vstv %s156_s27  ;;  %s1058_s7 = sld [smem:[#allocation2 + $0x4e]] }
  0x41   : > { %v164_v39 = vstv %s995_s28  ;;  %s1053_s8 = sld [smem:[#allocation2 + $0x4c]] }
  0x42   : > { %v165_v40 = vmul.f32 %v1208_v5, %v164_v39  ;;  %s1322_s12 = sld [smem:[#allocation2 + $0x4f]] }
  0x43   : > { %317 = vrot.lane.b32.xlu2 %v315_v43, %s1162_s3  ;;  %v566_v44 = vstv %s1052_s30  ;;  %s1329_s14 = sld [smem:[#allocation2 + $0x1f]] }
  0x44   : > { %v550_v45 = vstv %s1050_s4  ;;  %v567_v5 = vmul.f32 %v566_v44, %v1288_v14  ;;  %s1059_s15 = sld [smem:[#allocation2 + $0x1e]] }
  0x45   : > { %v592_v54 = vstv %s1312_s6  ;;  %s1338_s16 = sld [smem:[#allocation2 + $0x7]] }
  0x46   : > { %s1341_s17 = sld [smem:[#allocation2 + $0x20]] }
  0x47   : > { %325 = vrot.lane.b32.xlu0 %v323_v41, %s1163_s5  ;;  %v159_v41 = vmul.f32 %v158_v38, %v1201_v0  ;;  %v551_v0 = vmul.f32 %v550_v45, %v1288_v14  ;;  %v574_v58 = vstv %s1053_s8  ;;  %s1346_s18 = sld [smem:[#allocation2 + $0x51]] }
  0x48   : > { %333 = vrot.lane.b32.xlu1 %v331_v42, %s1163_s5  ;;  %v558_v42 = vstv %s1051_s29  ;;  %v575_v2 = vmul.f32 %v1292_v16, %v574_v58  ;;  %s1062_s19 = sld [smem:[#allocation2 + $0x50]] }
  0x49   : > { %v624_v8 = vstv %s1329_s14  ;;  %s1010_s20 = sld [smem:[#allocation2 + $0x38]] }
  0x4a   : > { %v608_v9 = vstv %s1059_s15  ;;  %v625_v17 = vmul.f32 %v624_v8, %v1326_v53  ;;  %s1354_s21 = sld [smem:[#allocation2 + $0x52]] }
  0x4b   : > { %341 = vrot.lane.b32.xlu2 %v339_v49, %s1164_s11  ;;  %v166_v49 = vadd.f32 %v165_v40, %v159_v41  ;;  %v609_v18 = vmul.f32 %v608_v9, %v1326_v53  ;;  %s1358_s24 = sld [smem:[#allocation2 + $0x22]]  ;;  %v265_v23 = vstv %s1338_s16 }
  0x4c   : > { %s1065_s26 = sld [smem:[#allocation2 + $0x21]] }
  0x4d   : > { %v648_v25 = vstv %s1346_s18  ;;  %s1369_s27 = sld [smem:[#allocation2 + $0x24]] }
  0x4e   : > { %s1373_s28 = sld [smem:[#allocation2 + $0x55]] }
  0x4f   : > { %349 = vrot.lane.b32.xlu0 %v347_v47, %s1164_s11  ;;  %v270_v31 = vstv %s1010_s20  ;;  %s1068_s29 = sld [smem:[#allocation2 + $0x53]] }
  0x50   : > { %357 = vrot.lane.b32.xlu1 %v355_v48, %s1165_s13  ;;  %v559_v48 = vmul.f32 %v1292_v16, %v558_v42  ;;  %v664_v40 = vstv %s1354_s21  ;;  %s1381_s30 = sld [smem:[#allocation2 + $0x56]] }
  0x51   : > { %v672_v41 = vstv %s1358_s24  ;;  %s1388_s4 = sld [smem:[#allocation2 + $0x26]] }
  0x52   : > { %v656_v42 = vstv %s1065_s26  ;;  %s1074_s6 = sld [smem:[#allocation2 + $0x25]] }
  0x53   : > { %365 = vrot.lane.b32.xlu2 %v363_v57, %s1165_s13  ;;  %v600_v57 = vstv %s1058_s7  ;;  %s1398_s7 = sld [smem:[#allocation2 + $0xe]] }
  0x54   : > { %s1401_s8 = sld [smem:[#allocation2 + $0x27]] }
  0x55   : > { %v680_v58 = vstv %s1068_s29  ;;  %s1077_s14 = sld [smem:[#allocation2 + $0x57]] }
  0x56   : > { %s1025_s15 = sld [smem:[#allocation2 + $0x3f]] }
  0x57   : > { %383 = vrot.lane.b32.xlu0 %v381_v55, %s1160_s23  ;;  %s1413_s16 = sld [smem:[#allocation2 + $0x59]] }
  0x58   : > { %391 = vrot.lane.b32.xlu1 %v389_v56, %s1160_s23  ;;  %v1333_v56 = vld [vmem:[%s1198_s22 + $0x14] sm:$0xff]  ;;  %v714_v8 = vstv %s1074_s6  ;;  %s1080_s18 = sld [smem:[#allocation2 + $0x28]] }
  0x59   : > { %v601_v1 = vmul.f32 %v1333_v56, %v600_v57  ;;  %v665_v45 = vmul.f32 %v1333_v56, %v664_v40  ;;  %v706_v57 = vstv %s1373_s28  ;;  %s1432_s20 = sld [smem:[#allocation2 + $0x5c]] }
  0x5a   : > { %s1083_s21 = sld [smem:[#allocation2 + $0x5a]] }
  0x5b   : > { %399 = vrot.lane.b32.xlu2 %v397_v63, %s1161_s25  ;;  %s1440_s24 = sld [smem:[#allocation2 + $0x5d]] }
  0x5c   : > { %s1447_s26 = sld [smem:[#allocation2 + $0x2d]] }
  0x5d   : > { %s1457_s28 = sld [smem:[#allocation2 + $0x15]] }
  0x5e   : > { %v762_v40 = vstv %s1080_s18  ;;  %s1464_s29 = sld [smem:[#allocation2 + $0x5f]] }
  0x5f   : > { %407 = vrot.lane.b32.xlu0 %v405_v61, %s1161_s25  ;;  %s1476_s6 = sld [smem:[#allocation2 + $0x30]] }
  0x60   : > { %415 = vrot.lane.b32.xlu1 %v413_v62, %s1162_s3  ;;  %v593_v62 = vmul.f32 %v592_v54, %v1326_v53 }
  0x63   : > { %423 = vrot.lane.b32.xlu2 %v421_v7, %s1162_s3 }
  0x67   : > { %431 = vrot.lane.b32.xlu0 %v429_v4, %s1163_s5 }
  0x68   : > { %439 = vrot.lane.b32.xlu1 %v437_v6, %s1163_s5  ;;  %v616_v6 = vstv %s1322_s12  ;;  %s1405_s12 = sld [smem:[#allocation2 + $0x58]] }
  0x6b   : > { %447 = vrot.lane.b32.xlu2 %v445_v13, %s1164_s11  ;;  %v617_v13 = vmul.f32 %v1333_v56, %v616_v6 }
  0x6f   : > { %455 = vrot.lane.b32.xlu0 %v453_v11, %s1164_s11 }
  0x70   : > { %463 = vrot.lane.b32.xlu1 %v461_v12, %s1165_s13 }
  0x73   : > { %471 = vrot.lane.b32.xlu2 %v469_v21, %s1165_s13  ;;  %v640_v21 = vstv %s1341_s17  ;;  %s1417_s17 = sld [smem:[#allocation2 + $0x29]] }
  0x74   : > { %v641_v32 = vmul.f32 %v640_v21, %v1326_v53  ;;  %v371_v21 = vstv %s1398_s7  ;;  %s1095_s7 = sld [smem:[#allocation2 + $0x2f]] }
  0x75   : > { %v1300_v27 = vpop.permute.xlu2 %203 }
  0x77   : > { %489 = vrot.lane.b32.xlu0 %v487_v19, %s1160_s23 }
  0x78   : > { %497 = vrot.lane.b32.xlu1 %v495_v20, %s1160_s23 }
  0x7b   : > { %505 = vrot.lane.b32.xlu2 %v503_v30, %s1161_s25 }
  0x7d   : > { %v212_v34 = vpop.permute.xlu2 %211 }
  0x7f   : > { %513 = vrot.lane.b32.xlu0 %v511_v28, %s1161_s25 }
  0x80   : > { %521 = vrot.lane.b32.xlu1 %v519_v29, %s1162_s3 }
  0x83   : > { %529 = vrot.lane.b32.xlu2 %v527_v37, %s1162_s3  ;;  %v271_v37 = vmul.f32 %v1232_v26, %v270_v31 }
  0x85   : > { %v236_v47 = vpop.permute.xlu2 %235 }
  0x87   : > { %537 = vrot.lane.b32.xlu0 %v535_v35, %s1163_s5  ;;  %v649_v35 = vmul.f32 %v1333_v56, %v648_v25 }
  0x88   : > { %545 = vrot.lane.b32.xlu1 %v543_v36, %s1163_s5 }
  0x89   : > { %v172_v43 = vpop.permute.xlu0 %171 }
  0x8a   : > { %v188_v46 = vpop.permute.xlu1 %187  ;;  %v174_v51 = vadd.f32 %v172_v43, %v166_v49 }
  0x8b   : > { %553 = vrot.lane.b32.xlu2 %v551_v0, %s1164_s11  ;;  %v1385_v0 = vld [vmem:[%s1198_s22 + $0x5] sm:$0xff] }
  0x8d   : > { %v260_v61 = vpop.permute.xlu2 %259 }
  0x8f   : > { %561 = vrot.lane.b32.xlu0 %v559_v48, %s1164_s11  ;;  %v657_v48 = vmul.f32 %v656_v42, %v1326_v53 }
  0x90   : > { %569 = vrot.lane.b32.xlu1 %v567_v5, %s1165_s13 }
  0x91   : > { %v180_v55 = vpop.permute.xlu0 %179 }
  0x92   : > { %v182_v59 = vadd.f32 %v180_v55, %v174_v51  ;;  %v196_v60 = vpop.permute.xlu1 %195  ;;  %v698_v51 = vstv %s1369_s27  ;;  %v1392_v55 = vld [vmem:[%s1198_s22 + $0x15] sm:$0xff]  ;;  %s1089_s27 = sld [smem:[#allocation2 + $0x2c]] }
  0x93   : > { %577 = vrot.lane.b32.xlu2 %v575_v2, %s1165_s13  ;;  %v681_v2 = vmul.f32 %v1333_v56, %v680_v58 }
  0x94   : > { %v190_v63 = vadd.f32 %v188_v46, %v182_v59 }
  0x95   : > { %v294_v12 = vpop.permute.xlu2 %293 }
  0x96   : > { %v198_v3 = vadd.f32 %v196_v60, %v190_v63 }
  0x97   : > { %595 = vrot.lane.b32.xlu0 %v593_v62, %s1160_s23  ;;  %v699_v62 = vmul.f32 %v698_v51, %v1385_v0  ;;  %v812_v51 = vstv %s1432_s20 }
  0x98   : > { %v206_v4 = vadd.f32 %v1300_v27, %v198_v3  ;;  %603 = vrot.lane.b32.xlu1 %v601_v1, %s1160_s23  ;;  %v632_v27 = vstv %s1062_s19  ;;  %v707_v1 = vmul.f32 %v1392_v55, %v706_v57  ;;  %s1428_s19 = sld [smem:[#allocation2 + $0x2b]] }
  0x99   : > { %v220_v7 = vpop.permute.xlu0 %219  ;;  %v633_v36 = vmul.f32 %v1333_v56, %v632_v27 }
  0x9a   : > { %v214_v10 = vadd.f32 %v212_v34, %v206_v4  ;;  %v228_v11 = vpop.permute.xlu1 %227  ;;  %v266_v34 = vmul.f32 %v265_v23, %v1228_v24  ;;  %v722_v4 = vstv %s1381_s30  ;;  %v738_v23 = vstv %s1077_s14  ;;  %s1092_s30 = sld [smem:[#allocation2 + $0x5e]]  ;;  %s994_s14 = sshll.u32 %s1516_s10, 3 }
  0x9b   : > { %611 = vrot.lane.b32.xlu2 %v609_v18, %s1161_s25 }
  0x9c   : > { %v222_v15 = vadd.f32 %v220_v7, %v214_v10  ;;  %v730_v7 = vstv %s1388_s4  ;;  %s1040_s4 = sld [smem:[#allocation2 + $0x46]] }
  0x9d   : > { %v318_v30 = vpop.permute.xlu2 %317 }
  0x9e   : > { %v230_v19 = vadd.f32 %v228_v11, %v222_v15  ;;  %v731_v15 = vmul.f32 %v730_v7, %v1385_v0 }
  0x9f   : > { %619 = vrot.lane.b32.xlu0 %v617_v13, %s1161_s25 }
  0xa0   : > { %v238_v20 = vadd.f32 %v236_v47, %v230_v19  ;;  %627 = vrot.lane.b32.xlu1 %v625_v17, %s1162_s3  ;;  %v673_v47 = vmul.f32 %v672_v41, %v1326_v53  ;;  %v715_v17 = vmul.f32 %v714_v8, %v1385_v0  ;;  %v746_v19 = vstv %s1401_s8  ;;  %s1084_s8 = sld [smem:[#allocation2 + $0x2a]] }
  0xa1   : > { %v244_v22 = vpop.permute.xlu0 %243 }
  0xa2   : > { %v246_v28 = vadd.f32 %v244_v22, %v238_v20  ;;  %v252_v29 = vpop.permute.xlu1 %251  ;;  %v754_v22 = vstv %s1405_s12  ;;  %s1085_s12 = sld [smem:[#allocation2 + $0x5b]] }
  0xa3   : > { %635 = vrot.lane.b32.xlu2 %v633_v36, %s1162_s3 }
  0xa4   : > { %v254_v33 = vadd.f32 %v252_v29, %v246_v28  ;;  %v376_v29 = vstv %s1025_s15 }
  0xa5   : > { %v342_v44 = vpop.permute.xlu2 %341 }
  0xa6   : > { %v262_v38 = vadd.f32 %v260_v61, %v254_v33  ;;  %v755_v33 = vmul.f32 %v1392_v55, %v754_v22 }
  0xa7   : > { %643 = vrot.lane.b32.xlu0 %v641_v32, %s1163_s5  ;;  %v372_v32 = vmul.f32 %v371_v21, %v1258_v50  ;;  %v844_v21 = vstv %s1092_s30 }
  0xa8   : > { %v267_v39 = vadd.f32 %v266_v34, %v262_v38  ;;  %651 = vrot.lane.b32.xlu1 %v649_v35, %s1163_s5  ;;  %v739_v34 = vmul.f32 %v1392_v55, %v738_v23  ;;  %v377_v35 = vmul.f32 %v1262_v52, %v376_v29  ;;  %v770_v38 = vstv %s1413_s16 }
  0xa9   : > { %v278_v24 = vpop.permute.xlu0 %277  ;;  %v771_v42 = vmul.f32 %v1392_v55, %v770_v38  ;;  %v884_v38 = vstv %s1476_s6 }
  0xaa   : > { %v272_v26 = vadd.f32 %v271_v37, %v267_v39  ;;  %v286_v43 = vpop.permute.xlu1 %285  ;;  %v778_v39 = vstv %s1417_s17  ;;  %s155_s17 = scalar_lea.vmem %s1514_s2, %s994_s14 }
  0xab   : > { %659 = vrot.lane.b32.xlu2 %v657_v48, %s1164_s11  ;;  %v804_v48 = vstv %s1428_s19 }
  0xac   : > { %v280_v46 = vadd.f32 %v278_v24, %v272_v26 }
  0xad   : > { %v366_v61 = vpop.permute.xlu2 %365 }
  0xae   : > { %v288_v49 = vadd.f32 %v286_v43, %v280_v46  ;;  %v779_v43 = vmul.f32 %v778_v39, %v1385_v0 }
  0xaf   : > { %667 = vrot.lane.b32.xlu0 %v665_v45, %s1164_s11 }
  0xb0   : > { %v296_v5 = vadd.f32 %v294_v12, %v288_v49  ;;  %675 = vrot.lane.b32.xlu1 %v673_v47, %s1165_s13  ;;  %v723_v12 = vmul.f32 %v1392_v55, %v722_v4  ;;  %v1444_v47 = vld [vmem:[%s1198_s22 + $0x6] sm:$0xff]  ;;  %v836_v4 = vstv %s1447_s26 }
  0xb1   : > { %v302_v54 = vpop.permute.xlu0 %301 }
  0xb2   : > { %v304_v59 = vadd.f32 %v302_v54, %v296_v5  ;;  %v310_v60 = vpop.permute.xlu1 %309  ;;  %v1451_v5 = vld [vmem:[%s1198_s22 + $0x16] sm:$0xff]  ;;  %v786_v54 = vstv %s1083_s21  ;;  %s1460_s22 = sld [smem:[#allocation2 + $0x2e]] }
  0xb3   : > { %683 = vrot.lane.b32.xlu2 %v681_v2, %s1165_s13  ;;  %v828_v2 = vstv %s1440_s24 }
  0xb4   : > { %v312_v63 = vadd.f32 %v310_v60, %v304_v59  ;;  %v805_v60 = vmul.f32 %v804_v48, %v1444_v47 }
  0xb5   : > { %v400_v11 = vpop.permute.xlu2 %399 }
  0xb6   : > { %v320_v3 = vadd.f32 %v318_v30, %v312_v63  ;;  %v747_v30 = vmul.f32 %v746_v19, %v1385_v0  ;;  %v787_v63 = vmul.f32 %v1392_v55, %v786_v54  ;;  %v477_v19 = vstv %s1457_s28 }
  0xb7   : > { %701 = vrot.lane.b32.xlu0 %v699_v62, %s1160_s23  ;;  %v813_v62 = vmul.f32 %v1451_v5, %v812_v51 }
  0xb8   : > { %709 = vrot.lane.b32.xlu1 %v707_v1, %s1160_s23 }
  0xb9   : > { %v326_v6 = vpop.permute.xlu0 %325 }
  0xba   : > { %v328_v9 = vadd.f32 %v326_v6, %v320_v3  ;;  %v334_v10 = vpop.permute.xlu1 %333  ;;  %v820_v6 = vstv %s1089_s27 }
  0xbb   : > { %717 = vrot.lane.b32.xlu2 %v715_v17, %s1161_s25  ;;  %v852_v17 = vstv %s1460_s22 }
  0xbc   : > { %v336_v13 = vadd.f32 %v334_v10, %v328_v9  ;;  %v829_v10 = vmul.f32 %v1451_v5, %v828_v2 }
  0xbd   : > { %v424_v28 = vpop.permute.xlu2 %423 }
  0xbe   : > { %v344_v18 = vadd.f32 %v342_v44, %v336_v13  ;;  %v763_v44 = vmul.f32 %v762_v40, %v1385_v0  ;;  %v821_v13 = vmul.f32 %v820_v6, %v1444_v47 }
  0xbf   : > { %725 = vrot.lane.b32.xlu0 %v723_v12, %s1161_s25  ;;  %v837_v12 = vmul.f32 %v836_v4, %v1444_v47 }
  0xc0   : > { %733 = vrot.lane.b32.xlu1 %v731_v15, %s1162_s3 }
  0xc1   : > { %v350_v20 = vpop.permute.xlu0 %349 }
  0xc2   : > { %v352_v25 = vadd.f32 %v350_v20, %v344_v18  ;;  %v358_v27 = vpop.permute.xlu1 %357  ;;  %v860_v20 = vstv %s1464_s29 }
  0xc3   : > { %741 = vrot.lane.b32.xlu2 %v739_v34, %s1162_s3 }
  0xc4   : > { %v360_v31 = vadd.f32 %v358_v27, %v352_v25  ;;  %v482_v27 = vstv %s1040_s4 }
  0xc5   : > { %v448_v41 = vpop.permute.xlu2 %447 }
  0xc6   : > { %v368_v36 = vadd.f32 %v366_v61, %v360_v31  ;;  %v861_v31 = vmul.f32 %v1451_v5, %v860_v20 }
  0xc7   : > { %749 = vrot.lane.b32.xlu0 %v747_v30, %s1163_s5  ;;  %v478_v30 = vmul.f32 %v477_v19, %v1288_v14 }
  0xc8   : > { %v373_v37 = vadd.f32 %v372_v32, %v368_v36  ;;  %757 = vrot.lane.b32.xlu1 %v755_v33, %s1163_s5  ;;  %v845_v32 = vmul.f32 %v1451_v5, %v844_v21  ;;  %v483_v33 = vmul.f32 %v1292_v16, %v482_v27  ;;  %v885_v16 = vmul.f32 %v884_v38, %v1444_v47 }
  0xc9   : > { %v384_v50 = vpop.permute.xlu0 %383 }
  0xca   : > { %v378_v52 = vadd.f32 %v377_v35, %v373_v37  ;;  %v392_v24 = vpop.permute.xlu1 %391 }
  0xcb   : > { %765 = vrot.lane.b32.xlu2 %v763_v44, %s1164_s11 }
  0xcc   : > { %v386_v26 = vadd.f32 %v384_v50, %v378_v52  ;;  %v868_v50 = vstv %s1095_s7 }
  0xcd   : > { %v472_v59 = vpop.permute.xlu2 %471 }
  0xce   : > { %v394_v45 = vadd.f32 %v392_v24, %v386_v26 }
  0xcf   : > { %773 = vrot.lane.b32.xlu0 %v771_v42, %s1164_s11 }
  0xd0   : > { %v402_v46 = vadd.f32 %v400_v11, %v394_v45  ;;  %781 = vrot.lane.b32.xlu1 %v779_v43, %s1165_s13 }
  0xd1   : > { %v408_v49 = vpop.permute.xlu0 %407 }
  0xd2   : > { %v410_v57 = vadd.f32 %v408_v49, %v402_v46  ;;  %v416_v58 = vpop.permute.xlu1 %415 }
  0xd3   : > { %789 = vrot.lane.b32.xlu2 %v787_v63, %s1165_s13 }
  0xd4   : > { %v418_v61 = vadd.f32 %v416_v58, %v410_v57 }
  0xd5   : > { %v506_v9 = vpop.permute.xlu2 %505 }
  0xd6   : > { %v426_v1 = vadd.f32 %v424_v28, %v418_v61  ;;  %v853_v28 = vmul.f32 %v852_v17, %v1444_v47 }
  0xd7   : > { %807 = vrot.lane.b32.xlu0 %v805_v60, %s1160_s23 }
  0xd8   : > { %815 = vrot.lane.b32.xlu1 %v813_v62, %s1160_s23  ;;  %s1472_s23 = sld [smem:[#allocation2 + $0x60]] }
  0xd9   : > { %v432_v3 = vpop.permute.xlu0 %431 }
  0xda   : > { %v434_v7 = vadd.f32 %v432_v3, %v426_v1  ;;  %v440_v8 = vpop.permute.xlu1 %439 }
  0xdb   : > { %823 = vrot.lane.b32.xlu2 %v821_v13, %s1161_s25 }
  0xdc   : > { %v442_v11 = vadd.f32 %v440_v8, %v434_v7 }
  0xdd   : > { %v530_v25 = vpop.permute.xlu2 %529 }
  0xde   : > { %v450_v15 = vadd.f32 %v448_v41, %v442_v11  ;;  %v876_v36 = vstv %s1472_s23  ;;  %v869_v41 = vmul.f32 %v868_v50, %v1444_v47 }
  0xdf   : > { %831 = vrot.lane.b32.xlu0 %v829_v10, %s1161_s25  ;;  %s1098_s25 = sld [smem:[#allocation2 + $0x61]]  ;;  %v877_v52 = vmul.f32 %v1451_v5, %v876_v36 }
  0xe0   : > { %839 = vrot.lane.b32.xlu1 %v837_v12, %s1162_s3 }
  0xe1   : > { %v456_v18 = vpop.permute.xlu0 %455 }
  0xe2   : > { %v458_v22 = vadd.f32 %v456_v18, %v450_v15  ;;  %v464_v23 = vpop.permute.xlu1 %463 }
  0xe3   : > { %847 = vrot.lane.b32.xlu2 %v845_v32, %s1162_s3  ;;  %s1054_s3 = sld [smem:[#allocation2 + $0x1c]] }
  0xe4   : > { %v466_v29 = vadd.f32 %v464_v23, %v458_v22 }
  0xe5   : > { %v554_v40 = vpop.permute.xlu2 %553  ;;  %v892_v44 = vstv %s1098_s25 }
  0xe6   : > { %v474_v34 = vadd.f32 %v472_v59, %v466_v29  ;;  %v893_v51 = vmul.f32 %v1451_v5, %v892_v44 }
  0xe7   : > { %855 = vrot.lane.b32.xlu0 %v853_v28, %s1163_s5 }
  0xe8   : > { %v479_v35 = vadd.f32 %v478_v30, %v474_v34  ;;  %863 = vrot.lane.b32.xlu1 %v861_v31, %s1163_s5  ;;  %s1055_s5 = sld [smem:[#allocation2 + $0x4d]] }
  0xe9   : > { %v490_v37 = vpop.permute.xlu0 %489  ;;  %v583_v1 = vstv %s1054_s3 }
  0xea   : > { %v484_v14 = vadd.f32 %v483_v33, %v479_v35  ;;  %v498_v39 = vpop.permute.xlu1 %497  ;;  %v584_v8 = vmul.f32 %v583_v1, %v1326_v53  ;;  %v800_v1 = vstv %s1085_s12 }
  0xeb   : > { %871 = vrot.lane.b32.xlu2 %v869_v41, %s1164_s11 }
  0xec   : > { %v492_v24 = vadd.f32 %v490_v37, %v484_v14 }
  0xed   : > { %v578_v48 = vpop.permute.xlu2 %577 }
  0xee   : > { %v500_v42 = vadd.f32 %v498_v39, %v492_v24  ;;  %v588_v6 = vstv %s1055_s5 }
  0xef   : > { %879 = vrot.lane.b32.xlu0 %v877_v52, %s1164_s11  ;;  %s1069_s11 = sld [smem:[#allocation2 + $0x23]] }
  0xf0   : > { %v508_v26 = vadd.f32 %v506_v9, %v500_v42  ;;  %887 = vrot.lane.b32.xlu1 %v885_v16, %s1165_s13  ;;  %v589_v9 = vmul.f32 %v1333_v56, %v588_v6 }
  0xf1   : > { %v514_v43 = vpop.permute.xlu0 %513 }
  0xf2   : > { %v516_v45 = vadd.f32 %v514_v43, %v508_v26  ;;  %v522_v46 = vpop.permute.xlu1 %521 }
  0xf3   : > { %895 = vrot.lane.b32.xlu2 %v893_v51, %s1165_s13  ;;  %s1070_s13 = sld [smem:[#allocation2 + $0x54]] }
  0xf4   : > { %v524_v49 = vadd.f32 %v522_v46, %v516_v45 }
  0xf5   : > { %v612_v60 = vpop.permute.xlu2 %611  ;;  %v689_v34 = vstv %s1069_s11 }
  0xf6   : > { %v532_v54 = vadd.f32 %v530_v25, %v524_v49  ;;  %v690_v50 = vmul.f32 %v689_v34, %v1385_v0 }
  0xf9   : > { %v538_v57 = vpop.permute.xlu0 %537  ;;  %v694_v37 = vstv %s1070_s13 }
  0xfa   : > { %v540_v58 = vadd.f32 %v538_v57, %v532_v54  ;;  %v546_v59 = vpop.permute.xlu1 %545  ;;  %v695_v39 = vmul.f32 %v1392_v55, %v694_v37 }
  0xfc   : > { %v548_v61 = vadd.f32 %v546_v59, %v540_v58 }
  0xfd   : > { %v636_v4 = vpop.permute.xlu2 %635 }
  0xfe   : > { %v556_v62 = vadd.f32 %v554_v40, %v548_v61  ;;  %v795_v61 = vstv %s1084_s8 }
 0x101   : > { %v562_v63 = vpop.permute.xlu0 %561 }
 0x102   : > { %v564_v2 = vadd.f32 %v562_v63, %v556_v62  ;;  %v570_v3 = vpop.permute.xlu1 %569 }
 0x104   : > { %v572_v7 = vadd.f32 %v570_v3, %v564_v2  ;;  %v796_v3 = vmul.f32 %v795_v61, %v1444_v47 }
 0x105   : > { %v660_v17 = vpop.permute.xlu2 %659 }
 0x106   : > { %v580_v10 = vadd.f32 %v578_v48, %v572_v7  ;;  %v801_v7 = vmul.f32 %v1451_v5, %v800_v1 }
 0x108   : > { %v585_v11 = vadd.f32 %v584_v8, %v580_v10 }
 0x109   : > { %v596_v12 = vpop.permute.xlu0 %595 }
 0x10a   : > { %v590_v13 = vadd.f32 %v589_v9, %v585_v11  ;;  %v604_v15 = vpop.permute.xlu1 %603 }
 0x10c   : > { %v598_v18 = vadd.f32 %v596_v12, %v590_v13 }
 0x10d   : > { %v684_v25 = vpop.permute.xlu2 %683 }
 0x10e   : > { %v606_v19 = vadd.f32 %v604_v15, %v598_v18 }
 0x110   : > { %v614_v20 = vadd.f32 %v612_v60, %v606_v19 }
 0x111   : > { %v620_v21 = vpop.permute.xlu0 %619 }
 0x112   : > { %v622_v22 = vadd.f32 %v620_v21, %v614_v20  ;;  %v628_v23 = vpop.permute.xlu1 %627 }
 0x114   : > { %v630_v27 = vadd.f32 %v628_v23, %v622_v22 }
 0x115   : > { %v718_v31 = vpop.permute.xlu2 %717 }
 0x116   : > { %v638_v28 = vadd.f32 %v636_v4, %v630_v27 }
 0x119   : > { %v644_v29 = vpop.permute.xlu0 %643 }
 0x11a   : > { %v646_v53 = vadd.f32 %v644_v29, %v638_v28  ;;  %v652_v30 = vpop.permute.xlu1 %651 }
 0x11c   : > { %v654_v56 = vadd.f32 %v652_v30, %v646_v53 }
 0x11d   : > { %v742_v40 = vpop.permute.xlu2 %741 }
 0x11e   : > { %v662_v32 = vadd.f32 %v660_v17, %v654_v56 }
 0x121   : > { %v668_v33 = vpop.permute.xlu0 %667 }
 0x122   : > { %v670_v35 = vadd.f32 %v668_v33, %v662_v32  ;;  %v676_v36 = vpop.permute.xlu1 %675 }
 0x124   : > { %v678_v38 = vadd.f32 %v676_v36, %v670_v35 }
 0x125   : > { %v766_v45 = vpop.permute.xlu2 %765 }
 0x126   : > { %v686_v14 = vadd.f32 %v684_v25, %v678_v38 }
 0x128   : > { %v691_v52 = vadd.f32 %v690_v50, %v686_v14 }
 0x129   : > { %v702_v24 = vpop.permute.xlu0 %701 }
 0x12a   : > { %v696_v16 = vadd.f32 %v695_v39, %v691_v52  ;;  %v710_v41 = vpop.permute.xlu1 %709 }
 0x12c   : > { %v704_v42 = vadd.f32 %v702_v24, %v696_v16 }
 0x12d   : > { %v790_v58 = vpop.permute.xlu2 %789 }
 0x12e   : > { %v712_v26 = vadd.f32 %v710_v41, %v704_v42 }
 0x130   : > { %v720_v43 = vadd.f32 %v718_v31, %v712_v26 }
 0x131   : > { %v726_v44 = vpop.permute.xlu0 %725 }
 0x132   : > { %v728_v46 = vadd.f32 %v726_v44, %v720_v43  ;;  %v734_v48 = vpop.permute.xlu1 %733 }
 0x134   : > { %v736_v49 = vadd.f32 %v734_v48, %v728_v46 }
 0x135   : > { %v824_v4 = vpop.permute.xlu2 %823 }
 0x136   : > { %v744_v51 = vadd.f32 %v742_v40, %v736_v49 }
 0x139   : > { %v750_v54 = vpop.permute.xlu0 %749 }
 0x13a   : > { %v752_v0 = vadd.f32 %v750_v54, %v744_v51  ;;  %v758_v57 = vpop.permute.xlu1 %757 }
 0x13c   : > { %v760_v55 = vadd.f32 %v758_v57, %v752_v0 }
 0x13d   : > { %v848_v15 = vpop.permute.xlu2 %847 }
 0x13e   : > { %v768_v59 = vadd.f32 %v766_v45, %v760_v55 }
 0x141   : > { %v774_v60 = vpop.permute.xlu0 %773 }
 0x142   : > { %v776_v62 = vadd.f32 %v774_v60, %v768_v59  ;;  %v782_v63 = vpop.permute.xlu1 %781 }
 0x144   : > { %v784_v2 = vadd.f32 %v782_v63, %v776_v62 }
 0x145   : > { %v872_v25 = vpop.permute.xlu2 %871 }
 0x146   : > { %v792_v6 = vadd.f32 %v790_v58, %v784_v2 }
 0x148   : > { %v797_v8 = vadd.f32 %v796_v3, %v792_v6 }
 0x149   : > { %v808_v9 = vpop.permute.xlu0 %807 }
 0x14a   : > { %v802_v10 = vadd.f32 %v801_v7, %v797_v8  ;;  %v816_v11 = vpop.permute.xlu1 %815 }
 0x14c   : > { %v810_v12 = vadd.f32 %v808_v9, %v802_v10 }
 0x14d   : > { %v896_v56 = vpop.permute.xlu2 %895 }
 0x14e   : > { %v818_v13 = vadd.f32 %v816_v11, %v810_v12 }
 0x150   : > { %v826_v17 = vadd.f32 %v824_v4, %v818_v13 }
 0x151   : > { %v832_v18 = vpop.permute.xlu0 %831 }
 0x152   : > { %v834_v19 = vadd.f32 %v832_v18, %v826_v17  ;;  %v840_v20 = vpop.permute.xlu1 %839 }
 0x154   : > { %v842_v21 = vadd.f32 %v840_v20, %v834_v19 }
 0x156   : > { %v850_v22 = vadd.f32 %v848_v15, %v842_v21 }
 0x159   : > { %v856_v23 = vpop.permute.xlu0 %855 }
 0x15a   : > { %v858_v47 = vadd.f32 %v856_v23, %v850_v22  ;;  %v864_v27 = vpop.permute.xlu1 %863 }
 0x15c   : > { %v866_v28 = vadd.f32 %v864_v27, %v858_v47 }
 0x15e   : > { %v874_v29 = vadd.f32 %v872_v25, %v866_v28 }
 0x161   : > { %v880_v5 = vpop.permute.xlu0 %879 }
 0x162   : > { %v882_v53 = vadd.f32 %v880_v5, %v874_v29  ;;  %v888_v30 = vpop.permute.xlu1 %887 }
 0x164   : > { %v890_v31 = vadd.f32 %v888_v30, %v882_v53 }
 0x166   : > { %v898_v32 = vadd.f32 %v896_v56, %v890_v31 }
 0x168   : > { %v1099_v33 = vmul.f32 -1.442695, %v898_v32 }
 0x16a   : > { %1128 = vpow2.f32 %v1099_v33 }
 0x170   : > { %v1129_v34 = vpop.eup %1128 }
 0x171   : > { %v902_v35 = vadd.f32 1.0, %v1129_v34 }
 0x173   : > { %1130 = vrcp.f32 %v902_v35  ;;  %v914_v50 = vand.u32 2147483648, %v902_v35  ;;  %v912_v39 = vand.u32 2147483647, %v902_v35  ;;  %vm908_vm1 = vweird.f32 %v902_v35 }
 0x175   : > { %v915_v52 = vor.u32 1.1754944e-38, %v914_v50  ;;  %vm913_vm4 = vcmp.eq.f32.partialorder %v912_v39, 8.507059e+37 }
 0x179   : > { %v1131_v36 = vpop.eup %1130 }
 0x17a   : > { %v904_v37 = vmul.f32 %v1131_v36, %v902_v35  ;;  %vm909_vm0 = vweird.f32 %v1131_v36 }
 0x17b   : > { %vm910_vm3 = vmor %vm908_vm1, %vm909_vm0 }
 0x17c   : > { %v905_v38 = vsub.f32 1.0, %v904_v37 }
 0x17e   : > { %v906_v14 = vmul.f32 %v1131_v36, %v905_v38 }
 0x180   : > { %v907_v40 = vadd.f32 %v1131_v36, %v906_v14 }
 0x182   : > { %v911_v24 = vsel %vm910_vm3, %v1131_v36, %v907_v40 }
 0x183   : > { %v916_v16 = vsel %vm913_vm4, %v915_v52, %v911_v24 }
 0x184   : > { %919 = vst.msk [vmem:[%s155_s17] sm:$0xff] %vm918_vm2, %v916_v16 }
 0x185 PF: > { %s13_s9 = sadd.s32 1, %s1157_s9  }
 0x186   : > { %p10_p7 = scmp.ge.s32.totalorder %s13_s9, 4  }
 0x188   :  { %12 = sbr.rel (!%p10_p7) target bundleno = 1 (0x1), region = 64 }
 0x18d   :  { %939 = vsyncpa [#allocation3], 1 }
 0x18e   :  { %941 = vsyncpa [#allocation3 + $0x1], 1 }

</bundles_post_ra>
